<compile_context>
chip_gen: v7x
topology: tpu7x:2x2x1
jax: 0.10.0
libtpu: 0.0.40
codegen_flags: <defaults>
</compile_context>

<pallas_src>
import functools

import numpy as np
import jax
import jax.numpy as jnp
from jax import lax
from jax.experimental import pallas as pl
from jax.experimental.pallas import tpu as pltpu


# ------------------------------ Fused kernel ------------------------------- #

def _bottleneck_kernel(x_ref, w1_ref, b1_ref, w2_ref, b2_ref, w3_ref, b3_ref,
                       o_ref, patch_ref, *, stride, has_shortcut, cdt):
    """Fully fused pre-activation Bottleneck for one NHWC image.

    Refs:
      x (1,H,W,Cin), w1 (Cin,P), b1 (1,P), w2 (9P,P), b2 (1,P),
      w3f (P[+Cin],Cout), b3f (1,Cout)   (shortcut conv fused into w3f/b3f),
      o (1,Ho,Wo,Cout)                    output,
      patch (Ho*Wo, 9P)                   VMEM scratch for the im2col patch matrix.
    """
    _, H, W, Cin = x_ref.shape
    P = w1_ref.shape[1]
    _, Ho, Wo, Cout = o_ref.shape
    m_out = Ho * Wo

    # ---- relu(x), shared by conv1 and the projection shortcut ---------------
    x = x_ref[0]                                            # (H, W, Cin)
    xr = jnp.maximum(x, 0.0).astype(cdt)                    # relu(x)

    # ---- conv1: 1x1 ----------------------------------------------------------
    h1 = jnp.dot(xr.reshape(H * W, Cin), w1_ref[...].astype(cdt),
                 preferred_element_type=jnp.float32)
    h1 = jnp.maximum(h1 + b1_ref[...], 0.0)                 # relu before conv2
    h1 = h1.astype(cdt).reshape(H, W, P)

    # ---- conv2: 3x3, padding=1, stride, as ONE im2col matmul -----------------
    # Zero-pad in VMEM (no HBM pad pass).  The 9 taps are sliced at the *strided*
    # output positions (so downsampling blocks do ~stride^2 less MXU work) and
    # written straight into the patch scratch -> single MXU contraction over K=9P.
    zr = jnp.zeros((1, W, P), cdt)
    hp = jnp.concatenate([zr, h1, zr], axis=0)              # (H+2, W,   P)
    zc = jnp.zeros((H + 2, 1, P), cdt)
    hp = jnp.concatenate([zc, hp, zc], axis=1)              # (H+2, W+2, P)
    for ky in range(3):
        for kx in range(3):
            t = ky * 3 + kx
            tap = hp[ky:ky + H:stride, kx:kx + W:stride, :]  # (Ho, Wo, P)
            patch_ref[:, t * P:(t + 1) * P] = tap.reshape(m_out, P)
    h2 = jnp.dot(patch_ref[...], w2_ref[...].astype(cdt),
                 preferred_element_type=jnp.float32)
    h2 = jnp.maximum(h2 + b2_ref[...], 0.0).astype(cdt)     # relu before conv3

    # ---- conv3: 1x1, fused with the projection shortcut conv -----------------
    if has_shortcut:
        # Strided relu(x) comes straight from the VMEM-resident x block.
        xs = xr[::stride, ::stride, :].reshape(m_out, Cin)
        k_in = jnp.concatenate([h2, xs], axis=1)            # (m_out, P+Cin)
    else:
        k_in = h2                                           # (m_out, P)
    h3 = jnp.dot(k_in, w3_ref[...].astype(cdt),
                 preferred_element_type=jnp.float32) + b3_ref[...]

    if not has_shortcut:
        h3 = h3 + x.reshape(m_out, Cout)                    # identity: raw x (not relu)

    o_ref[0] = h3.reshape(Ho, Wo, Cout).astype(o_ref.dtype)


# -------------------------------- Wrapper ----------------------------------- #

def bottleneck_forward_nhwc(x, params, *, stride=1, expansion=4,
                            compute_dtype=jnp.bfloat16):
    """Fused Bottleneck forward in NHWC. One pallas_call, grid over batch."""
    N, H, W, Cin = x.shape
    P = params["w1"].shape[1]
    Cout = P * expansion
    has_shortcut = (stride != 1) or (Cin != Cout)
    Ho = (H - 1) // stride + 1
    Wo = (W - 1) // stride + 1
    m_out = Ho * Wo

    # Fuse conv3 + shortcut conv into one K-stacked weight / summed bias.
    if has_shortcut:
        w3f = jnp.concatenate([params["w3"], params["w_sc"]], axis=0)   # (P+Cin, Cout)
        b3f = (params["b3"] + params["b_sc"]).reshape(1, Cout)
    else:
        w3f = params["w3"]                                              # (P, Cout)
        b3f = params["b3"].reshape(1, Cout)
    K3 = w3f.shape[0]

    inputs = [x,
              params["w1"], params["b1"].reshape(1, P),
              params["w2"].reshape(9 * P, P), params["b2"].reshape(1, P),
              w3f, b3f]
    in_specs = [
        pl.BlockSpec((1, H, W, Cin), lambda n: (n, 0, 0, 0)),
        pl.BlockSpec((Cin, P), lambda n: (0, 0)),
        pl.BlockSpec((1, P), lambda n: (0, 0)),
        pl.BlockSpec((9 * P, P), lambda n: (0, 0)),
        pl.BlockSpec((1, P), lambda n: (0, 0)),
        pl.BlockSpec((K3, Cout), lambda n: (0, 0)),
        pl.BlockSpec((1, Cout), lambda n: (0, 0)),
    ]

    # ---- Advisory cost estimate (sel-free, strided-size conv2) ----------------
    flops = N * (2 * H * W * Cin * P            # conv1
                 + 2 * m_out * 9 * P * P        # conv2 (strided)
                 + 2 * m_out * K3 * Cout)       # conv3 (+ fused shortcut)
    bytes_accessed = (x.dtype.itemsize * N * (H * W * Cin + m_out * Cout)
                      + 4 * (Cin * P + 9 * P * P + K3 * Cout + 2 * P + Cout))

    # ---- Explicit VMEM budget (per grid step, with double-buffering) ----------
    cbytes = jnp.dtype(compute_dtype).itemsize
    abytes = x.dtype.itemsize
    x_blk = H * W * Cin * abytes
    o_blk = m_out * Cout * abytes
    w_tot = 4 * (Cin * P + 9 * P * P + K3 * Cout + 2 * P + Cout)
    scratch_b = m_out * 9 * P * cbytes
    temps = (H * W * Cin * cbytes                      # relu(x) in compute dtype
             + (H + 2) * (W + 2) * P * cbytes          # zero-padded conv1 output
             + H * W * P * (4 + cbytes)                # conv1 accumulator + cast
             + 2 * m_out * 9 * P * cbytes              # patch load + tap temp
             + m_out * P * (4 + cbytes)                # conv2 accumulator + cast
             + m_out * K3 * cbytes                     # fused conv3 K input
             + m_out * Cout * (4 + abytes))            # conv3 accumulator + out cast
    vmem_limit = int(2 * (x_blk + o_blk + w_tot) + scratch_b + 2 * temps + (16 << 20))
    vmem_limit = max(32 << 20, min(vmem_limit, 100 << 20))

    kernel = functools.partial(_bottleneck_kernel, stride=stride,
                               has_shortcut=has_shortcut, cdt=compute_dtype)
    return pl.pallas_call(
        kernel,
        out_shape=jax.ShapeDtypeStruct((N, Ho, Wo, Cout), x.dtype),
        grid=(N,),
        in_specs=in_specs,
        out_specs=pl.BlockSpec((1, Ho, Wo, Cout), lambda n: (n, 0, 0, 0)),
        scratch_shapes=[pltpu.VMEM((m_out, 9 * P), compute_dtype)],
        compiler_params=pltpu.CompilerParams(
            dimension_semantics=("parallel",),
            vmem_limit_bytes=vmem_limit),
        cost_estimate=pl.CostEstimate(flops=int(flops), transcendentals=0,
                                      bytes_accessed=int(bytes_accessed)),
    )(*inputs)


def bottleneck_forward(x_nchw, params, *, stride=1, expansion=4,
                       compute_dtype=jnp.bfloat16):
    # NOTE: in a stacked encoder keep activations NHWC (and bf16) and call
    # bottleneck_forward_nhwc directly; transpose only at the encoder boundary.
    x = jnp.transpose(x_nchw, (0, 2, 3, 1))           # NCHW -> NHWC
    out = bottleneck_forward_nhwc(x, params, stride=stride, expansion=expansion,
                                  compute_dtype=compute_dtype)
    return jnp.transpose(out, (0, 3, 1, 2))           # NHWC -> NCHW


# ------------------------------ Param init ---------------------------------- #

def init_bottleneck_params(key, inplanes, planes, stride=1, expansion=4):
    outplanes = planes * expansion
    keys = jax.random.split(key, 8)

    def u(k, shape, fan_in):
        bound = 1.0 / np.sqrt(fan_in)
        return jax.random.uniform(k, shape, jnp.float32, -bound, bound)

    params = {
        "w1": u(keys[0], (inplanes, planes), inplanes),            # 1x1
        "b1": u(keys[1], (planes,), inplanes),
        "w2": u(keys[2], (3, 3, planes, planes), planes * 9),      # 3x3 HWIO
        "b2": u(keys[3], (planes,), planes * 9),
        "w3": u(keys[4], (planes, outplanes), planes),             # 1x1
        "b3": u(keys[5], (outplanes,), planes),
    }
    if stride != 1 or inplanes != outplanes:
        params["w_sc"] = u(keys[6], (inplanes, outplanes), inplanes)
        params["b_sc"] = u(keys[7], (outplanes,), inplanes)
    return params


# ----------------------------- Pure-JAX reference --------------------------- #

def bottleneck_ref(x_nchw, params, *, stride=1, expansion=4):
    x = jnp.transpose(x_nchw, (0, 2, 3, 1))
    inplanes = x.shape[-1]
    planes = params["w1"].shape[1]
    outplanes = planes * expansion

    def conv(y, w_hwio, b, s, pad):
        o = lax.conv_general_dilated(
            y, w_hwio, (s, s), pad, dimension_numbers=("NHWC", "HWIO", "NHWC"))
        return o + b

    o = jax.nn.relu(x)
    if (stride != 1) or (inplanes != outplanes):
        sc = conv(o, params["w_sc"].reshape(1, 1, inplanes, outplanes),
                  params["b_sc"], stride, "VALID")
    else:
        sc = x
    out = conv(o, params["w1"].reshape(1, 1, inplanes, planes), params["b1"], 1, "VALID")
    out = conv(jax.nn.relu(out), params["w2"], params["b2"], stride, [(1, 1), (1, 1)])
    out = conv(jax.nn.relu(out), params["w3"].reshape(1, 1, planes, outplanes),
               params["b3"], 1, "VALID")
    out = out + sc
    return jnp.transpose(out, (0, 3, 1, 2))


# ----------------------------------- Main ----------------------------------- #

if __name__ == "__main__":
    key = jax.random.PRNGKey(0)
    k_x, k_p, k_p2 = jax.random.split(key, 3)

    N, inplanes, H, W = 2, 4, 16, 16
    planes, expansion = 4, 4   # inplanes != planes*expansion -> projection shortcut

    x = jax.random.normal(k_x, (N, inplanes, H, W), jnp.float32)
    params = init_bottleneck_params(k_p, inplanes, planes, stride=1,
                                    expansion=expansion)

    # 1) f32 compute path, stride=1: exact check against the lax.conv reference.
    out = jax.block_until_ready(bottleneck_forward(
        x, params, stride=1, expansion=expansion, compute_dtype=jnp.float32))
    ref = bottleneck_ref(x, params, stride=1, expansion=expansion)
    np.testing.assert_allclose(np.asarray(out), np.asarray(ref), rtol=2e-5, atol=2e-5)

    # 2) f32 compute path, stride=2 (downsampling block): exact check.
    out2 = jax.block_until_ready(bottleneck_forward(
        x, params, stride=2, expansion=expansion, compute_dtype=jnp.float32))
    ref2 = bottleneck_ref(x, params, stride=2, expansion=expansion)
    np.testing.assert_allclose(np.asarray(out2), np.asarray(ref2), rtol=2e-5, atol=2e-5)

    # 3) bf16 MXU path (default compute dtype), stride=1: loose check vs f32 ref.
    out3 = jax.block_until_ready(bottleneck_forward(
        x, params, stride=1, expansion=expansion, compute_dtype=jnp.bfloat16))
    np.testing.assert_allclose(np.asarray(out3), np.asarray(ref), rtol=5e-2, atol=5e-2)

    # 4) identity-shortcut block (inplanes == expansion*planes, stride=1).
    x_id = jax.random.normal(k_x, (N, planes * expansion, H, W), jnp.float32)
    params_id = init_bottleneck_params(k_p2, planes * expansion, planes, stride=1,
                                       expansion=expansion)
    out4 = jax.block_until_ready(bottleneck_forward(
        x_id, params_id, stride=1, expansion=expansion, compute_dtype=jnp.float32))
    ref4 = bottleneck_ref(x_id, params_id, stride=1, expansion=expansion)
    np.testing.assert_allclose(np.asarray(out4), np.asarray(ref4), rtol=2e-5, atol=2e-5)

    print("KERNEL_OK")
</pallas_src>

<mosaic_0001>
module attributes {stable_mosaic.version = 11 : i64} {
  func.func @_bottleneck_kernel(%arg0: i32, %arg1: memref<1x16x16x4xf32, #tpu.memory_space<vmem>>, %arg2: memref<4x4xf32, #tpu.memory_space<vmem>>, %arg3: memref<1x4xf32, #tpu.memory_space<vmem>>, %arg4: memref<36x4xf32, #tpu.memory_space<vmem>>, %arg5: memref<1x4xf32, #tpu.memory_space<vmem>>, %arg6: memref<8x16xf32, #tpu.memory_space<vmem>>, %arg7: memref<1x16xf32, #tpu.memory_space<vmem>>, %arg8: memref<1x16x16x16xf32, #tpu.memory_space<vmem>>, %arg9: memref<256x36xf32, #tpu.memory_space<vmem>>) attributes {dimension_semantics = [#tpu.dimension_semantics<parallel>], iteration_bounds = array<i64: 2>, scalar_prefetch = 0 : i64, scratch_operands = 1 : i64, tpu.core_type = #tpu.core_type<tc>, window_params = [{transform_indices = @transform_0, window_bounds = array<i64: 1, 16, 16, 4>}, {pipeline_mode = #tpu.pipeline_mode<synchronous>, transform_indices = @transform_1, window_bounds = array<i64: 4, 4>}, {pipeline_mode = #tpu.pipeline_mode<synchronous>, transform_indices = @transform_2, window_bounds = array<i64: 1, 4>}, {pipeline_mode = #tpu.pipeline_mode<synchronous>, transform_indices = @transform_3, window_bounds = array<i64: 36, 4>}, {pipeline_mode = #tpu.pipeline_mode<synchronous>, transform_indices = @transform_4, window_bounds = array<i64: 1, 4>}, {pipeline_mode = #tpu.pipeline_mode<synchronous>, transform_indices = @transform_5, window_bounds = array<i64: 8, 16>}, {pipeline_mode = #tpu.pipeline_mode<synchronous>, transform_indices = @transform_6, window_bounds = array<i64: 1, 16>}, {transform_indices = @transform_7, window_bounds = array<i64: 1, 16, 16, 16>}]} {
    %c0 = arith.constant 0 : index
    %c0_0 = arith.constant 0 : index
    %c0_1 = arith.constant 0 : index
    %c0_2 = arith.constant 0 : index
    %0 = vector.load %arg1[%c0, %c0_0, %c0_1, %c0_2] : memref<1x16x16x4xf32, #tpu.memory_space<vmem>>, vector<1x16x16x4xf32>
    %1 = vector.shape_cast %0 : vector<1x16x16x4xf32> to vector<16x16x4xf32>
    %cst = arith.constant 0.000000e+00 : f32
    %2 = vector.broadcast %cst : f32 to vector<16x16x4xf32>
    %3 = arith.maximumf %1, %2 : vector<16x16x4xf32>
    %4 = vector.shape_cast %3 : vector<16x16x4xf32> to vector<256x4xf32>
    %c0_3 = arith.constant 0 : index
    %c0_4 = arith.constant 0 : index
    %5 = vector.load %arg2[%c0_3, %c0_4] : memref<4x4xf32, #tpu.memory_space<vmem>>, vector<4x4xf32>
    %cst_5 = arith.constant dense<0.000000e+00> : vector<256x4xf32>
    %6 = tpu.matmul %4, %5, %cst_5 {dimension_numbers = #tpu.dot_dimension_numbers<[1], [0], [0], [1], [0, 0, 1, 1], [], []>} : vector<256x4xf32>, vector<4x4xf32>, vector<256x4xf32> -> vector<256x4xf32>
    %c0_6 = arith.constant 0 : index
    %c0_7 = arith.constant 0 : index
    %7 = vector.load %arg3[%c0_6, %c0_7] : memref<1x4xf32, #tpu.memory_space<vmem>>, vector<1x4xf32>
    %8 = vector.broadcast %7 : vector<1x4xf32> to vector<256x4xf32>
    %9 = arith.addf %6, %8 : vector<256x4xf32>
    %cst_8 = arith.constant 0.000000e+00 : f32
    %10 = vector.broadcast %cst_8 : f32 to vector<256x4xf32>
    %11 = arith.maximumf %9, %10 : vector<256x4xf32>
    %12 = vector.shape_cast %11 : vector<256x4xf32> to vector<16x16x4xf32>
    %cst_9 = arith.constant 0.000000e+00 : f32
    %13 = vector.broadcast %cst_9 : f32 to vector<1x16x4xf32>
    %14 = tpu.concatenate %13, %12, %13 in 0 : vector<1x16x4xf32>, vector<16x16x4xf32>, vector<1x16x4xf32> -> vector<18x16x4xf32>
    %cst_10 = arith.constant 0.000000e+00 : f32
    %15 = vector.broadcast %cst_10 : f32 to vector<18x1x4xf32>
    %16 = tpu.concatenate %15, %14, %15 in 1 : vector<18x1x4xf32>, vector<18x16x4xf32>, vector<18x1x4xf32> -> vector<18x18x4xf32>
    %17 = vector.extract_strided_slice %16 {offsets = [0, 0, 0], sizes = [16, 16, 4], strides = [1, 1, 1]} : vector<18x18x4xf32> to vector<16x16x4xf32>
    %18 = vector.shape_cast %17 : vector<16x16x4xf32> to vector<256x4xf32>
    %c0_11 = arith.constant 0 : index
    %c0_12 = arith.constant 0 : index
    %19 = vector.load %arg9[%c0_11, %c0_12] : memref<256x36xf32, #tpu.memory_space<vmem>>, vector<256x4xf32>
    tpu.vector_store %arg9[%c0_11, %c0_12], %18 {strides = array<i32>} : memref<256x36xf32, #tpu.memory_space<vmem>>, vector<256x4xf32>,
    %20 = vector.extract_strided_slice %16 {offsets = [0, 1, 0], sizes = [16, 16, 4], strides = [1, 1, 1]} : vector<18x18x4xf32> to vector<16x16x4xf32>
    %21 = vector.shape_cast %20 : vector<16x16x4xf32> to vector<256x4xf32>
    %c0_13 = arith.constant 0 : index
    %c4 = arith.constant 4 : index
    %22 = vector.load %arg9[%c0_13, %c4] : memref<256x36xf32, #tpu.memory_space<vmem>>, vector<256x4xf32>
    tpu.vector_store %arg9[%c0_13, %c4], %21 {strides = array<i32>} : memref<256x36xf32, #tpu.memory_space<vmem>>, vector<256x4xf32>,
    %23 = vector.extract_strided_slice %16 {offsets = [0, 2, 0], sizes = [16, 16, 4], strides = [1, 1, 1]} : vector<18x18x4xf32> to vector<16x16x4xf32>
    %24 = vector.shape_cast %23 : vector<16x16x4xf32> to vector<256x4xf32>
    %c0_14 = arith.constant 0 : index
    %c8 = arith.constant 8 : index
    %25 = vector.load %arg9[%c0_14, %c8] : memref<256x36xf32, #tpu.memory_space<vmem>>, vector<256x4xf32>
    tpu.vector_store %arg9[%c0_14, %c8], %24 {strides = array<i32>} : memref<256x36xf32, #tpu.memory_space<vmem>>, vector<256x4xf32>,
    %26 = vector.extract_strided_slice %16 {offsets = [1, 0, 0], sizes = [16, 16, 4], strides = [1, 1, 1]} : vector<18x18x4xf32> to vector<16x16x4xf32>
    %27 = vector.shape_cast %26 : vector<16x16x4xf32> to vector<256x4xf32>
    %c0_15 = arith.constant 0 : index
    %c12 = arith.constant 12 : index
    %28 = vector.load %arg9[%c0_15, %c12] : memref<256x36xf32, #tpu.memory_space<vmem>>, vector<256x4xf32>
    tpu.vector_store %arg9[%c0_15, %c12], %27 {strides = array<i32>} : memref<256x36xf32, #tpu.memory_space<vmem>>, vector<256x4xf32>,
    %29 = vector.extract_strided_slice %16 {offsets = [1, 1, 0], sizes = [16, 16, 4], strides = [1, 1, 1]} : vector<18x18x4xf32> to vector<16x16x4xf32>
    %30 = vector.shape_cast %29 : vector<16x16x4xf32> to vector<256x4xf32>
    %c0_16 = arith.constant 0 : index
    %c16 = arith.constant 16 : index
    %31 = vector.load %arg9[%c0_16, %c16] : memref<256x36xf32, #tpu.memory_space<vmem>>, vector<256x4xf32>
    tpu.vector_store %arg9[%c0_16, %c16], %30 {strides = array<i32>} : memref<256x36xf32, #tpu.memory_space<vmem>>, vector<256x4xf32>,
    %32 = vector.extract_strided_slice %16 {offsets = [1, 2, 0], sizes = [16, 16, 4], strides = [1, 1, 1]} : vector<18x18x4xf32> to vector<16x16x4xf32>
    %33 = vector.shape_cast %32 : vector<16x16x4xf32> to vector<256x4xf32>
    %c0_17 = arith.constant 0 : index
    %c20 = arith.constant 20 : index
    %34 = vector.load %arg9[%c0_17, %c20] : memref<256x36xf32, #tpu.memory_space<vmem>>, vector<256x4xf32>
    tpu.vector_store %arg9[%c0_17, %c20], %33 {strides = array<i32>} : memref<256x36xf32, #tpu.memory_space<vmem>>, vector<256x4xf32>,
    %35 = vector.extract_strided_slice %16 {offsets = [2, 0, 0], sizes = [16, 16, 4], strides = [1, 1, 1]} : vector<18x18x4xf32> to vector<16x16x4xf32>
    %36 = vector.shape_cast %35 : vector<16x16x4xf32> to vector<256x4xf32>
    %c0_18 = arith.constant 0 : index
    %c24 = arith.constant 24 : index
    %37 = vector.load %arg9[%c0_18, %c24] : memref<256x36xf32, #tpu.memory_space<vmem>>, vector<256x4xf32>
    tpu.vector_store %arg9[%c0_18, %c24], %36 {strides = array<i32>} : memref<256x36xf32, #tpu.memory_space<vmem>>, vector<256x4xf32>,
    %38 = vector.extract_strided_slice %16 {offsets = [2, 1, 0], sizes = [16, 16, 4], strides = [1, 1, 1]} : vector<18x18x4xf32> to vector<16x16x4xf32>
    %39 = vector.shape_cast %38 : vector<16x16x4xf32> to vector<256x4xf32>
    %c0_19 = arith.constant 0 : index
    %c28 = arith.constant 28 : index
    %40 = vector.load %arg9[%c0_19, %c28] : memref<256x36xf32, #tpu.memory_space<vmem>>, vector<256x4xf32>
    tpu.vector_store %arg9[%c0_19, %c28], %39 {strides = array<i32>} : memref<256x36xf32, #tpu.memory_space<vmem>>, vector<256x4xf32>,
    %41 = vector.extract_strided_slice %16 {offsets = [2, 2, 0], sizes = [16, 16, 4], strides = [1, 1, 1]} : vector<18x18x4xf32> to vector<16x16x4xf32>
    %42 = vector.shape_cast %41 : vector<16x16x4xf32> to vector<256x4xf32>
    %c0_20 = arith.constant 0 : index
    %c32 = arith.constant 32 : index
    %43 = vector.load %arg9[%c0_20, %c32] : memref<256x36xf32, #tpu.memory_space<vmem>>, vector<256x4xf32>
    tpu.vector_store %arg9[%c0_20, %c32], %42 {strides = array<i32>} : memref<256x36xf32, #tpu.memory_space<vmem>>, vector<256x4xf32>,
    %c0_21 = arith.constant 0 : index
    %c0_22 = arith.constant 0 : index
    %44 = vector.load %arg9[%c0_21, %c0_22] : memref<256x36xf32, #tpu.memory_space<vmem>>, vector<256x36xf32>
    %c0_23 = arith.constant 0 : index
    %c0_24 = arith.constant 0 : index
    %45 = vector.load %arg4[%c0_23, %c0_24] : memref<36x4xf32, #tpu.memory_space<vmem>>, vector<36x4xf32>
    %cst_25 = arith.constant dense<0.000000e+00> : vector<256x4xf32>
    %46 = tpu.matmul %44, %45, %cst_25 {dimension_numbers = #tpu.dot_dimension_numbers<[1], [0], [0], [1], [0, 0, 1, 1], [], []>} : vector<256x36xf32>, vector<36x4xf32>, vector<256x4xf32> -> vector<256x4xf32>
    %c0_26 = arith.constant 0 : index
    %c0_27 = arith.constant 0 : index
    %47 = vector.load %arg5[%c0_26, %c0_27] : memref<1x4xf32, #tpu.memory_space<vmem>>, vector<1x4xf32>
    %48 = vector.broadcast %47 : vector<1x4xf32> to vector<256x4xf32>
    %49 = arith.addf %46, %48 : vector<256x4xf32>
    %cst_28 = arith.constant 0.000000e+00 : f32
    %50 = vector.broadcast %cst_28 : f32 to vector<256x4xf32>
    %51 = arith.maximumf %49, %50 : vector<256x4xf32>
    %52 = vector.shape_cast %3 : vector<16x16x4xf32> to vector<256x4xf32>
    %53 = tpu.concatenate %51, %52 in 1 : vector<256x4xf32>, vector<256x4xf32> -> vector<256x8xf32>
    %c0_29 = arith.constant 0 : index
    %c0_30 = arith.constant 0 : index
    %54 = vector.load %arg6[%c0_29, %c0_30] : memref<8x16xf32, #tpu.memory_space<vmem>>, vector<8x16xf32>
    %cst_31 = arith.constant dense<0.000000e+00> : vector<256x16xf32>
    %55 = tpu.matmul %53, %54, %cst_31 {dimension_numbers = #tpu.dot_dimension_numbers<[1], [0], [0], [1], [0, 0, 1, 1], [], []>} : vector<256x8xf32>, vector<8x16xf32>, vector<256x16xf32> -> vector<256x16xf32>
    %c0_32 = arith.constant 0 : index
    %c0_33 = arith.constant 0 : index
    %56 = vector.load %arg7[%c0_32, %c0_33] : memref<1x16xf32, #tpu.memory_space<vmem>>, vector<1x16xf32>
    %57 = vector.broadcast %56 : vector<1x16xf32> to vector<256x16xf32>
    %58 = arith.addf %55, %57 : vector<256x16xf32>
    %59 = vector.shape_cast %58 : vector<256x16xf32> to vector<16x16x16xf32>
    %c0_34 = arith.constant 0 : index
    %c0_35 = arith.constant 0 : index
    %c0_36 = arith.constant 0 : index
    %c0_37 = arith.constant 0 : index
    %60 = vector.load %arg8[%c0_34, %c0_35, %c0_36, %c0_37] : memref<1x16x16x16xf32, #tpu.memory_space<vmem>>, vector<1x16x16x16xf32>
    %61 = vector.shape_cast %60 : vector<1x16x16x16xf32> to vector<16x16x16xf32>
    %62 = vector.shape_cast %59 : vector<16x16x16xf32> to vector<1x16x16x16xf32>
    tpu.vector_store %arg8[%c0_34, %c0_35, %c0_36, %c0_37], %62 {strides = array<i32>} : memref<1x16x16x16xf32, #tpu.memory_space<vmem>>, vector<1x16x16x16xf32>,
    return
  }
  func.func @transform_0(%arg0: i32) -> (i32, i32, i32, i32) {
    %c0_i32 = arith.constant 0 : i32
    %c0_i32_0 = arith.constant 0 : i32
    %c0_i32_1 = arith.constant 0 : i32
    %c0_i32_2 = arith.constant 0 : i32
    return %arg0, %c0_i32, %c0_i32_0, %c0_i32_1 : i32, i32, i32, i32
  }
  func.func @transform_1(%arg0: i32) -> (i32, i32) {
    %c0_i32 = arith.constant 0 : i32
    %c0_i32_0 = arith.constant 0 : i32
    %c0_i32_1 = arith.constant 0 : i32
    return %c0_i32, %c0_i32_0 : i32, i32
  }
  func.func @transform_2(%arg0: i32) -> (i32, i32) {
    %c0_i32 = arith.constant 0 : i32
    %c0_i32_0 = arith.constant 0 : i32
    %c0_i32_1 = arith.constant 0 : i32
    return %c0_i32, %c0_i32_0 : i32, i32
  }
  func.func @transform_3(%arg0: i32) -> (i32, i32) {
    %c0_i32 = arith.constant 0 : i32
    %c0_i32_0 = arith.constant 0 : i32
    %c0_i32_1 = arith.constant 0 : i32
    return %c0_i32, %c0_i32_0 : i32, i32
  }
  func.func @transform_4(%arg0: i32) -> (i32, i32) {
    %c0_i32 = arith.constant 0 : i32
    %c0_i32_0 = arith.constant 0 : i32
    %c0_i32_1 = arith.constant 0 : i32
    return %c0_i32, %c0_i32_0 : i32, i32
  }
  func.func @transform_5(%arg0: i32) -> (i32, i32) {
    %c0_i32 = arith.constant 0 : i32
    %c0_i32_0 = arith.constant 0 : i32
    %c0_i32_1 = arith.constant 0 : i32
    return %c0_i32, %c0_i32_0 : i32, i32
  }
  func.func @transform_6(%arg0: i32) -> (i32, i32) {
    %c0_i32 = arith.constant 0 : i32
    %c0_i32_0 = arith.constant 0 : i32
    %c0_i32_1 = arith.constant 0 : i32
    return %c0_i32, %c0_i32_0 : i32, i32
  }
  func.func @transform_7(%arg0: i32) -> (i32, i32, i32, i32) {
    %c0_i32 = arith.constant 0 : i32
    %c0_i32_0 = arith.constant 0 : i32
    %c0_i32_1 = arith.constant 0 : i32
    %c0_i32_2 = arith.constant 0 : i32
    return %arg0, %c0_i32, %c0_i32_0, %c0_i32_1 : i32, i32, i32, i32
  }
}

</mosaic_0001>

<bundles_post_ra>
// kernel: tpu_custom_call.1
= control target key start
LH: loop header
LB: loop body
LE: loop exit
PB: predicated region body
PF: predicated region fallthrough
CT: control target
= control target key end

     0   :  { %12 = vsyncpa [#allocation4], 0  ;;  %s5540_s0 = inlined_call_operand.vmem [shape: f32[2,16,16,4], index: 0, kind: input, shape index: {}]   ;;  %s5541_s1 = inlined_call_operand.vmem [shape: f32[4,4], index: 1, kind: input, shape index: {}]   ;;  %s5542_s2 = inlined_call_operand.vmem [shape: f32[1,4], index: 2, kind: input, shape index: {}]   ;;  %s5543_s3 = inlined_call_operand.vmem [shape: f32[36,4], index: 3, kind: input, shape index: {}]   ;;  %s5544_s4 = inlined_call_operand.vmem [shape: f32[1,4], index: 4, kind: input, shape index: {}]   ;;  %s5545_s5 = inlined_call_operand.vmem [shape: f32[8,16], index: 5, kind: input, shape index: {}]   ;;  %s5546_s6 = inlined_call_operand.vmem [shape: f32[1,16], index: 6, kind: input, shape index: {}]   ;;  %s5547_s7 = inlined_call_operand.hbm [shape: f32[2,16,16,16], index: 7, kind: output, shape index: {}]  }
   0x1   :  { %14 = vsyncpa [#allocation4 + $0x1], 0  ;;  %s3688_s24 = smov 0   ;;  %s3690_s25 = smov 0  }
   0x2   :  { %s3692_s26 = smov 0   ;;  %s3694_s27 = smov 0  }
   0x3 LB: > { %s3709_s28 = sadd.s32 4294967295, %s3635_s27   ;;  %s3112_s29 = sadd.s32 4294967294, %s3635_s27   ;;  %s3635_s27 = sphi %s3694_s27, %s5658_s27   ;;  %s3631_s26 = sphi %s3692_s26, %s5657_s26   ;;  %s3627_s25 = sphi %s3690_s25, %s5656_s25   ;;  %s3623_s24 = sphi %s3688_s24, %s5655_s24  }
   0x4   : > { %s3713_s30 = sadd.s32 1, %s3635_s27   ;;  %s179_s8 = sadd.s32 1, %s3631_s26 }
   0x5   : > { %s176_s9 = ssub.s32 %s3635_s27, %s3713_s30  ;;  %p189_p0 = scmp.ne.s32.totalorder %s3631_s26, %s3627_s25 }
   0x6   : > { %p177_p1 = scmp.eq.s32.totalorder %s176_s9, 0  ;;  %p190_p2 = scmp.eq.s32.totalorder %s3709_s28, 1 }
   0x7   : > { %p195_p3 = scmp.ne.s32.totalorder %s3627_s25, %s3623_s24  ;;  %p196_p4 = scmp.eq.s32.totalorder %s3112_s29, 1 }
   0x8   : > { %s3724_s10 = scalar_select %p177_p1, %s3631_s26, %s179_s8  }
   0x9   : > { %p3726_p5 = por %p190_p2, %p189_p0  ;;  %p3730_p6 = por %p196_p4, %p195_p3 }
   0xa   : > { %p3115_p7 = scmp.ge.s32.totalorder %s3635_s27, 1  ;;  %p240_p8 = scmp.lt.s32.totalorder %s3635_s27, 3 }
   0xc   : > { %p241_p9 = pnand %p3115_p7, %p240_p8 }
   0xe   : > { %244 = sbr.rel (%p241_p9) target bundleno = 1322 (0x52a), region = 48 }
  0x15   : > { %v341_v0 = vld [vmem:[%s5541_s1] sm:$0xf]  ;;  %vm446_vm0 = vcmask 1043456   ;;  %p272_p10 = scmp.lt.s32.totalorder %s3709_s28, 1  ;;  %vm349_vm1 = vcmask 31744   ;;  %v3637_v33 = vmov 0.0  }
  0x16   : > { %3330 = vmatprep.subr.msk.mxu0 %vm446_vm0, %v341_v0  ;;  %3496 = vmatprep.subr.msk.mxu1 %vm446_vm0, %v341_v0  ;;  %v3862_v34 = vrot.slane %v3637_v33, 7  ;;  %vm740_vm2 = vcmask 1040384   ;;  %vm1148_vm3 = vcmask 1045504   ;;  %vm938_vm4 = vcmask 1046528   ;;  %s3638_s20 = smov 8   ;;  %s3639_s21 = smov 4  }
  0x17   : > { %3331 = vmatpush3.msk.msra.mxu0 %vm446_vm0, %v341_v0  ;;  %s273_s15 = scalar_select %p272_p10, %s3709_s28, 1  ;;  %3497 = vmatpush3.msk.msra.mxu1 %vm446_vm0, %v341_v0  ;;  %vm1115_vm5 = vcmask 64544   ;;  %vm1325_vm6 = vcmask 97344   ;;  %vm1455_vm7 = vcmask 130144   ;;  %vm1590_vm8 = vcmask 162944  }
  0x18   : > { %v3866_v35 = vsel %vm740_vm2, 0.0, %v3862_v34  ;;  %v857_v36 = vsel %vm740_vm2, %v3862_v34, 0.0  ;;  %875 = vst.msk [vmem:[#allocation2 + $0x8] sm:$0xff] %vm349_vm1, %v3862_v34  ;;  %v1150_v38 = vrot.slane %v3862_v34, 2  ;;  %v940_v41 = vrot.slane %v3862_v34, 1  ;;  %s3640_s29 = smov 12  }
  0x19   : > { %s3225_s16 = sshll.u32 %s273_s15, 8  ;;  %v1149_v37 = vrot.slane %v3866_v35, 2  ;;  %v1152_v39 = vrot.slane %v857_v36, 2  ;;  %874 = vst.msk [vmem:[#allocation2] sm:$0xff] %vm349_vm1, %v3866_v35  ;;  %v939_v40 = vrot.slane %v3866_v35, 1  ;;  %v942_v42 = vrot.slane %v857_v36, 1 }
  0x1a   : > { %s3748_s19 = scalar_lea.vmem %s5540_s0, %s3225_s16  ;;  %s3641_s8 = smov 24   ;;  %vm1724_vm9 = vcmask 195744   ;;  %vm1853_vm10 = vcmask 228544   ;;  %vm1982_vm11 = vcmask 261344   ;;  %vm2111_vm12 = vcmask 294144  }
  0x1b   : > { %v3751_v1 = vld [vmem:[%s3748_s19] sm:$0xff]  ;;  %v3754_v2 = vld [vmem:[%s3748_s19 + $0x8] sm:$0xff]  ;;  %v3766_v8 = vld [vmem:[%s3748_s19 + $0x10] sm:$0xff]  ;;  %v1151_v43 = vsel %vm1148_vm3, %v1149_v37, %v1150_v38  ;;  %v1153_v44 = vsel %vm1148_vm3, %v1150_v38, %v1152_v39  ;;  %v941_v46 = vsel %vm938_vm4, %v939_v40, %v940_v41  ;;  %v943_v47 = vsel %vm938_vm4, %v940_v41, %v942_v42  ;;  %s3642_s9 = smov 16   ;;  %s3643_s13 = smov 20  }
  0x1c   : > { %v3757_v3 = vld [vmem:[%s3748_s19 + $0x80] sm:$0xff]  ;;  %v5571_v4 = vmax.f32 %v3751_v1, 0.0  ;;  %v5569_v5 = vmax.f32 %v3754_v2, 0.0  ;;  %v3763_v7 = vld [vmem:[%s3748_s19 + $0x88] sm:$0xff]  ;;  %v3769_v9 = vld [vmem:[%s3748_s19 + $0x18] sm:$0xff]  ;;  %v5570_v11 = vmax.f32 %v3766_v8, 0.0  ;;  %v3880_v45 = vpack.i.bf16 %v1153_v44, %v1151_v43 }
  0x1d   : > { %v5556_v6 = vmax.f32 %v3757_v3, 0.0  ;;  %v5554_v10 = vmax.f32 %v3763_v7, 0.0  ;;  %v3774_v12 = vld [vmem:[%s3748_s19 + $0x20] sm:$0xff]  ;;  %v5567_v13 = vmax.f32 %v3769_v9, 0.0  ;;  %v3794_v15 = vld [vmem:[%s3748_s19 + $0x28] sm:$0xff]  ;;  %v3797_v16 = vld [vmem:[%s3748_s19 + $0x30] sm:$0xff]  ;;  %v3884_v48 = vpack.i.bf16 %v943_v47, %v941_v46 }
  0x1e   : > { %3332 = vmatprep.mubr.msk.f32.mxu0 %vm349_vm1, %v5571_v4  ;;  %v5568_v14 = vmax.f32 %v3774_v12, 0.0  ;;  %v5565_v17 = vmax.f32 %v3794_v15, 0.0  ;;  %v5566_v18 = vmax.f32 %v3797_v16, 0.0  ;;  %v3808_v19 = vld [vmem:[%s3748_s19 + $0x38] sm:$0xff]  ;;  %v3811_v20 = vld [vmem:[%s3748_s19 + $0x40] sm:$0xff]  ;;  %v3822_v23 = vld [vmem:[%s3748_s19 + $0x48] sm:$0xff]  ;;  %3553 = vrot.lane.b32.xlu1 %v3880_v45, %s3638_s20 }
  0x1f   : > { %3356 = vmatprep.mubr.msk.f32.mxu1 %vm349_vm1, %v5556_v6  ;;  %3333 = vmatmul.mubr.msk.f32.vlgmr.msra.gmra.mrb[0].mxu0 %vm349_vm1, %v5569_v5  ;;  %v5563_v21 = vmax.f32 %v3808_v19, 0.0  ;;  %v5564_v22 = vmax.f32 %v3811_v20, 0.0  ;;  %v3825_v24 = vld [vmem:[%s3748_s19 + $0x50] sm:$0xff]  ;;  %v5561_v25 = vmax.f32 %v3822_v23, 0.0  ;;  %v3836_v27 = vld [vmem:[%s3748_s19 + $0x58] sm:$0xff]  ;;  %v3839_v28 = vld [vmem:[%s3748_s19 + $0x60] sm:$0xff] }
  0x20   : > { %3357 = vmatmul.mubr.msk.f32.vlgmr.msra.gmra.mrb[0].mxu1 %vm349_vm1, %v5554_v10  ;;  %3335 = vmatprep.mubr.msk.f32.mxu0 %vm349_vm1, %v5570_v11  ;;  %v5562_v26 = vmax.f32 %v3825_v24, 0.0  ;;  %v5559_v29 = vmax.f32 %v3836_v27, 0.0  ;;  %v5560_v30 = vmax.f32 %v3839_v28, 0.0  ;;  %v3850_v31 = vld [vmem:[%s3748_s19 + $0x68] sm:$0xff]  ;;  %v3891_v49 = vld [vmem:[%s3748_s19 + $0x70] sm:$0xff]  ;;  %v3895_v51 = vld [vmem:[%s3748_s19 + $0x78] sm:$0xff] }
  0x21   : > { %v5557_v32 = vmax.f32 %v3850_v31, 0.0  ;;  %3548 = vrot.lane.b32.xlu0 %v3884_v48, %s3639_s21  ;;  %v5558_v50 = vmax.f32 %v3891_v49, 0.0  ;;  %v5555_v52 = vmax.f32 %v3895_v51, 0.0  ;;  %v3905_v53 = vld [vmem:[%s3748_s19 + $0x90] sm:$0xff]  ;;  %v3908_v54 = vld [vmem:[%s3748_s19 + $0x98] sm:$0xff]  ;;  %v3919_v57 = vld [vmem:[%s3748_s19 + $0xa0] sm:$0xff] }
  0x22   : > { %5596 = vst [vmem:[#allocation6_spill] sm:$0xff] %v3908_v54  ;;  %v5553_v55 = vmax.f32 %v3905_v53, 0.0  ;;  %v5551_v56 = vmax.f32 %v3908_v54, 0.0  ;;  %5597 = vst [vmem:[#allocation7_spill] sm:$0xff] %v3919_v57  ;;  %v3922_v58 = vld [vmem:[%s3748_s19 + $0xa8] sm:$0xff]  ;;  %v5550_v59 = vmax.f32 %v3919_v57, 0.0 }
  0x23   : > { %3336 = vmatmul.mubr.msk.f32.gmra.mrb[2].mxu0 %vm349_vm1, %v5567_v13  ;;  %5598 = vst [vmem:[#allocation8_spill] sm:$0xff] %v3922_v58  ;;  %v5549_v60 = vmax.f32 %v3922_v58, 0.0  ;;  %v3935_v37 = vld [vmem:[%s3748_s19 + $0xb0] sm:$0xff]  ;;  %v3941_v39 = vld [vmem:[%s3748_s19 + $0xb8] sm:$0xff]  ;;  %v3947_v41 = vld [vmem:[%s5542_s2] ss:$0 sm:$0xff] }
  0x24   : > { %3338 = vmatprep.mubr.msk.f32.mxu0 %vm349_vm1, %v5568_v14  ;;  %3359 = vmatprep.mubr.msk.f32.mxu1 %vm349_vm1, %v5553_v55  ;;  %5599 = vst [vmem:[#allocation9_spill] sm:$0xff] %v3935_v37  ;;  %v5548_v38 = vmax.f32 %v3935_v37, 0.0  ;;  %5600 = vst [vmem:[#allocation10_spill] sm:$0xff] %v3941_v39  ;;  %v5552_v40 = vmax.f32 %v3941_v39, 0.0  ;;  %s3644_s14 = smov 28   ;;  %s3645_s15 = smov 32  }
  0x25   : > { %3360 = vmatmul.mubr.msk.f32.gmra.mrb[2].mxu1 %vm349_vm1, %v5551_v56  ;;  %vm2188_vm13 = vcmask 293888   ;;  %vm2681_vm14 = vcmask 64512   ;;  %vm3003_vm15 = vcmask 130048  }
  0x26   : > { %3362 = vmatprep.mubr.msk.f32.mxu1 %vm349_vm1, %v5550_v59 }
  0x27   : > { %3339 = vmatmul.mubr.msk.f32.gmra.mrb[4].mxu0 %vm349_vm1, %v5565_v17 }
  0x28   : > { %3341 = vmatprep.mubr.msk.f32.mxu0 %vm349_vm1, %v5566_v18 }
  0x29   : > { %3363 = vmatmul.mubr.msk.f32.gmra.mrb[4].mxu1 %vm349_vm1, %v5549_v60 }
  0x2a   : > { %3365 = vmatprep.mubr.msk.f32.mxu1 %vm349_vm1, %v5548_v38 }
  0x2b   : > { %3342 = vmatmul.mubr.msk.f32.gmra.mrb[6].mxu0 %vm349_vm1, %v5563_v21 }
  0x2c   : > { %3344 = vmatprep.mubr.msk.f32.mxu0 %vm349_vm1, %v5564_v22 }
  0x2d   : > { %3366 = vmatmul.mubr.msk.f32.gmra.mrb[6].mxu1 %vm349_vm1, %v5552_v40 }
  0x2f   : > { %3345 = vmatmul.mubr.msk.f32.gmra.mrb[8].mxu0 %vm349_vm1, %v5561_v25 }
  0x30   : > { %3347 = vmatprep.mubr.msk.f32.mxu0 %vm349_vm1, %v5562_v26 }
  0x33   : > { %3348 = vmatmul.mubr.msk.f32.gmra.mrb[10].mxu0 %vm349_vm1, %v5559_v29 }
  0x34   : > { %3350 = vmatprep.mubr.msk.f32.mxu0 %vm349_vm1, %v5560_v30 }
  0x37   : > { %3351 = vmatmul.mubr.msk.f32.gmra.mrb[12].mxu0 %vm349_vm1, %v5557_v32 }
  0x38   : > { %3353 = vmatprep.mubr.msk.f32.mxu0 %vm349_vm1, %v5558_v50 }
  0x3b   : > { %3354 = vmatmul.mubr.msk.f32.gmra.mrb[14].mxu0 %vm349_vm1, %v5555_v52 }
  0x90   : > { %v3554_v61 = vpop.permute.xlu1 %3553 }
  0x91   : > { %v3556_v62 = vunpack.i.h.bf16 %v3554_v61  ;;  %v3555_v63 = vunpack.i.l.bf16 %v3554_v61 }
  0x93   : > { %v3549_v0 = vpop.permute.xlu0 %3548 }
  0x94   : > { %v3551_v33 = vunpack.i.h.bf16 %v3549_v0  ;;  %v3550_v36 = vunpack.i.l.bf16 %v3549_v0 }
  0x96   : > { %1116 = vst.msk [vmem:[#allocation2] sm:$0xff] %vm1115_vm5, %v3550_v36  ;;  %1117 = vst.msk [vmem:[#allocation2 + $0x8] sm:$0xff] %vm1115_vm5, %v3551_v33 }
  0x97   : > { %1326 = vst.msk [vmem:[#allocation2] sm:$0xff] %vm1325_vm6, %v3555_v63  ;;  %1327 = vst.msk [vmem:[#allocation2 + $0x8] sm:$0xff] %vm1325_vm6, %v3556_v62 }
  0xf2   : > { %v3334_v42 = vpop.f32.mrb[0].mxu0 }
  0xf3   : > { %v3358_v43 = vpop.f32.mrb[0].mxu1  ;;  %v522_v44 = vadd.f32 %v3334_v42, %v3947_v41  ;;  %v516_v46 = vpop.f32.mrb[1].mxu0 }
  0xf4   : > { %v602_v47 = vadd.f32 %v3358_v43, %v3947_v41  ;;  %v596_v61 = vpop.f32.mrb[1].mxu1  ;;  %v517_v62 = vadd.f32 %v3947_v41, %v516_v46 }
  0xf5   : > { %v597_v63 = vadd.f32 %v3947_v41, %v596_v61  ;;  %v676_v0 = vmax.f32 %v522_v44, 0.0 }
  0xf6   : > { %v692_v33 = vmax.f32 %v602_v47, 0.0  ;;  %v675_v36 = vmax.f32 %v517_v62, 0.0  ;;  %v3337_v60 = vpop.f32.mrb[2].mxu0 }
  0xf7   : > { %v691_v38 = vmax.f32 %v597_v63, 0.0  ;;  %v744_v59 = vrot.slane %v676_v0, 7  ;;  %v532_v40 = vadd.f32 %v3337_v60, %v3947_v41  ;;  %v526_v55 = vpop.f32.mrb[3].mxu0 }
  0xf8   : > { %v768_v56 = vrot.slane %v692_v33, 7  ;;  %v743_v10 = vrot.slane %v675_v36, 7  ;;  %v527_v61 = vadd.f32 %v3947_v41, %v526_v55 }
  0xf9   : > { %v767_v42 = vrot.slane %v691_v38, 7  ;;  %v858_v52 = vsel %vm740_vm2, %v744_v59, 0.0  ;;  %v678_v46 = vmax.f32 %v532_v40, 0.0 }
  0xfa   : > { %v3962_v43 = vsel %vm740_vm2, %v768_v56, 0.0  ;;  %v947_v44 = vrot.slane %v858_v52, 1  ;;  %v1157_v47 = vrot.slane %v858_v52, 2  ;;  %v3340_v63 = vpop.f32.mrb[4].mxu0  ;;  %v841_v60 = vsel %vm740_vm2, 0.0, %v743_v10 }
  0xfb   : > { %v987_v62 = vrot.slane %v3962_v43, 1  ;;  %v849_v0 = vsel %vm740_vm2, 0.0, %v767_v42  ;;  %v745_v33 = vsel %vm740_vm2, %v743_v10, %v744_v59  ;;  %v3970_v38 = vsel %vm740_vm2, %v767_v42, %v768_v56  ;;  %v536_v36 = vpop.f32.mrb[5].mxu0  ;;  %1359 = vrot.lane.b32.xlu0 %v841_v60, %s3640_s29  ;;  %876 = vst.msk [vmem:[#allocation2 + $0x10] sm:$0xff] %vm349_vm1, %v841_v60 }
  0xfc   : > { %892 = vst.msk [vmem:[#allocation2 + $0x90] sm:$0xff] %vm349_vm1, %v849_v0  ;;  %1361 = vrot.lane.b32.xlu1 %v745_v33, %s3640_s29  ;;  %877 = vst.msk [vmem:[#allocation2 + $0x18] sm:$0xff] %vm349_vm1, %v745_v33  ;;  %v945_v52 = vrot.slane %v745_v33, 1  ;;  %v944_v10 = vrot.slane %v841_v60, 1  ;;  %v1154_v55 = vrot.slane %v841_v60, 2  ;;  %v1155_v56 = vrot.slane %v745_v33, 2 }
  0xfd   : > { %893 = vst.msk [vmem:[#allocation2 + $0x98] sm:$0xff] %vm349_vm1, %v3970_v38  ;;  %v984_v59 = vrot.slane %v849_v0, 1  ;;  %v985_v40 = vrot.slane %v3970_v38, 1  ;;  %v747_v42 = vrot.slane %v678_v46, 7  ;;  %v677_v6 = vmax.f32 %v527_v61, 0.0 }
  0xfe   : > { %v3981_v32 = vsel %vm938_vm4, %v945_v52, %v947_v44  ;;  %v3984_v50 = vsel %vm938_vm4, %v944_v10, %v945_v52  ;;  %v3987_v29 = vsel %vm1148_vm3, %v1154_v55, %v1155_v56  ;;  %v3990_v30 = vsel %vm1148_vm3, %v1155_v56, %v1157_v47  ;;  %v3343_v25 = vpop.f32.mrb[6].mxu0 }
  0xff   : > { %v3993_v60 = vsel %vm938_vm4, %v984_v59, %v985_v40  ;;  %v859_v33 = vsel %vm740_vm2, %v747_v42, 0.0  ;;  %v746_v46 = vrot.slane %v677_v6, 7  ;;  %v1194_v61 = vrot.slane %v849_v0, 2  ;;  %v546_v26 = vpop.f32.mrb[7].mxu0  ;;  %1787 = vrot.lane.b32.xlu0 %v3970_v38, %s3641_s8 }
 0x100   : > { %1785 = vrot.lane.b32.xlu1 %v849_v0, %s3641_s8  ;;  %v952_v44 = vrot.slane %v859_v33, 1  ;;  %v1162_v52 = vrot.slane %v859_v33, 2  ;;  %v5572_v47 = vrot.slane %v3970_v38, 2  ;;  %v4001_v10 = vsel %vm938_vm4, %v985_v40, %v987_v62 }
 0x101   : > { %v4004_v55 = vsel %vm740_vm2, 0.0, %v746_v46  ;;  %v4007_v6 = vsel %vm740_vm2, %v746_v46, %v747_v42  ;;  %v542_v56 = vadd.f32 %v3340_v63, %v3947_v41  ;;  %v537_v59 = vadd.f32 %v3947_v41, %v536_v36 }
 0x102   : > { %878 = vst.msk [vmem:[#allocation2 + $0x20] sm:$0xff] %vm349_vm1, %v4004_v55  ;;  %v4016_v33 = vsel %vm1148_vm3, %v1194_v61, %v5572_v47  ;;  %879 = vst.msk [vmem:[#allocation2 + $0x28] sm:$0xff] %vm349_vm1, %v4007_v6  ;;  %v949_v62 = vrot.slane %v4004_v55, 1  ;;  %v950_v40 = vrot.slane %v4007_v6, 1  ;;  %v1159_v42 = vrot.slane %v4004_v55, 2  ;;  %v3346_v63 = vpop.f32.mrb[8].mxu0 }
 0x103   : > { %v1160_v36 = vrot.slane %v4007_v6, 2  ;;  %v680_v46 = vmax.f32 %v542_v56, 0.0  ;;  %v679_v21 = vmax.f32 %v537_v59, 0.0  ;;  %v552_v22 = vadd.f32 %v3343_v25, %v3947_v41  ;;  %v556_v17 = vpop.f32.mrb[9].mxu0  ;;  %1393 = vrot.lane.b32.xlu0 %v3970_v38, %s3640_s29 }
 0x104   : > { %1391 = vrot.lane.b32.xlu1 %v849_v0, %s3640_s29  ;;  %v4029_v61 = vsel %vm938_vm4, %v949_v62, %v950_v40  ;;  %v4032_v18 = vsel %vm938_vm4, %v950_v40, %v952_v44  ;;  %v547_v13 = vadd.f32 %v3947_v41, %v546_v26  ;;  %v562_v0 = vadd.f32 %v3346_v63, %v3947_v41 }
 0x105   : > { %v4036_v14 = vsel %vm1148_vm3, %v1159_v42, %v1160_v36  ;;  %v750_v56 = vrot.slane %v680_v46, 7  ;;  %v749_v59 = vrot.slane %v679_v21, 7  ;;  %v4039_v25 = vsel %vm1148_vm3, %v1160_v36, %v1162_v52 }
 0x106   : > { %v682_v5 = vmax.f32 %v552_v22, 0.0  ;;  %v681_v11 = vmax.f32 %v547_v13, 0.0  ;;  %v557_v62 = vadd.f32 %v3947_v41, %v556_v17  ;;  %v1197_v4 = vrot.slane %v3962_v43, 2 }
 0x107   : > { %v860_v44 = vsel %vm740_vm2, %v750_v56, 0.0  ;;  %v4046_v26 = vsel %vm740_vm2, 0.0, %v749_v59  ;;  %v4049_v40 = vsel %vm740_vm2, %v749_v59, %v750_v56  ;;  %1023 = vrot.lane.b32.xlu0 %v3984_v50, %s3639_s21  ;;  %v684_v56 = vmax.f32 %v562_v0, 0.0 }
 0x108   : > { %1025 = vrot.lane.b32.xlu1 %v3981_v32, %s3639_s21  ;;  %v957_v13 = vrot.slane %v860_v44, 1  ;;  %v1167_v21 = vrot.slane %v860_v44, 2  ;;  %880 = vst.msk [vmem:[#allocation2 + $0x30] sm:$0xff] %vm349_vm1, %v4046_v26  ;;  %881 = vst.msk [vmem:[#allocation2 + $0x38] sm:$0xff] %vm349_vm1, %v4049_v40  ;;  %v954_v17 = vrot.slane %v4046_v26, 1  ;;  %v955_v22 = vrot.slane %v4049_v40, 1 }
 0x109   : > { %v1164_v43 = vrot.slane %v4046_v26, 2  ;;  %v1165_v52 = vrot.slane %v4049_v40, 2  ;;  %v4063_v42 = vrot.slane %v682_v5, 7  ;;  %v752_v63 = vrot.slane %v681_v11, 7 }
 0x10a   : > { %v4066_v36 = vsel %vm938_vm4, %v954_v17, %v955_v22  ;;  %v4069_v46 = vsel %vm938_vm4, %v955_v22, %v957_v13  ;;  %v683_v59 = vmax.f32 %v557_v62, 0.0  ;;  %v4092_v0 = vrot.slane %v684_v56, 7  ;;  %v4095_v62 = vld [vmem:[%s3748_s19 + $0xc0] sm:$0xff] }
 0x10b   : > { %v4072_v44 = vsel %vm1148_vm3, %v1164_v43, %v1165_v52  ;;  %v4075_v47 = vsel %vm740_vm2, 0.0, %v752_v63  ;;  %v4078_v5 = vsel %vm1148_vm3, %v1165_v52, %v1167_v21  ;;  %1494 = vrot.lane.b32.xlu0 %v3984_v50, %s3642_s9  ;;  %v4088_v11 = vsel %vm740_vm2, %v752_v63, %v4063_v42  ;;  %5601 = vst [vmem:[#allocation11_spill] sm:$0xff] %v4095_v62  ;;  %v4099_v21 = vld [vmem:[%s3748_s19 + $0xc8] sm:$0xff] }
 0x10c   : > { %1496 = vrot.lane.b32.xlu1 %v3981_v32, %s3642_s9  ;;  %882 = vst.msk [vmem:[#allocation2 + $0x40] sm:$0xff] %vm349_vm1, %v4075_v47  ;;  %883 = vst.msk [vmem:[#allocation2 + $0x48] sm:$0xff] %vm349_vm1, %v4088_v11  ;;  %v755_v13 = vrot.slane %v683_v59, 7  ;;  %v5574_v32 = vmax.f32 %v4095_v62, 0.0  ;;  %v5603_v50 = vrot.slane %v3970_v38, 2 }
 0x10d   : > { %5602 = vst [vmem:[#allocation12_spill] sm:$0xff] %v4099_v21 }
 0x10e   : > { %v4104_v17 = vsel %vm1148_vm3, %v5603_v50, %v1197_v4  ;;  %v4111_v22 = vsel %vm740_vm2, 0.0, %v755_v13  ;;  %v4117_v43 = vsel %vm740_vm2, %v755_v13, %v4092_v0  ;;  %3368 = vmatprep.mubr.msk.f32.mxu1 %vm349_vm1, %v5574_v32  ;;  %v5573_v4 = vmax.f32 %v4099_v21, 0.0 }
 0x10f   : > { %1628 = vrot.lane.b32.xlu0 %v3987_v29, %s3643_s13  ;;  %884 = vst.msk [vmem:[#allocation2 + $0x50] sm:$0xff] %vm349_vm1, %v4111_v22  ;;  %885 = vst.msk [vmem:[#allocation2 + $0x58] sm:$0xff] %vm349_vm1, %v4117_v43 }
 0x110   : > { %1233 = vrot.lane.b32.xlu1 %v3987_v29, %s3638_s20  ;;  %3369 = vmatmul.mubr.msk.f32.gmra.mrb[8].mxu1 %vm349_vm1, %v5573_v4  ;;  %v3349_v29 = vpop.f32.mrb[10].mxu0  ;;  %v4182_v4 = vld [vmem:[%s3748_s19 + $0xe8] sm:$0xff] }
 0x111   : > { %v572_v38 = vadd.f32 %v3349_v29, %v3947_v41  ;;  %v566_v63 = vpop.f32.mrb[11].mxu0  ;;  %5607 = vst [vmem:[#allocation16_spill] sm:$0xff] %v4182_v4  ;;  %v5578_v32 = vmax.f32 %v4182_v4, 0.0 }
 0x112   : > { %v567_v56 = vadd.f32 %v3947_v41, %v566_v63  ;;  %v4164_v63 = vld [vmem:[%s3748_s19 + $0xd8] sm:$0xff] }
 0x113   : > { %1630 = vrot.lane.b32.xlu0 %v3990_v30, %s3643_s13  ;;  %v686_v52 = vmax.f32 %v572_v38, 0.0  ;;  %v4154_v38 = vld [vmem:[%s3748_s19 + $0xd0] sm:$0xff]  ;;  %5605 = vst [vmem:[#allocation14_spill] sm:$0xff] %v4164_v63 }
 0x114   : > { %1914 = vrot.lane.b32.xlu1 %v3993_v60, %s3644_s14  ;;  %v685_v59 = vmax.f32 %v567_v56, 0.0  ;;  %5604 = vst [vmem:[#allocation13_spill] sm:$0xff] %v4154_v38  ;;  %v5575_v56 = vmax.f32 %v4164_v63, 0.0 }
 0x115   : > { %v4138_v13 = vrot.slane %v686_v52, 7  ;;  %v5577_v52 = vmax.f32 %v4154_v38, 0.0 }
 0x116   : > { %v758_v50 = vrot.slane %v685_v59, 7  ;;  %v4174_v59 = vld [vmem:[%s3748_s19 + $0xe0] sm:$0xff] }
 0x117   : > { %1235 = vrot.lane.b32.xlu0 %v3990_v30, %s3638_s20  ;;  %3371 = vmatprep.mubr.msk.f32.mxu1 %vm349_vm1, %v5577_v52  ;;  %5606 = vst [vmem:[#allocation15_spill] sm:$0xff] %v4174_v59 }
 0x118   : > { %1526 = vrot.lane.b32.xlu1 %v3993_v60, %s3642_s9  ;;  %v4145_v29 = vsel %vm740_vm2, 0.0, %v758_v50  ;;  %v4151_v30 = vsel %vm740_vm2, %v758_v50, %v4138_v13  ;;  %3372 = vmatmul.mubr.msk.f32.gmra.mrb[10].mxu1 %vm349_vm1, %v5575_v56  ;;  %v5576_v50 = vmax.f32 %v4174_v59, 0.0  ;;  %v4192_v56 = vld [vmem:[%s3748_s19 + $0xf0] sm:$0xff] }
 0x119   : > { %886 = vst.msk [vmem:[#allocation2 + $0x60] sm:$0xff] %vm349_vm1, %v4145_v29  ;;  %887 = vst.msk [vmem:[#allocation2 + $0x68] sm:$0xff] %vm349_vm1, %v4151_v30  ;;  %v2178_v59 = vld [vmem:[%s5543_s3 + $0x10] sm:$0xff] }
 0x11a   : > { %3374 = vmatprep.mubr.msk.f32.mxu1 %vm349_vm1, %v5576_v50  ;;  %5608 = vst [vmem:[#allocation17_spill] sm:$0xff] %v4192_v56  ;;  %v5582_v50 = vmax.f32 %v4192_v56, 0.0 }
 0x11b   : > { %1916 = vrot.lane.b32.xlu0 %v4001_v10, %s3644_s14 }
 0x11c   : > { %2043 = vrot.lane.b32.xlu1 %v4016_v33, %s3645_s15  ;;  %3375 = vmatmul.mubr.msk.f32.gmra.mrb[12].mxu1 %vm349_vm1, %v5578_v32  ;;  %v4206_v32 = vld [vmem:[%s3748_s19 + $0xf8] sm:$0xff]  ;;  %s3226_s19 = sshll.u32 %s3709_s28, 12 }
 0x11d   : > { %5609 = vst [vmem:[#allocation18_spill] sm:$0xff] %v4206_v32  ;;  %v5581_v4 = vmax.f32 %v4206_v32, 0.0  ;;  %3377 = vmatprep.mubr.msk.f32.mxu1 %vm349_vm1, %v5582_v50 }
 0x11f   : > { %1759 = vrot.lane.b32.xlu0 %v4007_v6, %s3641_s8 }
 0x120   : > { %1757 = vrot.lane.b32.xlu1 %v4004_v55, %s3641_s8  ;;  %3378 = vmatmul.mubr.msk.f32.gmra.mrb[14].mxu1 %vm349_vm1, %v5581_v4  ;;  %v2180_v4 = vld [vmem:[%s5543_s3 + $0x20] sm:$0xf] }
 0x123   : > { %1365 = vrot.lane.b32.xlu0 %v4007_v6, %s3640_s29  ;;  %v2177_v6 = vld [vmem:[%s5543_s3 + $0x8] sm:$0xff] }
 0x124   : > { %1363 = vrot.lane.b32.xlu1 %v4004_v55, %s3640_s29  ;;  %v2176_v55 = vld [vmem:[%s5543_s3] sm:$0xff] }
 0x125   : > { %v3488_v52 = vpack.c.bf16 %v2177_v6, %v2176_v55  ;;  %v2179_v55 = vld [vmem:[%s5543_s3 + $0x18] sm:$0xff] }
 0x126   : > { %v3492_v6 = vpack.c.bf16 %v2179_v55, %v2178_v59 }
 0x127   : > { %1888 = vrot.lane.b32.xlu0 %v4032_v18, %s3644_s14  ;;  %3489 = vmatprep.subr.bf16.mxu1 %v3488_v52 }
 0x128   : > { %1886 = vrot.lane.b32.xlu1 %v4029_v61, %s3644_s14  ;;  %3491 = vmatpush3.bf16.msra.mxu1 %v3488_v52 }
 0x129   : > { %3493 = vmatprep.subr.bf16.mxu1 %v3492_v6 }
 0x12b   : > { %1027 = vrot.lane.b32.xlu0 %v4029_v61, %s3639_s21 }
 0x12c   : > { %1498 = vrot.lane.b32.xlu1 %v4029_v61, %s3642_s9  ;;  %3495 = vmatpush3.bf16.msra.mxu1 %v3492_v6  ;;  %v3352_v61 = vpop.f32.mrb[12].mxu0 }
 0x12d   : > { %3388 = vmatprep.subr.msk.mxu1 %vm446_vm0, %v2180_v4  ;;  %v582_v52 = vadd.f32 %v3352_v61, %v3947_v41  ;;  %v576_v55 = vpop.f32.mrb[13].mxu0 }
 0x12e   : > { %v577_v6 = vadd.f32 %v3947_v41, %v576_v55 }
 0x12f   : > { %1632 = vrot.lane.b32.xlu0 %v4036_v14, %s3643_s13  ;;  %v688_v59 = vmax.f32 %v582_v52, 0.0 }
 0x130   : > { %2015 = vrot.lane.b32.xlu1 %v4036_v14, %s3645_s15  ;;  %3389 = vmatpush3.msk.msra.mxu1 %vm446_vm0, %v2180_v4  ;;  %v687_v50 = vmax.f32 %v577_v6, 0.0  ;;  %v861_v6 = vsel %vm740_vm2, %v4063_v42, 0.0 }
 0x131   : > { %v4244_v32 = vrot.slane %v688_v59, 7 }
 0x133   : > { %1029 = vrot.lane.b32.xlu0 %v4032_v18, %s3639_s21 }
 0x134   : > { %1500 = vrot.lane.b32.xlu1 %v4032_v18, %s3642_s9  ;;  %v761_v18 = vrot.slane %v687_v50, 7 }
 0x136   : > { %v4251_v4 = vsel %vm740_vm2, 0.0, %v761_v18  ;;  %v4257_v61 = vsel %vm740_vm2, %v761_v18, %v4244_v32  ;;  %v960_v18 = vrot.slane %v4088_v11, 1 }
 0x137   : > { %1634 = vrot.lane.b32.xlu0 %v4039_v25, %s3643_s13  ;;  %888 = vst.msk [vmem:[#allocation2 + $0x70] sm:$0xff] %vm349_vm1, %v4251_v4  ;;  %889 = vst.msk [vmem:[#allocation2 + $0x78] sm:$0xff] %vm349_vm1, %v4257_v61 }
 0x138   : > { %2017 = vrot.lane.b32.xlu1 %v4039_v25, %s3645_s15 }
 0x13b   : > { %1239 = vrot.lane.b32.xlu0 %v4039_v25, %s3638_s20 }
 0x13c   : > { %1237 = vrot.lane.b32.xlu1 %v4036_v14, %s3638_s20  ;;  %v3355_v14 = vpop.f32.mrb[14].mxu0 }
 0x13d   : > { %v592_v25 = vadd.f32 %v3355_v14, %v3947_v41 }
 0x13f   : > { %1763 = vrot.lane.b32.xlu0 %v4049_v40, %s3641_s8 }
 0x140   : > { %1761 = vrot.lane.b32.xlu1 %v4046_v26, %s3641_s8 }
 0x143   : > { %1369 = vrot.lane.b32.xlu0 %v4049_v40, %s3640_s29 }
 0x144   : > { %1367 = vrot.lane.b32.xlu1 %v4046_v26, %s3640_s29  ;;  %v586_v26 = vpop.f32.mrb[15].mxu0 }
 0x145   : > { %v587_v40 = vadd.f32 %v3947_v41, %v586_v26  ;;  %v1170_v26 = vrot.slane %v4088_v11, 2 }
 0x147   : > { %1892 = vrot.lane.b32.xlu0 %v4069_v46, %s3644_s14  ;;  %v689_v50 = vmax.f32 %v587_v40, 0.0 }
 0x148   : > { %1890 = vrot.lane.b32.xlu1 %v4066_v36, %s3644_s14 }
 0x14b   : > { %1031 = vrot.lane.b32.xlu0 %v4066_v36, %s3639_s21 }
 0x14c   : > { %1502 = vrot.lane.b32.xlu1 %v4066_v36, %s3642_s9  ;;  %v690_v36 = vmax.f32 %v592_v25, 0.0  ;;  %v1169_v25 = vrot.slane %v4075_v47, 2 }
 0x14e   : > { %v4291_v52 = vrot.slane %v690_v36, 7 }
 0x14f   : > { %1636 = vrot.lane.b32.xlu0 %v4072_v44, %s3643_s13 }
 0x150   : > { %2019 = vrot.lane.b32.xlu1 %v4072_v44, %s3645_s15 }
 0x153   : > { %1033 = vrot.lane.b32.xlu0 %v4069_v46, %s3639_s21 }
 0x154   : > { %1504 = vrot.lane.b32.xlu1 %v4069_v46, %s3642_s9  ;;  %v764_v46 = vrot.slane %v689_v50, 7  ;;  %v1171_v50 = vsel %vm1148_vm3, %v1169_v25, %v1170_v26 }
 0x156   : > { %v4298_v59 = vsel %vm740_vm2, 0.0, %v764_v46  ;;  %v4304_v55 = vsel %vm740_vm2, %v764_v46, %v4291_v52  ;;  %v1172_v46 = vrot.slane %v861_v6, 2 }
 0x157   : > { %1638 = vrot.lane.b32.xlu0 %v4078_v5, %s3643_s13  ;;  %890 = vst.msk [vmem:[#allocation2 + $0x80] sm:$0xff] %vm349_vm1, %v4298_v59  ;;  %891 = vst.msk [vmem:[#allocation2 + $0x88] sm:$0xff] %vm349_vm1, %v4304_v55 }
 0x158   : > { %2021 = vrot.lane.b32.xlu1 %v4078_v5, %s3645_s15 }
 0x15b   : > { %1243 = vrot.lane.b32.xlu0 %v4078_v5, %s3638_s20  ;;  %v959_v5 = vrot.slane %v4075_v47, 1 }
 0x15c   : > { %1241 = vrot.lane.b32.xlu1 %v4072_v44, %s3638_s20  ;;  %v962_v44 = vrot.slane %v861_v6, 1 }
 0x15d   : > { %v961_v42 = vsel %vm938_vm4, %v959_v5, %v960_v18 }
 0x15e   : > { %v963_v14 = vsel %vm938_vm4, %v960_v18, %v962_v44  ;;  %v1173_v18 = vsel %vm1148_vm3, %v1170_v26, %v1172_v46  ;;  %v862_v26 = vsel %vm740_vm2, %v4092_v0, 0.0  ;;  %v964_v46 = vrot.slane %v4111_v22, 1 }
 0x15f   : > { %1767 = vrot.lane.b32.xlu0 %v4088_v11, %s3641_s8 }
 0x160   : > { %1765 = vrot.lane.b32.xlu1 %v4075_v47, %s3641_s8 }
 0x163   : > { %1373 = vrot.lane.b32.xlu0 %v4088_v11, %s3640_s29 }
 0x164   : > { %1371 = vrot.lane.b32.xlu1 %v4075_v47, %s3640_s29 }
 0x167   : > { %1896 = vrot.lane.b32.xlu0 %v963_v14, %s3644_s14 }
 0x168   : > { %1894 = vrot.lane.b32.xlu1 %v961_v42, %s3644_s14 }
 0x16b   : > { %1035 = vrot.lane.b32.xlu0 %v961_v42, %s3639_s21 }
 0x16c   : > { %1506 = vrot.lane.b32.xlu1 %v961_v42, %s3642_s9 }
 0x16d   : > { %v1360_v40 = vpop.permute.xlu0 %1359 }
 0x16e   : > { %v1362_v36 = vpop.permute.xlu1 %1361  ;;  %1456 = vst.msk [vmem:[#allocation2] sm:$0xff] %vm1455_vm7, %v1360_v40 }
 0x16f   : > { %1457 = vst.msk [vmem:[#allocation2 + $0x8] sm:$0xff] %vm1455_vm7, %v1362_v36  ;;  %1640 = vrot.lane.b32.xlu0 %v1171_v50, %s3643_s13 }
 0x170   : > { %2023 = vrot.lane.b32.xlu1 %v1171_v50, %s3645_s15 }
 0x171   : > { %v4333_v47 = vpop.permute.xlu0 %1787 }
 0x172   : > { %v4335_v11 = vpop.permute.xlu1 %1785 }
 0x173   : > { %1037 = vrot.lane.b32.xlu0 %v963_v14, %s3639_s21 }
 0x174   : > { %1508 = vrot.lane.b32.xlu1 %v963_v14, %s3642_s9 }
 0x175   : > { %v4339_v44 = vpop.permute.xlu0 %1393 }
 0x176   : > { %v4341_v5 = vpop.permute.xlu1 %1391 }
 0x177   : > { %1642 = vrot.lane.b32.xlu0 %v1173_v18, %s3643_s13 }
 0x178   : > { %2025 = vrot.lane.b32.xlu1 %v1173_v18, %s3645_s15 }
 0x179   : > { %v1024_v25 = vpop.permute.xlu0 %1023 }
 0x17a   : > { %v1026_v42 = vpop.permute.xlu1 %1025  ;;  %1118 = vst.msk [vmem:[#allocation2 + $0x10] sm:$0xff] %vm1115_vm5, %v1024_v25 }
 0x17b   : > { %1119 = vst.msk [vmem:[#allocation2 + $0x18] sm:$0xff] %vm1115_vm5, %v1026_v42  ;;  %1247 = vrot.lane.b32.xlu0 %v1173_v18, %s3638_s20  ;;  %v965_v18 = vrot.slane %v4117_v43, 1  ;;  %v3361_v42 = vpop.f32.mrb[2].mxu1 }
 0x17c   : > { %1245 = vrot.lane.b32.xlu1 %v1171_v50, %s3638_s20  ;;  %v967_v50 = vrot.slane %v862_v26, 1  ;;  %v612_v0 = vadd.f32 %v3361_v42, %v3947_v41  ;;  %v606_v25 = vpop.f32.mrb[3].mxu1 }
 0x17d   : > { %v1495_v14 = vpop.permute.xlu0 %1494  ;;  %v966_v56 = vsel %vm938_vm4, %v964_v46, %v965_v18 }
 0x17e   : > { %v1497_v6 = vpop.permute.xlu1 %1496  ;;  %1591 = vst.msk [vmem:[#allocation2] sm:$0xff] %vm1590_vm8, %v1495_v14  ;;  %v968_v63 = vsel %vm938_vm4, %v965_v18, %v967_v50 }
 0x17f   : > { %1592 = vst.msk [vmem:[#allocation2 + $0x8] sm:$0xff] %vm1590_vm8, %v1497_v6  ;;  %1771 = vrot.lane.b32.xlu0 %v4117_v43, %s3641_s8  ;;  %v607_v6 = vadd.f32 %v3947_v41, %v606_v25 }
 0x180   : > { %1769 = vrot.lane.b32.xlu1 %v4111_v22, %s3641_s8 }
 0x181   : > { %v1629_v36 = vpop.permute.xlu0 %1628  ;;  %v693_v38 = vmax.f32 %v607_v6, 0.0 }
 0x182   : > { %v1234_v40 = vpop.permute.xlu1 %1233  ;;  %1725 = vst.msk [vmem:[#allocation2] sm:$0xff] %vm1724_vm9, %v1629_v36  ;;  %v694_v36 = vmax.f32 %v612_v0, 0.0  ;;  %v1174_v0 = vrot.slane %v4111_v22, 2 }
 0x183   : > { %1328 = vst.msk [vmem:[#allocation2 + $0x10] sm:$0xff] %vm1325_vm6, %v1234_v40  ;;  %1377 = vrot.lane.b32.xlu0 %v4117_v43, %s3640_s29  ;;  %v770_v42 = vrot.slane %v693_v38, 7 }
 0x184   : > { %1375 = vrot.lane.b32.xlu1 %v4111_v22, %s3640_s29  ;;  %v4375_v21 = vrot.slane %v694_v36, 7 }
 0x185   : > { %v1631_v40 = vpop.permute.xlu0 %1630  ;;  %v4387_v46 = vsel %vm740_vm2, 0.0, %v770_v42 }
 0x186   : > { %v4368_v14 = vpop.permute.xlu1 %1914  ;;  %1726 = vst.msk [vmem:[#allocation2 + $0x8] sm:$0xff] %vm1724_vm9, %v1631_v40  ;;  %v1175_v40 = vrot.slane %v4117_v43, 2  ;;  %v4384_v50 = vsel %vm740_vm2, %v770_v42, %v4375_v21 }
 0x187   : > { %1900 = vrot.lane.b32.xlu0 %v968_v63, %s3644_s14  ;;  %894 = vst.msk [vmem:[#allocation2 + $0xa0] sm:$0xff] %vm349_vm1, %v4387_v46  ;;  %895 = vst.msk [vmem:[#allocation2 + $0xa8] sm:$0xff] %vm349_vm1, %v4384_v50 }
 0x188   : > { %1898 = vrot.lane.b32.xlu1 %v966_v56, %s3644_s14  ;;  %v1176_v38 = vsel %vm1148_vm3, %v1174_v0, %v1175_v40 }
 0x189   : > { %v1236_v25 = vpop.permute.xlu0 %1235 }
 0x18a   : > { %v4377_v62 = vpop.permute.xlu1 %1526  ;;  %1329 = vst.msk [vmem:[#allocation2 + $0x18] sm:$0xff] %vm1325_vm6, %v1236_v25 }
 0x18b   : > { %1039 = vrot.lane.b32.xlu0 %v966_v56, %s3639_s21 }
 0x18c   : > { %1510 = vrot.lane.b32.xlu1 %v966_v56, %s3642_s9  ;;  %v1177_v56 = vrot.slane %v862_v26, 2 }
 0x18d   : > { %v4397_v43 = vpop.permute.xlu0 %1916 }
 0x18e   : > { %v4395_v22 = vpop.permute.xlu1 %2043  ;;  %v1178_v25 = vsel %vm1148_vm3, %v1175_v40, %v1177_v56  ;;  %v4419_v40 = vsel %vm740_vm2, %v4138_v13, 0.0  ;;  %v970_v13 = vrot.slane %v4151_v30, 1 }
 0x18f   : > { %1644 = vrot.lane.b32.xlu0 %v1176_v38, %s3643_s13  ;;  %v972_v56 = vrot.slane %v4419_v40, 1 }
 0x190   : > { %2027 = vrot.lane.b32.xlu1 %v1176_v38, %s3645_s15 }
 0x191   : > { %v1760_v6 = vpop.permute.xlu0 %1759  ;;  %v973_v39 = vsel %vm938_vm4, %v970_v13, %v972_v56  ;;  %v1179_v56 = vrot.slane %v4145_v29, 2 }
 0x192   : > { %v1758_v18 = vpop.permute.xlu1 %1757  ;;  %1855 = vst.msk [vmem:[#allocation2 + $0x8] sm:$0xff] %vm1853_vm10, %v1760_v6 }
 0x193   : > { %1854 = vst.msk [vmem:[#allocation2] sm:$0xff] %vm1853_vm10, %v1758_v18  ;;  %1041 = vrot.lane.b32.xlu0 %v968_v63, %s3639_s21 }
 0x194   : > { %1512 = vrot.lane.b32.xlu1 %v968_v63, %s3642_s9 }
 0x195   : > { %v1366_v42 = vpop.permute.xlu0 %1365 }
 0x196   : > { %v1364_v36 = vpop.permute.xlu1 %1363  ;;  %1459 = vst.msk [vmem:[#allocation2 + $0x18] sm:$0xff] %vm1455_vm7, %v1366_v42  ;;  %v3364_v42 = vpop.f32.mrb[4].mxu1 }
 0x197   : > { %1458 = vst.msk [vmem:[#allocation2 + $0x10] sm:$0xff] %vm1455_vm7, %v1364_v36  ;;  %1646 = vrot.lane.b32.xlu0 %v1178_v25, %s3643_s13  ;;  %v969_v36 = vrot.slane %v4145_v29, 1 }
 0x198   : > { %2029 = vrot.lane.b32.xlu1 %v1178_v25, %s3645_s15 }
 0x199   : > { %v1889_v0 = vpop.permute.xlu0 %1888 }
 0x19a   : > { %v1887_v26 = vpop.permute.xlu1 %1886  ;;  %1984 = vst.msk [vmem:[#allocation2 + $0x8] sm:$0xff] %vm1982_vm11, %v1889_v0 }
 0x19b   : > { %1983 = vst.msk [vmem:[#allocation2] sm:$0xff] %vm1982_vm11, %v1887_v26  ;;  %1251 = vrot.lane.b32.xlu0 %v1178_v25, %s3638_s20  ;;  %v622_v25 = vadd.f32 %v3364_v42, %v3947_v41  ;;  %v616_v26 = vpop.f32.mrb[5].mxu1 }
 0x19c   : > { %1249 = vrot.lane.b32.xlu1 %v1176_v38, %s3638_s20  ;;  %v617_v0 = vadd.f32 %v3947_v41, %v616_v26 }
 0x19d   : > { %v1028_v18 = vpop.permute.xlu0 %1027 }
 0x19e   : > { %v1499_v63 = vpop.permute.xlu1 %1498  ;;  %1120 = vst.msk [vmem:[#allocation2 + $0x20] sm:$0xff] %vm1115_vm5, %v1028_v18  ;;  %v695_v37 = vmax.f32 %v617_v0, 0.0 }
 0x19f   : > { %1593 = vst.msk [vmem:[#allocation2 + $0x10] sm:$0xff] %vm1590_vm8, %v1499_v63  ;;  %1775 = vrot.lane.b32.xlu0 %v4151_v30, %s3641_s8 }
 0x1a0   : > { %1773 = vrot.lane.b32.xlu1 %v4145_v29, %s3641_s8  ;;  %v773_v26 = vrot.slane %v695_v37, 7 }
 0x1a1   : > { %v1633_v6 = vpop.permute.xlu0 %1632 }
 0x1a2   : > { %v2016_v38 = vpop.permute.xlu1 %2015  ;;  %1727 = vst.msk [vmem:[#allocation2 + $0x10] sm:$0xff] %vm1724_vm9, %v1633_v6  ;;  %v971_v6 = vsel %vm938_vm4, %v969_v36, %v970_v13  ;;  %v1180_v36 = vrot.slane %v4151_v30, 2  ;;  %v4454_v0 = vsel %vm740_vm2, 0.0, %v773_v26 }
 0x1a3   : > { %2112 = vst.msk [vmem:[#allocation2] sm:$0xff] %vm2111_vm12, %v2016_v38  ;;  %1381 = vrot.lane.b32.xlu0 %v4151_v30, %s3640_s29  ;;  %v696_v38 = vmax.f32 %v622_v25, 0.0 }
 0x1a4   : > { %1379 = vrot.lane.b32.xlu1 %v4145_v29, %s3640_s29  ;;  %896 = vst.msk [vmem:[#allocation2 + $0xb0] sm:$0xff] %vm349_vm1, %v4454_v0  ;;  %v1181_v37 = vsel %vm1148_vm3, %v1179_v56, %v1180_v36 }
 0x1a5   : > { %v1030_v18 = vpop.permute.xlu0 %1029  ;;  %v4442_v42 = vrot.slane %v696_v38, 7 }
 0x1a6   : > { %v1501_v63 = vpop.permute.xlu1 %1500  ;;  %1121 = vst.msk [vmem:[#allocation2 + $0x28] sm:$0xff] %vm1115_vm5, %v1030_v18  ;;  %v1182_v18 = vrot.slane %v4419_v40, 2 }
 0x1a7   : > { %1594 = vst.msk [vmem:[#allocation2 + $0x18] sm:$0xff] %vm1590_vm8, %v1501_v63  ;;  %1904 = vrot.lane.b32.xlu0 %v973_v39, %s3644_s14  ;;  %v4451_v13 = vsel %vm740_vm2, %v773_v26, %v4442_v42 }
 0x1a8   : > { %1902 = vrot.lane.b32.xlu1 %v971_v6, %s3644_s14  ;;  %897 = vst.msk [vmem:[#allocation2 + $0xb8] sm:$0xff] %vm349_vm1, %v4451_v13  ;;  %v1183_v26 = vsel %vm1148_vm3, %v1180_v36, %v1182_v18  ;;  %v4486_v36 = vsel %vm740_vm2, %v4244_v32, 0.0  ;;  %v3367_v32 = vpop.f32.mrb[6].mxu1 }
 0x1a9   : > { %v1635_v57 = vpop.permute.xlu0 %1634  ;;  %v626_v18 = vpop.f32.mrb[7].mxu1 }
 0x1aa   : > { %v2018_v58 = vpop.permute.xlu1 %2017  ;;  %v2144_v25 = vld [vmem:[#allocation2] sm:$0xff]  ;;  %1728 = vst.msk [vmem:[#allocation2 + $0x18] sm:$0xff] %vm1724_vm9, %v1635_v57 }
 0x1ab   : > { %2113 = vst.msk [vmem:[#allocation2 + $0x8] sm:$0xff] %vm2111_vm12, %v2018_v58  ;;  %3390 = vmatprep.mubr.msk.f32.mxu1 %vm2188_vm13, %v2144_v25  ;;  %1043 = vrot.lane.b32.xlu0 %v971_v6, %s3639_s21 }
 0x1ac   : > { %1514 = vrot.lane.b32.xlu1 %v971_v6, %s3642_s9 }
 0x1ad   : > { %v1240_v58 = vpop.permute.xlu0 %1239 }
 0x1ae   : > { %v1238_v57 = vpop.permute.xlu1 %1237  ;;  %1331 = vst.msk [vmem:[#allocation2 + $0x28] sm:$0xff] %vm1325_vm6, %v1240_v58 }
 0x1af   : > { %1330 = vst.msk [vmem:[#allocation2 + $0x20] sm:$0xff] %vm1325_vm6, %v1238_v57  ;;  %1648 = vrot.lane.b32.xlu0 %v1181_v37, %s3643_s13 }
 0x1b0   : > { %2031 = vrot.lane.b32.xlu1 %v1181_v37, %s3645_s15 }
 0x1b1   : > { %v1764_v30 = vpop.permute.xlu0 %1763 }
 0x1b2   : > { %v1762_v29 = vpop.permute.xlu1 %1761  ;;  %v2145_v63 = vld [vmem:[#allocation2 + $0x8] sm:$0xff]  ;;  %1857 = vst.msk [vmem:[#allocation2 + $0x18] sm:$0xff] %vm1853_vm10, %v1764_v30  ;;  %v975_v30 = vrot.slane %v4257_v61, 1 }
 0x1b3   : > { %1856 = vst.msk [vmem:[#allocation2 + $0x10] sm:$0xff] %vm1853_vm10, %v1762_v29  ;;  %3391 = vmatmul.mubr.msk.f32.vlgmr.msra.gmra.mrb[16].mxu1 %vm2188_vm13, %v2145_v63  ;;  %1045 = vrot.lane.b32.xlu0 %v973_v39, %s3639_s21  ;;  %v974_v29 = vrot.slane %v4251_v4, 1  ;;  %v632_v63 = vadd.f32 %v3367_v32, %v3947_v41 }
 0x1b4   : > { %1516 = vrot.lane.b32.xlu1 %v973_v39, %s3642_s9 }
 0x1b5   : > { %v1370_v6 = vpop.permute.xlu0 %1369 }
 0x1b6   : > { %v1368_v38 = vpop.permute.xlu1 %1367  ;;  %1461 = vst.msk [vmem:[#allocation2 + $0x28] sm:$0xff] %vm1455_vm7, %v1370_v6 }
 0x1b7   : > { %1460 = vst.msk [vmem:[#allocation2 + $0x20] sm:$0xff] %vm1455_vm7, %v1368_v38  ;;  %1650 = vrot.lane.b32.xlu0 %v1183_v26, %s3643_s13 }
 0x1b8   : > { %2033 = vrot.lane.b32.xlu1 %v1183_v26, %s3645_s15 }
 0x1b9   : > { %v1893_v25 = vpop.permute.xlu0 %1892 }
 0x1ba   : > { %v1891_v40 = vpop.permute.xlu1 %1890  ;;  %1986 = vst.msk [vmem:[#allocation2 + $0x18] sm:$0xff] %vm1982_vm11, %v1893_v25 }
 0x1bb   : > { %1985 = vst.msk [vmem:[#allocation2 + $0x10] sm:$0xff] %vm1982_vm11, %v1891_v40  ;;  %1255 = vrot.lane.b32.xlu0 %v1183_v26, %s3638_s20  ;;  %v627_v26 = vadd.f32 %v3947_v41, %v626_v18  ;;  %v976_v40 = vsel %vm938_vm4, %v974_v29, %v975_v30  ;;  %v1185_v29 = vrot.slane %v4257_v61, 2 }
 0x1bc   : > { %1253 = vrot.lane.b32.xlu1 %v1181_v37, %s3638_s20  ;;  %v977_v37 = vrot.slane %v4486_v36, 1 }
 0x1bd   : > { %v1032_v56 = vpop.permute.xlu0 %1031 }
 0x1be   : > { %v1503_v39 = vpop.permute.xlu1 %1502  ;;  %1122 = vst.msk [vmem:[#allocation2 + $0x30] sm:$0xff] %vm1115_vm5, %v1032_v56  ;;  %v978_v25 = vsel %vm938_vm4, %v975_v30, %v977_v37  ;;  %v697_v56 = vmax.f32 %v627_v26, 0.0  ;;  %v1184_v37 = vrot.slane %v4251_v4, 2  ;;  %v1187_v26 = vrot.slane %v4486_v36, 2 }
 0x1bf   : > { %1595 = vst.msk [vmem:[#allocation2 + $0x20] sm:$0xff] %vm1590_vm8, %v1503_v39  ;;  %1779 = vrot.lane.b32.xlu0 %v4257_v61, %s3641_s8  ;;  %v698_v39 = vmax.f32 %v632_v63, 0.0 }
 0x1c0   : > { %1777 = vrot.lane.b32.xlu1 %v4251_v4, %s3641_s8  ;;  %v776_v41 = vrot.slane %v697_v56, 7  ;;  %v1188_v56 = vsel %vm1148_vm3, %v1185_v29, %v1187_v26 }
 0x1c1   : > { %v1637_v58 = vpop.permute.xlu0 %1636 }
 0x1c2   : > { %v2020_v57 = vpop.permute.xlu1 %2019  ;;  %1729 = vst.msk [vmem:[#allocation2 + $0x20] sm:$0xff] %vm1724_vm9, %v1637_v58  ;;  %v4523_v63 = vsel %vm740_vm2, 0.0, %v776_v41 }
 0x1c3   : > { %2114 = vst.msk [vmem:[#allocation2 + $0x10] sm:$0xff] %vm2111_vm12, %v2020_v57  ;;  %1385 = vrot.lane.b32.xlu0 %v4257_v61, %s3640_s29  ;;  %v4509_v57 = vrot.slane %v698_v39, 7  ;;  %v1186_v61 = vsel %vm1148_vm3, %v1184_v37, %v1185_v29 }
 0x1c4   : > { %1383 = vrot.lane.b32.xlu1 %v4251_v4, %s3640_s29  ;;  %898 = vst.msk [vmem:[#allocation2 + $0xc0] sm:$0xff] %vm349_vm1, %v4523_v63 }
 0x1c5   : > { %v1034_v6 = vpop.permute.xlu0 %1033  ;;  %v4520_v30 = vsel %vm740_vm2, %v776_v41, %v4509_v57  ;;  %v4553_v41 = vsel %vm740_vm2, %v4291_v52, 0.0 }
 0x1c6   : > { %v1505_v38 = vpop.permute.xlu1 %1504  ;;  %1123 = vst.msk [vmem:[#allocation2 + $0x38] sm:$0xff] %vm1115_vm5, %v1034_v6 }
 0x1c7   : > { %1596 = vst.msk [vmem:[#allocation2 + $0x28] sm:$0xff] %vm1590_vm8, %v1505_v38  ;;  %1908 = vrot.lane.b32.xlu0 %v978_v25, %s3644_s14 }
 0x1c8   : > { %1906 = vrot.lane.b32.xlu1 %v976_v40, %s3644_s14  ;;  %899 = vst.msk [vmem:[#allocation2 + $0xc8] sm:$0xff] %vm349_vm1, %v4520_v30 }
 0x1c9   : > { %v1639_v32 = vpop.permute.xlu0 %1638 }
 0x1ca   : > { %v2022_v58 = vpop.permute.xlu1 %2021  ;;  %v2146_v54 = vld [vmem:[#allocation2 + $0x10] sm:$0xff]  ;;  %1730 = vst.msk [vmem:[#allocation2 + $0x28] sm:$0xff] %vm1724_vm9, %v1639_v32 }
 0x1cb   : > { %2115 = vst.msk [vmem:[#allocation2 + $0x18] sm:$0xff] %vm2111_vm12, %v2022_v58  ;;  %3393 = vmatprep.mubr.msk.f32.mxu1 %vm2188_vm13, %v2146_v54  ;;  %1047 = vrot.lane.b32.xlu0 %v976_v40, %s3639_s21 }
 0x1cc   : > { %1518 = vrot.lane.b32.xlu1 %v976_v40, %s3642_s9 }
 0x1cd   : > { %v1244_v4 = vpop.permute.xlu0 %1243 }
 0x1ce   : > { %v1242_v54 = vpop.permute.xlu1 %1241  ;;  %1333 = vst.msk [vmem:[#allocation2 + $0x38] sm:$0xff] %vm1325_vm6, %v1244_v4  ;;  %v979_v4 = vrot.slane %v4298_v59, 1 }
 0x1cf   : > { %1332 = vst.msk [vmem:[#allocation2 + $0x30] sm:$0xff] %vm1325_vm6, %v1242_v54  ;;  %1652 = vrot.lane.b32.xlu0 %v1186_v61, %s3643_s13  ;;  %v982_v54 = vrot.slane %v4553_v41, 1 }
 0x1d0   : > { %2035 = vrot.lane.b32.xlu1 %v1186_v61, %s3645_s15 }
 0x1d1   : > { %v1768_v38 = vpop.permute.xlu0 %1767 }
 0x1d2   : > { %v1766_v18 = vpop.permute.xlu1 %1765  ;;  %v2147_v6 = vld [vmem:[#allocation2 + $0x18] sm:$0xff]  ;;  %1859 = vst.msk [vmem:[#allocation2 + $0x28] sm:$0xff] %vm1853_vm10, %v1768_v38 }
 0x1d3   : > { %1858 = vst.msk [vmem:[#allocation2 + $0x20] sm:$0xff] %vm1853_vm10, %v1766_v18  ;;  %3394 = vmatmul.mubr.msk.f32.gmra.mrb[18].mxu1 %vm2188_vm13, %v2147_v6  ;;  %1049 = vrot.lane.b32.xlu0 %v978_v25, %s3639_s21 }
 0x1d4   : > { %1520 = vrot.lane.b32.xlu1 %v978_v25, %s3642_s9 }
 0x1d5   : > { %v1374_v39 = vpop.permute.xlu0 %1373 }
 0x1d6   : > { %v1372_v40 = vpop.permute.xlu1 %1371  ;;  %1463 = vst.msk [vmem:[#allocation2 + $0x38] sm:$0xff] %vm1455_vm7, %v1374_v39 }
 0x1d7   : > { %1462 = vst.msk [vmem:[#allocation2 + $0x30] sm:$0xff] %vm1455_vm7, %v1372_v40  ;;  %1654 = vrot.lane.b32.xlu0 %v1188_v56, %s3643_s13  ;;  %v4577_v40 = vld [vmem:[%s5542_s2] ss:$0 sm:$0xff] }
 0x1d8   : > { %2037 = vrot.lane.b32.xlu1 %v1188_v56, %s3645_s15 }
 0x1d9   : > { %v1897_v58 = vpop.permute.xlu0 %1896 }
 0x1da   : > { %v1895_v36 = vpop.permute.xlu1 %1894  ;;  %1988 = vst.msk [vmem:[#allocation2 + $0x28] sm:$0xff] %vm1982_vm11, %v1897_v58 }
 0x1db   : > { %1987 = vst.msk [vmem:[#allocation2 + $0x20] sm:$0xff] %vm1982_vm11, %v1895_v36  ;;  %1259 = vrot.lane.b32.xlu0 %v1188_v56, %s3638_s20 }
 0x1dc   : > { %1257 = vrot.lane.b32.xlu1 %v1186_v61, %s3638_s20  ;;  %v980_v61 = vrot.slane %v4304_v55, 1 }
 0x1dd   : > { %v1036_v32 = vpop.permute.xlu0 %1035 }
 0x1de   : > { %v1507_v25 = vpop.permute.xlu1 %1506  ;;  %1124 = vst.msk [vmem:[#allocation2 + $0x40] sm:$0xff] %vm1115_vm5, %v1036_v32  ;;  %v981_v38 = vsel %vm938_vm4, %v979_v4, %v980_v61  ;;  %v983_v6 = vsel %vm938_vm4, %v980_v61, %v982_v54  ;;  %v1190_v54 = vrot.slane %v4304_v55, 2 }
 0x1df   : > { %1597 = vst.msk [vmem:[#allocation2 + $0x30] sm:$0xff] %vm1590_vm8, %v1507_v25  ;;  %1783 = vrot.lane.b32.xlu0 %v4304_v55, %s3641_s8 }
 0x1e0   : > { %1781 = vrot.lane.b32.xlu1 %v4298_v59, %s3641_s8 }
 0x1e1   : > { %v1641_v29 = vpop.permute.xlu0 %1640 }
 0x1e2   : > { %v2024_v37 = vpop.permute.xlu1 %2023  ;;  %1731 = vst.msk [vmem:[#allocation2 + $0x30] sm:$0xff] %vm1724_vm9, %v1641_v29  ;;  %v1189_v29 = vrot.slane %v4298_v59, 2 }
 0x1e3   : > { %2116 = vst.msk [vmem:[#allocation2 + $0x20] sm:$0xff] %vm2111_vm12, %v2024_v37  ;;  %1389 = vrot.lane.b32.xlu0 %v4304_v55, %s3640_s29  ;;  %v3370_v26 = vpop.f32.mrb[8].mxu1 }
 0x1e4   : > { %1387 = vrot.lane.b32.xlu1 %v4298_v59, %s3640_s29  ;;  %v642_v39 = vadd.f32 %v4577_v40, %v3370_v26  ;;  %v636_v56 = vpop.f32.mrb[9].mxu1 }
 0x1e5   : > { %v1038_v18 = vpop.permute.xlu0 %1037  ;;  %v637_v36 = vadd.f32 %v4577_v40, %v636_v56 }
 0x1e6   : > { %v1509_v52 = vpop.permute.xlu1 %1508  ;;  %1125 = vst.msk [vmem:[#allocation2 + $0x48] sm:$0xff] %vm1115_vm5, %v1038_v18  ;;  %v700_v37 = vmax.f32 %v642_v39, 0.0  ;;  %v1191_v39 = vsel %vm1148_vm3, %v1189_v29, %v1190_v54 }
 0x1e7   : > { %1598 = vst.msk [vmem:[#allocation2 + $0x38] sm:$0xff] %vm1590_vm8, %v1509_v52  ;;  %1912 = vrot.lane.b32.xlu0 %v983_v6, %s3644_s14  ;;  %v699_v4 = vmax.f32 %v637_v36, 0.0 }
 0x1e8   : > { %1910 = vrot.lane.b32.xlu1 %v981_v38, %s3644_s14  ;;  %v4588_v61 = vrot.slane %v700_v37, 7 }
 0x1e9   : > { %v1643_v25 = vpop.permute.xlu0 %1642  ;;  %v779_v52 = vrot.slane %v699_v4, 7 }
 0x1ea   : > { %v2026_v58 = vpop.permute.xlu1 %2025  ;;  %v2148_v32 = vld [vmem:[#allocation2 + $0x20] sm:$0xff]  ;;  %1732 = vst.msk [vmem:[#allocation2 + $0x38] sm:$0xff] %vm1724_vm9, %v1643_v25 }
 0x1eb   : > { %2117 = vst.msk [vmem:[#allocation2 + $0x28] sm:$0xff] %vm2111_vm12, %v2026_v58  ;;  %3396 = vmatprep.mubr.msk.f32.mxu1 %vm2188_vm13, %v2148_v32  ;;  %1051 = vrot.lane.b32.xlu0 %v981_v38, %s3639_s21  ;;  %v4595_v59 = vsel %vm740_vm2, %v779_v52, %v4588_v61  ;;  %v4598_v55 = vsel %vm740_vm2, 0.0, %v779_v52  ;;  %v1192_v58 = vrot.slane %v4553_v41, 2 }
 0x1ec   : > { %1522 = vrot.lane.b32.xlu1 %v981_v38, %s3642_s9  ;;  %900 = vst.msk [vmem:[#allocation2 + $0xd0] sm:$0xff] %vm349_vm1, %v4598_v55  ;;  %901 = vst.msk [vmem:[#allocation2 + $0xd8] sm:$0xff] %vm349_vm1, %v4595_v59 }
 0x1ed   : > { %v1248_v26 = vpop.permute.xlu0 %1247  ;;  %v1193_v37 = vsel %vm1148_vm3, %v1190_v54, %v1192_v58  ;;  %v3373_v54 = vpop.f32.mrb[10].mxu1 }
 0x1ee   : > { %v1246_v18 = vpop.permute.xlu1 %1245  ;;  %1335 = vst.msk [vmem:[#allocation2 + $0x48] sm:$0xff] %vm1325_vm6, %v1248_v26  ;;  %v652_v52 = vadd.f32 %v4577_v40, %v3373_v54 }
 0x1ef   : > { %1334 = vst.msk [vmem:[#allocation2 + $0x40] sm:$0xff] %vm1325_vm6, %v1246_v18  ;;  %1656 = vrot.lane.b32.xlu0 %v1191_v39, %s3643_s13  ;;  %v646_v18 = vpop.f32.mrb[11].mxu1 }
 0x1f0   : > { %2039 = vrot.lane.b32.xlu1 %v1191_v39, %s3645_s15  ;;  %v647_v26 = vadd.f32 %v4577_v40, %v646_v18 }
 0x1f1   : > { %v1772_v56 = vpop.permute.xlu0 %1771 }
 0x1f2   : > { %v1770_v38 = vpop.permute.xlu1 %1769  ;;  %v2149_v36 = vld [vmem:[#allocation2 + $0x28] sm:$0xff]  ;;  %1861 = vst.msk [vmem:[#allocation2 + $0x38] sm:$0xff] %vm1853_vm10, %v1772_v56 }
 0x1f3   : > { %1860 = vst.msk [vmem:[#allocation2 + $0x30] sm:$0xff] %vm1853_vm10, %v1770_v38  ;;  %3397 = vmatmul.mubr.msk.f32.gmra.mrb[20].mxu1 %vm2188_vm13, %v2149_v36  ;;  %1053 = vrot.lane.b32.xlu0 %v983_v6, %s3639_s21  ;;  %v702_v36 = vmax.f32 %v652_v52, 0.0 }
 0x1f4   : > { %1524 = vrot.lane.b32.xlu1 %v983_v6, %s3642_s9 }
 0x1f5   : > { %v1378_v32 = vpop.permute.xlu0 %1377 }
 0x1f6   : > { %v1376_v25 = vpop.permute.xlu1 %1375  ;;  %1465 = vst.msk [vmem:[#allocation2 + $0x48] sm:$0xff] %vm1455_vm7, %v1378_v32 }
 0x1f7   : > { %1464 = vst.msk [vmem:[#allocation2 + $0x40] sm:$0xff] %vm1455_vm7, %v1376_v25  ;;  %1658 = vrot.lane.b32.xlu0 %v1193_v37, %s3643_s13  ;;  %v701_v25 = vmax.f32 %v647_v26, 0.0 }
 0x1f8   : > { %2041 = vrot.lane.b32.xlu1 %v1193_v37, %s3645_s15 }
 0x1f9   : > { %v1901_v29 = vpop.permute.xlu0 %1900 }
 0x1fa   : > { %v1899_v41 = vpop.permute.xlu1 %1898  ;;  %1990 = vst.msk [vmem:[#allocation2 + $0x38] sm:$0xff] %vm1982_vm11, %v1901_v29 }
 0x1fb   : > { %1989 = vst.msk [vmem:[#allocation2 + $0x30] sm:$0xff] %vm1982_vm11, %v1899_v41  ;;  %1263 = vrot.lane.b32.xlu0 %v1193_v37, %s3638_s20 }
 0x1fc   : > { %1261 = vrot.lane.b32.xlu1 %v1191_v39, %s3638_s20  ;;  %v3376_v39 = vpop.f32.mrb[12].mxu1 }
 0x1fd   : > { %v1040_v4 = vpop.permute.xlu0 %1039  ;;  %v662_v58 = vadd.f32 %v4577_v40, %v3376_v39  ;;  %v656_v32 = vpop.f32.mrb[13].mxu1 }
 0x1fe   : > { %v1511_v6 = vpop.permute.xlu1 %1510  ;;  %1126 = vst.msk [vmem:[#allocation2 + $0x50] sm:$0xff] %vm1115_vm5, %v1040_v4  ;;  %v657_v41 = vadd.f32 %v4577_v40, %v656_v32  ;;  %v3379_v29 = vpop.f32.mrb[14].mxu1 }
 0x1ff   : > { %1599 = vst.msk [vmem:[#allocation2 + $0x40] sm:$0xff] %vm1590_vm8, %v1511_v6  ;;  %1055 = vrot.lane.b32.xlu0 %v3993_v60, %s3639_s21  ;;  %v4636_v60 = vrot.slane %v702_v36, 7  ;;  %v704_v37 = vmax.f32 %v662_v58, 0.0  ;;  %v782_v6 = vrot.slane %v701_v25, 7  ;;  %v672_v4 = vadd.f32 %v4577_v40, %v3379_v29  ;;  %v666_v54 = vpop.f32.mrb[15].mxu1 }
 0x200   : > { %1528 = vrot.lane.b32.xlu1 %v4001_v10, %s3642_s9  ;;  %v703_v39 = vmax.f32 %v657_v41, 0.0 }
 0x201   : > { %v1645_v56 = vpop.permute.xlu0 %1644  ;;  %v4640_v26 = vrot.slane %v704_v37, 7  ;;  %v4650_v36 = vsel %vm740_vm2, 0.0, %v782_v6  ;;  %v706_v58 = vmax.f32 %v672_v4, 0.0 }
 0x202   : > { %v2028_v38 = vpop.permute.xlu1 %2027  ;;  %1733 = vst.msk [vmem:[#allocation2 + $0x40] sm:$0xff] %vm1724_vm9, %v1645_v56  ;;  %v4647_v56 = vsel %vm740_vm2, %v782_v6, %v4636_v60 }
 0x203   : > { %2118 = vst.msk [vmem:[#allocation2 + $0x30] sm:$0xff] %vm2111_vm12, %v2028_v38  ;;  %1660 = vrot.lane.b32.xlu0 %v4016_v33, %s3643_s13  ;;  %v667_v38 = vadd.f32 %v4577_v40, %v666_v54  ;;  %v785_v40 = vrot.slane %v703_v39, 7  ;;  %v990_v39 = vrot.slane %v4384_v50, 1 }
 0x204   : > { %2045 = vrot.lane.b32.xlu1 %v4104_v17, %s3645_s15  ;;  %902 = vst.msk [vmem:[#allocation2 + $0xe0] sm:$0xff] %vm349_vm1, %v4650_v36  ;;  %903 = vst.msk [vmem:[#allocation2 + $0xe8] sm:$0xff] %vm349_vm1, %v4647_v56 }
 0x205   : > { %v1042_v18 = vpop.permute.xlu0 %1041  ;;  %v705_v25 = vmax.f32 %v667_v38, 0.0  ;;  %v4662_v29 = vsel %vm740_vm2, %v785_v40, %v4640_v26 }
 0x206   : > { %v1513_v52 = vpop.permute.xlu1 %1512  ;;  %1127 = vst.msk [vmem:[#allocation2 + $0x58] sm:$0xff] %vm1115_vm5, %v1042_v18  ;;  %v989_v18 = vrot.slane %v4387_v46, 1 }
 0x207   : > { %1600 = vst.msk [vmem:[#allocation2 + $0x48] sm:$0xff] %vm1590_vm8, %v1513_v52  ;;  %1057 = vrot.lane.b32.xlu0 %v4001_v10, %s3639_s21  ;;  %v4667_v10 = vrot.slane %v706_v58, 7  ;;  %v4669_v6 = vrot.slane %v705_v25, 7 }
 0x208   : > { %1265 = vrot.lane.b32.xlu1 %v4016_v33, %s3638_s20  ;;  %v4665_v33 = vsel %vm740_vm2, 0.0, %v785_v40  ;;  %905 = vst.msk [vmem:[#allocation2 + $0xf8] sm:$0xff] %vm349_vm1, %v4662_v29  ;;  %v991_v25 = vsel %vm938_vm4, %v989_v18, %v990_v39 }
 0x209   : > { %v1647_v37 = vpop.permute.xlu0 %1646  ;;  %904 = vst.msk [vmem:[#allocation2 + $0xf0] sm:$0xff] %vm349_vm1, %v4665_v33  ;;  %v4685_v4 = vsel %vm740_vm2, %v4669_v6, %v4667_v10 }
 0x20a   : > { %v2030_v32 = vpop.permute.xlu1 %2029  ;;  %v2150_v41 = vld [vmem:[#allocation2 + $0x30] sm:$0xff]  ;;  %1734 = vst.msk [vmem:[#allocation2 + $0x48] sm:$0xff] %vm1724_vm9, %v1647_v37 }
 0x20b   : > { %2119 = vst.msk [vmem:[#allocation2 + $0x38] sm:$0xff] %vm2111_vm12, %v2030_v32  ;;  %3399 = vmatprep.mubr.msk.f32.mxu1 %vm2188_vm13, %v2150_v41  ;;  %1662 = vrot.lane.b32.xlu0 %v4104_v17, %s3643_s13  ;;  %v867_v32 = vsel %vm740_vm2, %v4375_v21, 0.0 }
 0x20c   : > { %1789 = vrot.lane.b32.xlu1 %v4387_v46, %s3641_s8  ;;  %v992_v41 = vrot.slane %v867_v32, 1 }
 0x20d   : > { %v1252_v52 = vpop.permute.xlu0 %1251 }
 0x20e   : > { %v1250_v54 = vpop.permute.xlu1 %1249  ;;  %1337 = vst.msk [vmem:[#allocation2 + $0x58] sm:$0xff] %vm1325_vm6, %v1252_v52  ;;  %v1200_v52 = vrot.slane %v4384_v50, 2 }
 0x20f   : > { %1336 = vst.msk [vmem:[#allocation2 + $0x50] sm:$0xff] %vm1325_vm6, %v1250_v54  ;;  %1267 = vrot.lane.b32.xlu0 %v4104_v17, %s3638_s20  ;;  %v1199_v54 = vrot.slane %v4387_v46, 2 }
 0x210   : > { %1395 = vrot.lane.b32.xlu1 %v4387_v46, %s3640_s29 }
 0x211   : > { %v1776_v40 = vpop.permute.xlu0 %1775 }
 0x212   : > { %v1774_v38 = vpop.permute.xlu1 %1773  ;;  %v2151_v58 = vld [vmem:[#allocation2 + $0x38] sm:$0xff]  ;;  %1863 = vst.msk [vmem:[#allocation2 + $0x48] sm:$0xff] %vm1853_vm10, %v1776_v40  ;;  %v993_v40 = vsel %vm938_vm4, %v990_v39, %v992_v41 }
 0x213   : > { %1862 = vst.msk [vmem:[#allocation2 + $0x40] sm:$0xff] %vm1853_vm10, %v1774_v38  ;;  %3400 = vmatmul.mubr.msk.f32.gmra.mrb[22].mxu1 %vm2188_vm13, %v2151_v58  ;;  %1791 = vrot.lane.b32.xlu0 %v4384_v50, %s3641_s8  ;;  %v1201_v38 = vsel %vm1148_vm3, %v1199_v54, %v1200_v52 }
 0x214   : > { %1918 = vrot.lane.b32.xlu1 %v991_v25, %s3644_s14 }
 0x215   : > { %v1382_v37 = vpop.permute.xlu0 %1381 }
 0x216   : > { %v1380_v17 = vpop.permute.xlu1 %1379  ;;  %1467 = vst.msk [vmem:[#allocation2 + $0x58] sm:$0xff] %vm1455_vm7, %v1382_v37 }
 0x217   : > { %1466 = vst.msk [vmem:[#allocation2 + $0x50] sm:$0xff] %vm1455_vm7, %v1380_v17  ;;  %1397 = vrot.lane.b32.xlu0 %v4384_v50, %s3640_s29  ;;  %v1202_v17 = vrot.slane %v867_v32, 2 }
 0x218   : > { %1530 = vrot.lane.b32.xlu1 %v991_v25, %s3642_s9 }
 0x219   : > { %v1905_v18 = vpop.permute.xlu0 %1904  ;;  %v1203_v39 = vsel %vm1148_vm3, %v1200_v52, %v1202_v17 }
 0x21a   : > { %v1903_v21 = vpop.permute.xlu1 %1902  ;;  %1992 = vst.msk [vmem:[#allocation2 + $0x48] sm:$0xff] %vm1982_vm11, %v1905_v18 }
 0x21b   : > { %1991 = vst.msk [vmem:[#allocation2 + $0x40] sm:$0xff] %vm1982_vm11, %v1903_v21  ;;  %1920 = vrot.lane.b32.xlu0 %v993_v40, %s3644_s14 }
 0x21c   : > { %2047 = vrot.lane.b32.xlu1 %v1201_v38, %s3645_s15 }
 0x21d   : > { %v1044_v58 = vpop.permute.xlu0 %1043 }
 0x21e   : > { %v1515_v46 = vpop.permute.xlu1 %1514  ;;  %1128 = vst.msk [vmem:[#allocation2 + $0x60] sm:$0xff] %vm1115_vm5, %v1044_v58 }
 0x21f   : > { %1601 = vst.msk [vmem:[#allocation2 + $0x50] sm:$0xff] %vm1590_vm8, %v1515_v46  ;;  %1059 = vrot.lane.b32.xlu0 %v991_v25, %s3639_s21 }
 0x220   : > { %1532 = vrot.lane.b32.xlu1 %v993_v40, %s3642_s9 }
 0x221   : > { %v1649_v37 = vpop.permute.xlu0 %1648 }
 0x222   : > { %v2032_v50 = vpop.permute.xlu1 %2031  ;;  %1735 = vst.msk [vmem:[#allocation2 + $0x50] sm:$0xff] %vm1724_vm9, %v1649_v37  ;;  %v868_v37 = vsel %vm740_vm2, %v4442_v42, 0.0 }
 0x223   : > { %2120 = vst.msk [vmem:[#allocation2 + $0x40] sm:$0xff] %vm2111_vm12, %v2032_v50  ;;  %1664 = vrot.lane.b32.xlu0 %v1201_v38, %s3643_s13 }
 0x224   : > { %2049 = vrot.lane.b32.xlu1 %v1203_v39, %s3645_s15 }
 0x225   : > { %v1046_v41 = vpop.permute.xlu0 %1045 }
 0x226   : > { %v1517_v32 = vpop.permute.xlu1 %1516  ;;  %1129 = vst.msk [vmem:[#allocation2 + $0x68] sm:$0xff] %vm1115_vm5, %v1046_v41  ;;  %v997_v41 = vrot.slane %v868_v37, 1 }
 0x227   : > { %1602 = vst.msk [vmem:[#allocation2 + $0x58] sm:$0xff] %vm1590_vm8, %v1517_v32  ;;  %1061 = vrot.lane.b32.xlu0 %v993_v40, %s3639_s21  ;;  %v995_v40 = vrot.slane %v4451_v13, 1 }
 0x228   : > { %1269 = vrot.lane.b32.xlu1 %v1201_v38, %s3638_s20  ;;  %v994_v38 = vrot.slane %v4454_v0, 1 }
 0x229   : > { %v1651_v54 = vpop.permute.xlu0 %1650 }
 0x22a   : > { %v2034_v25 = vpop.permute.xlu1 %2033  ;;  %v2152_v21 = vld [vmem:[#allocation2 + $0x40] sm:$0xff]  ;;  %1736 = vst.msk [vmem:[#allocation2 + $0x58] sm:$0xff] %vm1724_vm9, %v1651_v54  ;;  %v996_v50 = vsel %vm938_vm4, %v994_v38, %v995_v40  ;;  %v1205_v54 = vrot.slane %v4451_v13, 2 }
 0x22b   : > { %2121 = vst.msk [vmem:[#allocation2 + $0x48] sm:$0xff] %vm2111_vm12, %v2034_v25  ;;  %3402 = vmatprep.mubr.msk.f32.mxu1 %vm2188_vm13, %v2152_v21  ;;  %1666 = vrot.lane.b32.xlu0 %v1203_v39, %s3643_s13  ;;  %v1204_v25 = vrot.slane %v4454_v0, 2 }
 0x22c   : > { %1793 = vrot.lane.b32.xlu1 %v4454_v0, %s3641_s8 }
 0x22d   : > { %v1256_v18 = vpop.permute.xlu0 %1255 }
 0x22e   : > { %v1254_v52 = vpop.permute.xlu1 %1253  ;;  %1339 = vst.msk [vmem:[#allocation2 + $0x68] sm:$0xff] %vm1325_vm6, %v1256_v18  ;;  %v998_v18 = vsel %vm938_vm4, %v995_v40, %v997_v41 }
 0x22f   : > { %1338 = vst.msk [vmem:[#allocation2 + $0x60] sm:$0xff] %vm1325_vm6, %v1254_v52  ;;  %1271 = vrot.lane.b32.xlu0 %v1203_v39, %s3638_s20  ;;  %v1206_v52 = vsel %vm1148_vm3, %v1204_v25, %v1205_v54 }
 0x230   : > { %1399 = vrot.lane.b32.xlu1 %v4454_v0, %s3640_s29 }
 0x231   : > { %v1780_v58 = vpop.permute.xlu0 %1779 }
 0x232   : > { %v1778_v46 = vpop.permute.xlu1 %1777  ;;  %v2153_v17 = vld [vmem:[#allocation2 + $0x48] sm:$0xff]  ;;  %1865 = vst.msk [vmem:[#allocation2 + $0x58] sm:$0xff] %vm1853_vm10, %v1780_v58 }
 0x233   : > { %1864 = vst.msk [vmem:[#allocation2 + $0x50] sm:$0xff] %vm1853_vm10, %v1778_v46  ;;  %3403 = vmatmul.mubr.msk.f32.gmra.mrb[24].mxu1 %vm2188_vm13, %v2153_v17  ;;  %1795 = vrot.lane.b32.xlu0 %v4451_v13, %s3641_s8  ;;  %v1207_v46 = vrot.slane %v868_v37, 2 }
 0x234   : > { %1922 = vrot.lane.b32.xlu1 %v996_v50, %s3644_s14 }
 0x235   : > { %v1386_v32 = vpop.permute.xlu0 %1385  ;;  %v1208_v40 = vsel %vm1148_vm3, %v1205_v54, %v1207_v46  ;;  %v999_v54 = vrot.slane %v4523_v63, 1 }
 0x236   : > { %v1384_v39 = vpop.permute.xlu1 %1383  ;;  %1469 = vst.msk [vmem:[#allocation2 + $0x68] sm:$0xff] %vm1455_vm7, %v1386_v32 }
 0x237   : > { %1468 = vst.msk [vmem:[#allocation2 + $0x60] sm:$0xff] %vm1455_vm7, %v1384_v39  ;;  %1401 = vrot.lane.b32.xlu0 %v4451_v13, %s3640_s29 }
 0x238   : > { %1534 = vrot.lane.b32.xlu1 %v996_v50, %s3642_s9 }
 0x239   : > { %v1909_v21 = vpop.permute.xlu0 %1908 }
 0x23a   : > { %v1907_v42 = vpop.permute.xlu1 %1906  ;;  %1994 = vst.msk [vmem:[#allocation2 + $0x58] sm:$0xff] %vm1982_vm11, %v1909_v21  ;;  %v4793_v21 = vsel %vm740_vm2, 0.0, %v4669_v6  ;;  %v1490_v6 = vrot.slane %v4685_v4, 1 }
 0x23b   : > { %1993 = vst.msk [vmem:[#allocation2 + $0x50] sm:$0xff] %vm1982_vm11, %v1907_v42  ;;  %1924 = vrot.lane.b32.xlu0 %v998_v18, %s3644_s14  ;;  %v1000_v42 = vrot.slane %v4520_v30, 1 }
 0x23c   : > { %2051 = vrot.lane.b32.xlu1 %v1206_v52, %s3645_s15 }
 0x23d   : > { %v1048_v38 = vpop.permute.xlu0 %1047  ;;  %v1001_v46 = vsel %vm938_vm4, %v999_v54, %v1000_v42 }
 0x23e   : > { %v1519_v0 = vpop.permute.xlu1 %1518  ;;  %1130 = vst.msk [vmem:[#allocation2 + $0x70] sm:$0xff] %vm1115_vm5, %v1048_v38  ;;  %v1489_v38 = vrot.slane %v4793_v21, 1 }
 0x23f   : > { %1603 = vst.msk [vmem:[#allocation2 + $0x60] sm:$0xff] %vm1590_vm8, %v1519_v0  ;;  %1063 = vrot.lane.b32.xlu0 %v996_v50, %s3639_s21 }
 0x240   : > { %1536 = vrot.lane.b32.xlu1 %v998_v18, %s3642_s9 }
 0x241   : > { %v1653_v58 = vpop.permute.xlu0 %1652 }
 0x242   : > { %v2036_v13 = vpop.permute.xlu1 %2035  ;;  %1737 = vst.msk [vmem:[#allocation2 + $0x60] sm:$0xff] %vm1724_vm9, %v1653_v58  ;;  %v873_v58 = vsel %vm740_vm2, %v4667_v10, 0.0 }
 0x243   : > { %2122 = vst.msk [vmem:[#allocation2 + $0x50] sm:$0xff] %vm2111_vm12, %v2036_v13  ;;  %1668 = vrot.lane.b32.xlu0 %v1206_v52, %s3643_s13  ;;  %v869_v13 = vsel %vm740_vm2, %v4509_v57, 0.0  ;;  %v1209_v57 = vrot.slane %v4523_v63, 2  ;;  %v1492_v10 = vrot.slane %v873_v58, 1 }
 0x244   : > { %2053 = vrot.lane.b32.xlu1 %v1208_v40, %s3645_s15 }
 0x245   : > { %v1050_v37 = vpop.permute.xlu0 %1049 }
 0x246   : > { %v1521_v17 = vpop.permute.xlu1 %1520  ;;  %1131 = vst.msk [vmem:[#allocation2 + $0x78] sm:$0xff] %vm1115_vm5, %v1050_v37  ;;  %v4809_v37 = vsel %vm938_vm4, %v1489_v38, %v1490_v6 }
 0x247   : > { %1604 = vst.msk [vmem:[#allocation2 + $0x68] sm:$0xff] %vm1590_vm8, %v1521_v17  ;;  %1065 = vrot.lane.b32.xlu0 %v998_v18, %s3639_s21 }
 0x248   : > { %1273 = vrot.lane.b32.xlu1 %v1206_v52, %s3638_s20 }
 0x249   : > { %v1655_v39 = vpop.permute.xlu0 %1654 }
 0x24a   : > { %v2038_v50 = vpop.permute.xlu1 %2037  ;;  %v2154_v32 = vld [vmem:[#allocation2 + $0x50] sm:$0xff]  ;;  %1738 = vst.msk [vmem:[#allocation2 + $0x68] sm:$0xff] %vm1724_vm9, %v1655_v39  ;;  %v1210_v39 = vrot.slane %v4520_v30, 2 }
 0x24b   : > { %2123 = vst.msk [vmem:[#allocation2 + $0x58] sm:$0xff] %vm2111_vm12, %v2038_v50  ;;  %3405 = vmatprep.mubr.msk.f32.mxu1 %vm2188_vm13, %v2154_v32  ;;  %1670 = vrot.lane.b32.xlu0 %v1208_v40, %s3643_s13  ;;  %v1002_v50 = vrot.slane %v869_v13, 1  ;;  %v1626_v32 = vrot.slane %v873_v58, 2 }
 0x24c   : > { %1797 = vrot.lane.b32.xlu1 %v4523_v63, %s3641_s8 }
 0x24d   : > { %v1260_v25 = vpop.permute.xlu0 %1259 }
 0x24e   : > { %v1258_v41 = vpop.permute.xlu1 %1257  ;;  %1341 = vst.msk [vmem:[#allocation2 + $0x78] sm:$0xff] %vm1325_vm6, %v1260_v25 }
 0x24f   : > { %1340 = vst.msk [vmem:[#allocation2 + $0x70] sm:$0xff] %vm1325_vm6, %v1258_v41  ;;  %1275 = vrot.lane.b32.xlu0 %v1208_v40, %s3638_s20  ;;  %v1623_v41 = vrot.slane %v4793_v21, 2 }
 0x250   : > { %1403 = vrot.lane.b32.xlu1 %v4523_v63, %s3640_s29  ;;  %v1003_v63 = vsel %vm938_vm4, %v1000_v42, %v1002_v50 }
 0x251   : > { %v1784_v18 = vpop.permute.xlu0 %1783 }
 0x252   : > { %v1782_v52 = vpop.permute.xlu1 %1781  ;;  %v2155_v0 = vld [vmem:[#allocation2 + $0x58] sm:$0xff]  ;;  %1867 = vst.msk [vmem:[#allocation2 + $0x68] sm:$0xff] %vm1853_vm10, %v1784_v18  ;;  %v1624_v18 = vrot.slane %v4685_v4, 2 }
 0x253   : > { %1866 = vst.msk [vmem:[#allocation2 + $0x60] sm:$0xff] %vm1853_vm10, %v1782_v52  ;;  %3406 = vmatmul.mubr.msk.f32.gmra.mrb[26].mxu1 %vm2188_vm13, %v2155_v0  ;;  %1799 = vrot.lane.b32.xlu0 %v4520_v30, %s3641_s8  ;;  %v1211_v52 = vsel %vm1148_vm3, %v1209_v57, %v1210_v39 }
 0x254   : > { %1926 = vrot.lane.b32.xlu1 %v1001_v46, %s3644_s14  ;;  %v4830_v0 = vsel %vm1148_vm3, %v1623_v41, %v1624_v18  ;;  %v4833_v38 = vsel %vm1148_vm3, %v1624_v18, %v1626_v32  ;;  %v1005_v32 = vrot.slane %v4595_v59, 1  ;;  %v1215_v18 = vrot.slane %v4595_v59, 2 }
 0x255   : > { %v1390_v17 = vpop.permute.xlu0 %1389 }
 0x256   : > { %v1388_v40 = vpop.permute.xlu1 %1387  ;;  %1471 = vst.msk [vmem:[#allocation2 + $0x78] sm:$0xff] %vm1455_vm7, %v1390_v17  ;;  %v1212_v17 = vrot.slane %v869_v13, 2 }
 0x257   : > { %1470 = vst.msk [vmem:[#allocation2 + $0x70] sm:$0xff] %vm1455_vm7, %v1388_v40  ;;  %1405 = vrot.lane.b32.xlu0 %v4520_v30, %s3640_s29  ;;  %v4827_v30 = vsel %vm938_vm4, %v1490_v6, %v1492_v10  ;;  %v1004_v10 = vrot.slane %v4598_v55, 1 }
 0x258   : > { %1538 = vrot.lane.b32.xlu1 %v1001_v46, %s3642_s9  ;;  %v1213_v50 = vsel %vm1148_vm3, %v1210_v39, %v1212_v17 }
 0x259   : > { %v1913_v54 = vpop.permute.xlu0 %1912 }
 0x25a   : > { %v1911_v25 = vpop.permute.xlu1 %1910  ;;  %1996 = vst.msk [vmem:[#allocation2 + $0x68] sm:$0xff] %vm1982_vm11, %v1913_v54 }
 0x25b   : > { %1995 = vst.msk [vmem:[#allocation2 + $0x60] sm:$0xff] %vm1982_vm11, %v1911_v25  ;;  %1928 = vrot.lane.b32.xlu0 %v1003_v63, %s3644_s14 }
 0x25c   : > { %2055 = vrot.lane.b32.xlu1 %v1211_v52, %s3645_s15 }
 0x25d   : > { %v1052_v40 = vpop.permute.xlu0 %1051 }
 0x25e   : > { %v1523_v58 = vpop.permute.xlu1 %1522  ;;  %1132 = vst.msk [vmem:[#allocation2 + $0x80] sm:$0xff] %vm1115_vm5, %v1052_v40 }
 0x25f   : > { %1605 = vst.msk [vmem:[#allocation2 + $0x70] sm:$0xff] %vm1590_vm8, %v1523_v58  ;;  %1067 = vrot.lane.b32.xlu0 %v1001_v46, %s3639_s21 }
 0x260   : > { %1540 = vrot.lane.b32.xlu1 %v1003_v63, %s3642_s9 }
 0x261   : > { %v1657_v6 = vpop.permute.xlu0 %1656 }
 0x262   : > { %v2040_v42 = vpop.permute.xlu1 %2039  ;;  %1739 = vst.msk [vmem:[#allocation2 + $0x70] sm:$0xff] %vm1724_vm9, %v1657_v6 }
 0x263   : > { %2124 = vst.msk [vmem:[#allocation2 + $0x60] sm:$0xff] %vm2111_vm12, %v2040_v42  ;;  %1672 = vrot.lane.b32.xlu0 %v1211_v52, %s3643_s13 }
 0x264   : > { %1868 = vst.msk [vmem:[#allocation2 + $0x70] sm:$0xff] %vm1853_vm10, %v4335_v11  ;;  %2057 = vrot.lane.b32.xlu1 %v1213_v50, %s3645_s15 }
 0x265   : > { %1997 = vst.msk [vmem:[#allocation2 + $0x70] sm:$0xff] %vm1982_vm11, %v4368_v14  ;;  %v1054_v13 = vpop.permute.xlu0 %1053 }
 0x266   : > { %2126 = vst.msk [vmem:[#allocation2 + $0x70] sm:$0xff] %vm2111_vm12, %v4395_v22  ;;  %v1525_v46 = vpop.permute.xlu1 %1524 }
 0x267   : > { %1606 = vst.msk [vmem:[#allocation2 + $0x78] sm:$0xff] %vm1590_vm8, %v1525_v46  ;;  %1069 = vrot.lane.b32.xlu0 %v1003_v63, %s3639_s21  ;;  %v1214_v63 = vrot.slane %v4598_v55, 2 }
 0x268   : > { %1133 = vst.msk [vmem:[#allocation2 + $0x88] sm:$0xff] %vm1115_vm5, %v1054_v13  ;;  %1277 = vrot.lane.b32.xlu1 %v1211_v52, %s3638_s20 }
 0x269   : > { %v1659_v57 = vpop.permute.xlu0 %1658  ;;  %v1216_v40 = vsel %vm1148_vm3, %v1214_v63, %v1215_v18 }
 0x26a   : > { %v2042_v11 = vpop.permute.xlu1 %2041  ;;  %v2156_v39 = vld [vmem:[#allocation2 + $0x60] sm:$0xff]  ;;  %1740 = vst.msk [vmem:[#allocation2 + $0x78] sm:$0xff] %vm1724_vm9, %v1659_v57 }
 0x26b   : > { %2125 = vst.msk [vmem:[#allocation2 + $0x68] sm:$0xff] %vm2111_vm12, %v2042_v11  ;;  %3408 = vmatprep.mubr.msk.f32.mxu1 %vm2188_vm13, %v2156_v39  ;;  %1674 = vrot.lane.b32.xlu0 %v1213_v50, %s3643_s13 }
 0x26c   : > { %1869 = vst.msk [vmem:[#allocation2 + $0x78] sm:$0xff] %vm1853_vm10, %v4333_v47  ;;  %1801 = vrot.lane.b32.xlu1 %v4598_v55, %s3641_s8 }
 0x26d   : > { %1998 = vst.msk [vmem:[#allocation2 + $0x78] sm:$0xff] %vm1982_vm11, %v4397_v43  ;;  %v1264_v22 = vpop.permute.xlu0 %1263 }
 0x26e   : > { %v1262_v14 = vpop.permute.xlu1 %1261  ;;  %1343 = vst.msk [vmem:[#allocation2 + $0x88] sm:$0xff] %vm1325_vm6, %v1264_v22 }
 0x26f   : > { %1342 = vst.msk [vmem:[#allocation2 + $0x80] sm:$0xff] %vm1325_vm6, %v1262_v14  ;;  %1279 = vrot.lane.b32.xlu0 %v1213_v50, %s3638_s20 }
 0x270   : > { %1472 = vst.msk [vmem:[#allocation2 + $0x80] sm:$0xff] %vm1455_vm7, %v4341_v5  ;;  %1473 = vst.msk [vmem:[#allocation2 + $0x88] sm:$0xff] %vm1455_vm7, %v4339_v44  ;;  %1407 = vrot.lane.b32.xlu1 %v4598_v55, %s3640_s29  ;;  %v1006_v5 = vsel %vm938_vm4, %v1004_v10, %v1005_v32  ;;  %v870_v44 = vsel %vm740_vm2, %v4588_v61, 0.0 }
 0x271   : > { %1607 = vst.msk [vmem:[#allocation2 + $0x80] sm:$0xff] %vm1590_vm8, %v4377_v62  ;;  %v1056_v43 = vpop.permute.xlu0 %1055  ;;  %v2158_v62 = vld [vmem:[#allocation2 + $0x70] sm:$0xff]  ;;  %v1007_v52 = vrot.slane %v870_v44, 1  ;;  %v1217_v50 = vrot.slane %v870_v44, 2 }
 0x272   : > { %v1529_v47 = vpop.permute.xlu1 %1528  ;;  %v2157_v41 = vld [vmem:[#allocation2 + $0x68] sm:$0xff]  ;;  %1134 = vst.msk [vmem:[#allocation2 + $0x90] sm:$0xff] %vm1115_vm5, %v1056_v43  ;;  %v1009_v43 = vrot.slane %v4650_v36, 1 }
 0x273   : > { %1608 = vst.msk [vmem:[#allocation2 + $0x88] sm:$0xff] %vm1590_vm8, %v1529_v47  ;;  %3409 = vmatmul.mubr.msk.f32.gmra.mrb[28].mxu1 %vm2188_vm13, %v2157_v41  ;;  %1803 = vrot.lane.b32.xlu0 %v4595_v59, %s3641_s8  ;;  %v1008_v17 = vsel %vm938_vm4, %v1005_v32, %v1007_v52  ;;  %v1218_v13 = vsel %vm1148_vm3, %v1215_v18, %v1217_v50  ;;  %v1010_v41 = vrot.slane %v4647_v56, 1 }
 0x274   : > { %1930 = vrot.lane.b32.xlu1 %v1006_v5, %s3644_s14  ;;  %3411 = vmatprep.mubr.msk.f32.mxu1 %vm2188_vm13, %v2158_v62 }
 0x275   : > { %v1661_v54 = vpop.permute.xlu0 %1660  ;;  %v1011_v62 = vsel %vm938_vm4, %v1009_v43, %v1010_v41 }
 0x276   : > { %v2046_v25 = vpop.permute.xlu1 %2045  ;;  %1741 = vst.msk [vmem:[#allocation2 + $0x80] sm:$0xff] %vm1724_vm9, %v1661_v54 }
 0x277   : > { %2127 = vst.msk [vmem:[#allocation2 + $0x78] sm:$0xff] %vm2111_vm12, %v2046_v25  ;;  %1409 = vrot.lane.b32.xlu0 %v4595_v59, %s3640_s29  ;;  %v871_v25 = vsel %vm740_vm2, %v4636_v60, 0.0 }
 0x278   : > { %1542 = vrot.lane.b32.xlu1 %v1006_v5, %s3642_s9  ;;  %v1012_v63 = vrot.slane %v871_v25, 1 }
 0x279   : > { %v1058_v58 = vpop.permute.xlu0 %1057 }
 0x27a   : > { %v1266_v61 = vpop.permute.xlu1 %1265  ;;  %1135 = vst.msk [vmem:[#allocation2 + $0x98] sm:$0xff] %vm1115_vm5, %v1058_v58  ;;  %v1220_v58 = vrot.slane %v4647_v56, 2 }
 0x27b   : > { %1344 = vst.msk [vmem:[#allocation2 + $0x90] sm:$0xff] %vm1325_vm6, %v1266_v61  ;;  %1932 = vrot.lane.b32.xlu0 %v1008_v17, %s3644_s14  ;;  %v1219_v61 = vrot.slane %v4650_v36, 2 }
 0x27c   : > { %2059 = vrot.lane.b32.xlu1 %v1216_v40, %s3645_s15 }
 0x27d   : > { %v1663_v42 = vpop.permute.xlu0 %1662 }
 0x27e   : > { %v1790_v55 = vpop.permute.xlu1 %1789  ;;  %v2159_v6 = vld [vmem:[#allocation2 + $0x78] sm:$0xff]  ;;  %1742 = vst.msk [vmem:[#allocation2 + $0x88] sm:$0xff] %vm1724_vm9, %v1663_v42 }
 0x27f   : > { %1870 = vst.msk [vmem:[#allocation2 + $0x80] sm:$0xff] %vm1853_vm10, %v1790_v55  ;;  %3412 = vmatmul.mubr.msk.f32.gmra.mrb[30].mxu1 %vm2188_vm13, %v2159_v6  ;;  %1071 = vrot.lane.b32.xlu0 %v1006_v5, %s3639_s21  ;;  %v1013_v55 = vsel %vm938_vm4, %v1010_v41, %v1012_v63  ;;  %v1222_v6 = vrot.slane %v871_v25, 2  ;;  %v1014_v41 = vrot.slane %v4665_v33, 1 }
 0x280   : > { %1544 = vrot.lane.b32.xlu1 %v1008_v17, %s3642_s9 }
 0x281   : > { %v1268_v46 = vpop.permute.xlu0 %1267 }
 0x282   : > { %v1396_v59 = vpop.permute.xlu1 %1395  ;;  %1345 = vst.msk [vmem:[#allocation2 + $0x98] sm:$0xff] %vm1325_vm6, %v1268_v46  ;;  %v1223_v46 = vsel %vm1148_vm3, %v1220_v58, %v1222_v6 }
 0x283   : > { %1474 = vst.msk [vmem:[#allocation2 + $0x90] sm:$0xff] %vm1455_vm7, %v1396_v59  ;;  %1676 = vrot.lane.b32.xlu0 %v1216_v40, %s3643_s13 }
 0x284   : > { %2061 = vrot.lane.b32.xlu1 %v1218_v13, %s3645_s15 }
 0x285   : > { %v1792_v39 = vpop.permute.xlu0 %1791 }
 0x286   : > { %v1919_v11 = vpop.permute.xlu1 %1918  ;;  %v4910_v57 = vpop.f32.mrb[16].mxu1  ;;  %1871 = vst.msk [vmem:[#allocation2 + $0x88] sm:$0xff] %vm1853_vm10, %v1792_v39 }
 0x287   : > { %1999 = vst.msk [vmem:[#allocation2 + $0x80] sm:$0xff] %vm1982_vm11, %v1919_v11  ;;  %v4913_v14 = vpop.f32.mrb[17].mxu1  ;;  %1073 = vrot.lane.b32.xlu0 %v1008_v17, %s3639_s21  ;;  %v1221_v17 = vsel %vm1148_vm3, %v1219_v61, %v1220_v58  ;;  %v1224_v58 = vrot.slane %v4665_v33, 2 }
 0x288   : > { %1281 = vrot.lane.b32.xlu1 %v1216_v40, %s3638_s20 }
 0x289   : > { %v1398_v10 = vpop.permute.xlu0 %1397 }
 0x28a   : > { %v1531_v22 = vpop.permute.xlu1 %1530  ;;  %1475 = vst.msk [vmem:[#allocation2 + $0x98] sm:$0xff] %vm1455_vm7, %v1398_v10 }
 0x28b   : > { %1609 = vst.msk [vmem:[#allocation2 + $0x90] sm:$0xff] %vm1590_vm8, %v1531_v22  ;;  %1678 = vrot.lane.b32.xlu0 %v1218_v13, %s3643_s13 }
 0x28c   : > { %1805 = vrot.lane.b32.xlu1 %v4650_v36, %s3641_s8 }
 0x28d   : > { %v1921_v47 = vpop.permute.xlu0 %1920 }
 0x28e   : > { %v2048_v32 = vpop.permute.xlu1 %2047  ;;  %2000 = vst.msk [vmem:[#allocation2 + $0x88] sm:$0xff] %vm1982_vm11, %v1921_v47 }
 0x28f   : > { %2128 = vst.msk [vmem:[#allocation2 + $0x80] sm:$0xff] %vm2111_vm12, %v2048_v32  ;;  %1283 = vrot.lane.b32.xlu0 %v1218_v13, %s3638_s20 }
 0x290   : > { %1411 = vrot.lane.b32.xlu1 %v4650_v36, %s3640_s29 }
 0x291   : > { %v1060_v44 = vpop.permute.xlu0 %1059 }
 0x292   : > { %v1533_v5 = vpop.permute.xlu1 %1532  ;;  %1136 = vst.msk [vmem:[#allocation2 + $0xa0] sm:$0xff] %vm1115_vm5, %v1060_v44 }
 0x293   : > { %1610 = vst.msk [vmem:[#allocation2 + $0x98] sm:$0xff] %vm1590_vm8, %v1533_v5  ;;  %1807 = vrot.lane.b32.xlu0 %v4647_v56, %s3641_s8  ;;  %v1015_v5 = vrot.slane %v4662_v29, 1 }
 0x294   : > { %1934 = vrot.lane.b32.xlu1 %v1011_v62, %s3644_s14 }
 0x295   : > { %v1665_v18 = vpop.permute.xlu0 %1664  ;;  %v1016_v25 = vsel %vm938_vm4, %v1014_v41, %v1015_v5 }
 0x296   : > { %v2050_v54 = vpop.permute.xlu1 %2049  ;;  %v2160_v52 = vld [vmem:[#allocation2 + $0x80] sm:$0xff]  ;;  %1743 = vst.msk [vmem:[#allocation2 + $0x90] sm:$0xff] %vm1724_vm9, %v1665_v18 }
 0x297   : > { %2129 = vst.msk [vmem:[#allocation2 + $0x88] sm:$0xff] %vm2111_vm12, %v2050_v54  ;;  %3414 = vmatprep.mubr.msk.f32.mxu1 %vm2188_vm13, %v2160_v52  ;;  %1413 = vrot.lane.b32.xlu0 %v4647_v56, %s3640_s29  ;;  %v872_v54 = vsel %vm740_vm2, %v4640_v26, 0.0 }
 0x298   : > { %1546 = vrot.lane.b32.xlu1 %v1011_v62, %s3642_s9  ;;  %v1017_v18 = vrot.slane %v872_v54, 1 }
 0x299   : > { %v1062_v40 = vpop.permute.xlu0 %1061 }
 0x29a   : > { %v1270_v60 = vpop.permute.xlu1 %1269  ;;  %1137 = vst.msk [vmem:[#allocation2 + $0xa8] sm:$0xff] %vm1115_vm5, %v1062_v40 }
 0x29b   : > { %1346 = vst.msk [vmem:[#allocation2 + $0xa0] sm:$0xff] %vm1325_vm6, %v1270_v60  ;;  %1936 = vrot.lane.b32.xlu0 %v1013_v55, %s3644_s14  ;;  %v1225_v60 = vrot.slane %v4662_v29, 2 }
 0x29c   : > { %2063 = vrot.lane.b32.xlu1 %v1221_v17, %s3645_s15 }
 0x29d   : > { %v1667_v56 = vpop.permute.xlu0 %1666 }
 0x29e   : > { %v1794_v36 = vpop.permute.xlu1 %1793  ;;  %v2161_v42 = vld [vmem:[#allocation2 + $0x88] sm:$0xff]  ;;  %1744 = vst.msk [vmem:[#allocation2 + $0x98] sm:$0xff] %vm1724_vm9, %v1667_v56 }
 0x29f   : > { %1872 = vst.msk [vmem:[#allocation2 + $0x90] sm:$0xff] %vm1853_vm10, %v1794_v36  ;;  %3415 = vmatmul.mubr.msk.f32.gmra.mrb[32].mxu1 %vm2188_vm13, %v2161_v42  ;;  %1075 = vrot.lane.b32.xlu0 %v1011_v62, %s3639_s21  ;;  %v1227_v42 = vrot.slane %v872_v54, 2 }
 0x2a0   : > { %1548 = vrot.lane.b32.xlu1 %v1013_v55, %s3642_s9 }
 0x2a1   : > { %v1272_v59 = vpop.permute.xlu0 %1271 }
 0x2a2   : > { %v1400_v50 = vpop.permute.xlu1 %1399  ;;  %1347 = vst.msk [vmem:[#allocation2 + $0xa8] sm:$0xff] %vm1325_vm6, %v1272_v59 }
 0x2a3   : > { %1476 = vst.msk [vmem:[#allocation2 + $0xa0] sm:$0xff] %vm1455_vm7, %v1400_v50  ;;  %1680 = vrot.lane.b32.xlu0 %v1221_v17, %s3643_s13  ;;  %v1228_v50 = vsel %vm1148_vm3, %v1225_v60, %v1227_v42 }
 0x2a4   : > { %2065 = vrot.lane.b32.xlu1 %v1223_v46, %s3645_s15 }
 0x2a5   : > { %v1796_v39 = vpop.permute.xlu0 %1795 }
 0x2a6   : > { %v1923_v13 = vpop.permute.xlu1 %1922  ;;  %v4962_v11 = vpop.f32.mrb[18].mxu1  ;;  %1873 = vst.msk [vmem:[#allocation2 + $0x98] sm:$0xff] %vm1853_vm10, %v1796_v39 }
 0x2a7   : > { %2001 = vst.msk [vmem:[#allocation2 + $0x90] sm:$0xff] %vm1982_vm11, %v1923_v13  ;;  %v4965_v22 = vpop.f32.mrb[19].mxu1  ;;  %1077 = vrot.lane.b32.xlu0 %v1013_v55, %s3639_s21  ;;  %v1018_v55 = vsel %vm938_vm4, %v1015_v5, %v1017_v18  ;;  %v2673_v18 = vld [vmem:[%s5545_s5] sm:$0xff] }
 0x2a8   : > { %1285 = vrot.lane.b32.xlu1 %v1221_v17, %s3638_s20  ;;  %v1226_v17 = vsel %vm1148_vm3, %v1224_v58, %v1225_v60  ;;  %3438 = vmatprep.subr.mxu0 %v2673_v18 }
 0x2a9   : > { %v1402_v32 = vpop.permute.xlu0 %1401  ;;  %3439 = vmatpush3.msra.mxu0 %v2673_v18 }
 0x2aa   : > { %v1535_v10 = vpop.permute.xlu1 %1534  ;;  %1477 = vst.msk [vmem:[#allocation2 + $0xa8] sm:$0xff] %vm1455_vm7, %v1402_v32 }
 0x2ab   : > { %1611 = vst.msk [vmem:[#allocation2 + $0xa0] sm:$0xff] %vm1590_vm8, %v1535_v10  ;;  %1682 = vrot.lane.b32.xlu0 %v1223_v46, %s3643_s13 }
 0x2ac   : > { %1809 = vrot.lane.b32.xlu1 %v4665_v33, %s3641_s8 }
 0x2ad   : > { %v1925_v43 = vpop.permute.xlu0 %1924 }
 0x2ae   : > { %v2052_v47 = vpop.permute.xlu1 %2051  ;;  %2002 = vst.msk [vmem:[#allocation2 + $0x98] sm:$0xff] %vm1982_vm11, %v1925_v43 }
 0x2af   : > { %2130 = vst.msk [vmem:[#allocation2 + $0x90] sm:$0xff] %vm2111_vm12, %v2052_v47  ;;  %1287 = vrot.lane.b32.xlu0 %v1223_v46, %s3638_s20 }
 0x2b0   : > { %1415 = vrot.lane.b32.xlu1 %v4665_v33, %s3640_s29 }
 0x2b1   : > { %v1064_v62 = vpop.permute.xlu0 %1063 }
 0x2b2   : > { %v1537_v44 = vpop.permute.xlu1 %1536  ;;  %1138 = vst.msk [vmem:[#allocation2 + $0xb0] sm:$0xff] %vm1115_vm5, %v1064_v62 }
 0x2b3   : > { %1612 = vst.msk [vmem:[#allocation2 + $0xa8] sm:$0xff] %vm1590_vm8, %v1537_v44  ;;  %1811 = vrot.lane.b32.xlu0 %v4662_v29, %s3641_s8 }
 0x2b4   : > { %1938 = vrot.lane.b32.xlu1 %v1016_v25, %s3644_s14 }
 0x2b5   : > { %v1669_v61 = vpop.permute.xlu0 %1668 }
 0x2b6   : > { %v2054_v52 = vpop.permute.xlu1 %2053  ;;  %v2162_v63 = vld [vmem:[#allocation2 + $0x90] sm:$0xff]  ;;  %1745 = vst.msk [vmem:[#allocation2 + $0xa0] sm:$0xff] %vm1724_vm9, %v1669_v61 }
 0x2b7   : > { %2131 = vst.msk [vmem:[#allocation2 + $0x98] sm:$0xff] %vm2111_vm12, %v2054_v52  ;;  %3417 = vmatprep.mubr.msk.f32.mxu1 %vm2188_vm13, %v2162_v63  ;;  %1417 = vrot.lane.b32.xlu0 %v4662_v29, %s3640_s29 }
 0x2b8   : > { %1550 = vrot.lane.b32.xlu1 %v1016_v25, %s3642_s9 }
 0x2b9   : > { %v1066_v40 = vpop.permute.xlu0 %1065 }
 0x2ba   : > { %v1274_v26 = vpop.permute.xlu1 %1273  ;;  %1139 = vst.msk [vmem:[#allocation2 + $0xb8] sm:$0xff] %vm1115_vm5, %v1066_v40 }
 0x2bb   : > { %1348 = vst.msk [vmem:[#allocation2 + $0xb0] sm:$0xff] %vm1325_vm6, %v1274_v26  ;;  %1940 = vrot.lane.b32.xlu0 %v1018_v55, %s3644_s14 }
 0x2bc   : > { %2067 = vrot.lane.b32.xlu1 %v1226_v17, %s3645_s15 }
 0x2bd   : > { %v1671_v29 = vpop.permute.xlu0 %1670 }
 0x2be   : > { %v1798_v33 = vpop.permute.xlu1 %1797  ;;  %v2163_v36 = vld [vmem:[#allocation2 + $0x98] sm:$0xff]  ;;  %1746 = vst.msk [vmem:[#allocation2 + $0xa8] sm:$0xff] %vm1724_vm9, %v1671_v29  ;;  %v5615_v29 = vmax.f32 %v3797_v16, 0.0 }
 0x2bf   : > { %1874 = vst.msk [vmem:[#allocation2 + $0xa0] sm:$0xff] %vm1853_vm10, %v1798_v33  ;;  %3418 = vmatmul.mubr.msk.f32.gmra.mrb[34].mxu1 %vm2188_vm13, %v2163_v36  ;;  %1079 = vrot.lane.b32.xlu0 %v1016_v25, %s3639_s21  ;;  %v5614_v36 = vmax.f32 %v3769_v9, 0.0 }
 0x2c0   : > { %1552 = vrot.lane.b32.xlu1 %v1018_v55, %s3642_s9 }
 0x2c1   : > { %v1276_v56 = vpop.permute.xlu0 %1275 }
 0x2c2   : > { %v1404_v6 = vpop.permute.xlu1 %1403  ;;  %1349 = vst.msk [vmem:[#allocation2 + $0xb8] sm:$0xff] %vm1325_vm6, %v1276_v56  ;;  %v5617_v56 = vmax.f32 %v3811_v20, 0.0  ;;  %v5620_v20 = vmax.f32 %v3822_v23, 0.0 }
 0x2c3   : > { %1478 = vst.msk [vmem:[#allocation2 + $0xb0] sm:$0xff] %vm1455_vm7, %v1404_v6  ;;  %1684 = vrot.lane.b32.xlu0 %v1226_v17, %s3643_s13 }
 0x2c4   : > { %2069 = vrot.lane.b32.xlu1 %v1228_v50, %s3645_s15 }
 0x2c5   : > { %v1800_v13 = vpop.permute.xlu0 %1799 }
 0x2c6   : > { %v1927_v59 = vpop.permute.xlu1 %1926  ;;  %v5014_v46 = vpop.f32.mrb[20].mxu1  ;;  %1875 = vst.msk [vmem:[#allocation2 + $0xa8] sm:$0xff] %vm1853_vm10, %v1800_v13  ;;  %v5619_v13 = vmax.f32 %v3825_v24, 0.0 }
 0x2c7   : > { %2003 = vst.msk [vmem:[#allocation2 + $0xa0] sm:$0xff] %vm1982_vm11, %v1927_v59  ;;  %v5017_v39 = vpop.f32.mrb[21].mxu1  ;;  %1081 = vrot.lane.b32.xlu0 %v1018_v55, %s3639_s21  ;;  %v5612_v55 = vmax.f32 %v3754_v2, 0.0 }
 0x2c8   : > { %1289 = vrot.lane.b32.xlu1 %v1226_v17, %s3638_s20 }
 0x2c9   : > { %v1406_v32 = vpop.permute.xlu0 %1405 }
 0x2ca   : > { %v1539_v10 = vpop.permute.xlu1 %1538  ;;  %1479 = vst.msk [vmem:[#allocation2 + $0xb8] sm:$0xff] %vm1455_vm7, %v1406_v32  ;;  %v5621_v32 = vmax.f32 %v3839_v28, 0.0  ;;  %v5624_v28 = vmax.f32 %v3850_v31, 0.0  ;;  %v5627_v31 = vmax.f32 %v3763_v7, 0.0 }
 0x2cb   : > { %1613 = vst.msk [vmem:[#allocation2 + $0xb0] sm:$0xff] %vm1590_vm8, %v1539_v10  ;;  %1686 = vrot.lane.b32.xlu0 %v1228_v50, %s3643_s13 }
 0x2cc   : > { %1813 = vrot.lane.b32.xlu1 %v4793_v21, %s3641_s8 }
 0x2cd   : > { %v1929_v43 = vpop.permute.xlu0 %1928 }
 0x2ce   : > { %v2056_v47 = vpop.permute.xlu1 %2055  ;;  %2004 = vst.msk [vmem:[#allocation2 + $0xa8] sm:$0xff] %vm1982_vm11, %v1929_v43 }
 0x2cf   : > { %2132 = vst.msk [vmem:[#allocation2 + $0xa0] sm:$0xff] %vm2111_vm12, %v2056_v47  ;;  %1291 = vrot.lane.b32.xlu0 %v1228_v50, %s3638_s20  ;;  %v5618_v50 = vmax.f32 %v3808_v19, 0.0  ;;  %v5622_v47 = vmax.f32 %v3836_v27, 0.0 }
 0x2d0   : > { %1419 = vrot.lane.b32.xlu1 %v4793_v21, %s3640_s29 }
 0x2d1   : > { %v1068_v5 = vpop.permute.xlu0 %1067 }
 0x2d2   : > { %v1541_v41 = vpop.permute.xlu1 %1540  ;;  %1140 = vst.msk [vmem:[#allocation2 + $0xc0] sm:$0xff] %vm1115_vm5, %v1068_v5  ;;  %v5623_v5 = vmax.f32 %v3891_v49, 0.0 }
 0x2d3   : > { %1614 = vst.msk [vmem:[#allocation2 + $0xb8] sm:$0xff] %vm1590_vm8, %v1541_v41  ;;  %1815 = vrot.lane.b32.xlu0 %v4685_v4, %s3641_s8 }
 0x2d4   : > { %1942 = vrot.lane.b32.xlu1 %v4809_v37, %s3644_s14 }
 0x2d5   : > { %v1673_v25 = vpop.permute.xlu0 %1672 }
 0x2d6   : > { %v2058_v44 = vpop.permute.xlu1 %2057  ;;  %v2164_v62 = vld [vmem:[#allocation2 + $0xa0] sm:$0xff]  ;;  %1747 = vst.msk [vmem:[#allocation2 + $0xb0] sm:$0xff] %vm1724_vm9, %v1673_v25  ;;  %v5626_v25 = vmax.f32 %v3895_v51, 0.0 }
 0x2d7   : > { %2133 = vst.msk [vmem:[#allocation2 + $0xa8] sm:$0xff] %vm2111_vm12, %v2058_v44  ;;  %3420 = vmatprep.mubr.msk.f32.mxu1 %vm2188_vm13, %v2164_v62  ;;  %1421 = vrot.lane.b32.xlu0 %v4685_v4, %s3640_s29  ;;  %v5625_v62 = vmax.f32 %v3757_v3, 0.0  ;;  %v5629_v51 = vld [vmem:[#allocation6_spill] sm:$0xff]  ;;  %s5487_s29 = scalar_lea.hbm %s5547_s7, %s3226_s19 }
 0x2d8   : > { %1554 = vrot.lane.b32.xlu1 %v4809_v37, %s3642_s9 }
 0x2d9   : > { %v1070_v54 = vpop.permute.xlu0 %1069 }
 0x2da   : > { %v1278_v21 = vpop.permute.xlu1 %1277  ;;  %1141 = vst.msk [vmem:[#allocation2 + $0xc8] sm:$0xff] %vm1115_vm5, %v1070_v54  ;;  %v5628_v54 = vmax.f32 %v3905_v53, 0.0 }
 0x2db   : > { %1350 = vst.msk [vmem:[#allocation2 + $0xc0] sm:$0xff] %vm1325_vm6, %v1278_v21  ;;  %1944 = vrot.lane.b32.xlu0 %v4827_v30, %s3644_s14 }
 0x2dc   : > { %2071 = vrot.lane.b32.xlu1 %v4830_v0, %s3645_s15 }
 0x2dd   : > { %v1675_v37 = vpop.permute.xlu0 %1674 }
 0x2de   : > { %v1802_v52 = vpop.permute.xlu1 %1801  ;;  %v2165_v63 = vld [vmem:[#allocation2 + $0xa8] sm:$0xff]  ;;  %1748 = vst.msk [vmem:[#allocation2 + $0xb8] sm:$0xff] %vm1724_vm9, %v1675_v37 }
 0x2df   : > { %1876 = vst.msk [vmem:[#allocation2 + $0xb0] sm:$0xff] %vm1853_vm10, %v1802_v52  ;;  %3421 = vmatmul.mubr.msk.f32.gmra.mrb[36].mxu1 %vm2188_vm13, %v2165_v63  ;;  %1556 = vrot.lane.b32.xlu0 %v4827_v30, %s3642_s9  ;;  %v3557_v30 = vpack.i.bf16 %v3862_v34, %v3866_v35  ;;  %v5610_v35 = vmax.f32 %v3751_v1, 0.0  ;;  %v5630_v63 = vmax.f32 %v5629_v51, 0.0  ;;  %v5631_v37 = vld [vmem:[#allocation7_spill] sm:$0xff]  ;;  %s269_s9 = sand.u32 1, %s3627_s25  }
 0x2e0   : > { %1688 = vrot.lane.b32.xlu1 %v4830_v0, %s3643_s13  ;;  %s5498_s28 = scalar_lea.sflag [#allocation4], %s269_s9 }
 0x2e1   : > { %v1280_v61 = vpop.permute.xlu0 %1279 }
 0x2e2   : > { %v1408_v4 = vpop.permute.xlu1 %1407  ;;  %1351 = vst.msk [vmem:[#allocation2 + $0xc8] sm:$0xff] %vm1325_vm6, %v1280_v61  ;;  %v5633_v61 = vld [vmem:[#allocation8_spill] sm:$0xff] }
 0x2e3   : > { %1480 = vst.msk [vmem:[#allocation2 + $0xc0] sm:$0xff] %vm1455_vm7, %v1408_v4  ;;  %2073 = vrot.lane.b32.xlu0 %v4833_v38, %s3645_s15  ;;  %v5632_v4 = vmax.f32 %v5631_v37, 0.0 }
 0x2e4   : > { %1690 = vrot.lane.b32.xlu1 %v4833_v38, %s3643_s13  ;;  %s3116_s13 = sshll.u32 %s269_s9, 8 }
 0x2e5   : > { %v1804_v60 = vpop.permute.xlu0 %1803  ;;  %s5384_s18 = scalar_lea.vmem [#allocation3], %s3116_s13 }
 0x2e6   : > { %v1931_v0 = vpop.permute.xlu1 %1930  ;;  %v5069_v58 = vpop.f32.mrb[22].mxu1  ;;  %1877 = vst.msk [vmem:[#allocation2 + $0xb8] sm:$0xff] %vm1853_vm10, %v1804_v60  ;;  %s3050_s22 = sshll.u32 %s5384_s18, 4  ;;  %s5490_s22 = int_to_ptr.vmem [resolvable:$true] %s3050_s22 }
 0x2e7   : > { %2005 = vst.msk [vmem:[#allocation2 + $0xb0] sm:$0xff] %vm1982_vm11, %v1931_v0  ;;  %v5072_v26 = vpop.f32.mrb[23].mxu1  ;;  %3558 = vrot.lane.b32.xlu0 %v3557_v30, %s3641_s8  ;;  %v5634_v30 = vmax.f32 %v5633_v61, 0.0  ;;  %v5635_v0 = vld [vmem:[#allocation9_spill] sm:$0xff]  ;;  %s3573_s17 = scalar_lea.vmem %s5490_s22, 4096 }
 0x2e8   : > { %3563 = vrot.lane.b32.xlu1 %v3884_v48, %s3644_s14  ;;  %v5611_v48 = vmax.f32 %v3766_v8, 0.0  ;;  %v5636_v60 = vmax.f32 %v5635_v0, 0.0  ;;  %p3574_p11 = scmp.ne.s32.totalorder %s5490_s22, %s3573_s17 }
 0x2e9   : > { %v1410_v34 = vpop.permute.xlu0 %1409 }
 0x2ea   : > { %v1543_v38 = vpop.permute.xlu1 %1542  ;;  %1481 = vst.msk [vmem:[#allocation2 + $0xc8] sm:$0xff] %vm1455_vm7, %v1410_v34  ;;  %p3575_p12 = pnand %p3574_p11, %p3726_p5 }
 0x2eb   : > { %1615 = vst.msk [vmem:[#allocation2 + $0xc0] sm:$0xff] %vm1590_vm8, %v1543_v38  ;;  %3568 = vrot.lane.b32.xlu0 %v3880_v45, %s3645_s15  ;;  %v5613_v45 = vmax.f32 %v3774_v12, 0.0  ;;  %v5616_v12 = vmax.f32 %v3794_v15, 0.0 }
 0x2ec   : > { %2545 = vrot.lane.b32.xlu1 %v5610_v35, %s3639_s21  ;;  %v5637_v35 = vld [vmem:[#allocation10_spill] sm:$0xff]  ;;  %p3576_p13 = pneg %p3575_p12 }
 0x2ed   : > { %v1933_v17 = vpop.permute.xlu0 %1932 }
 0x2ee   : > { %v2060_v40 = vpop.permute.xlu1 %2059  ;;  %2006 = vst.msk [vmem:[#allocation2 + $0xb8] sm:$0xff] %vm1982_vm11, %v1933_v17  ;;  %v5639_v17 = vld [vmem:[#allocation11_spill] sm:$0xff] }
 0x2ef   : > { %2134 = vst.msk [vmem:[#allocation2 + $0xb0] sm:$0xff] %vm2111_vm12, %v2060_v40  ;;  %2547 = vrot.lane.b32.xlu0 %v5612_v55, %s3639_s21  ;;  %v5638_v40 = vmax.f32 %v5637_v35, 0.0 }
 0x2f0   : > { %2549 = vrot.lane.b32.xlu1 %v5611_v48, %s3639_s21  ;;  %v5640_v48 = vmax.f32 %v5639_v17, 0.0 }
 0x2f1   : > { %v1072_v1 = vpop.permute.xlu0 %1071 }
 0x2f2   : > { %v1545_v33 = vpop.permute.xlu1 %1544  ;;  %1142 = vst.msk [vmem:[#allocation2 + $0xd0] sm:$0xff] %vm1115_vm5, %v1072_v1 }
 0x2f3   : > { %1616 = vst.msk [vmem:[#allocation2 + $0xc8] sm:$0xff] %vm1590_vm8, %v1545_v33  ;;  %2551 = vrot.lane.b32.xlu0 %v5614_v36, %s3639_s21 }
 0x2f4   : > { %2553 = vrot.lane.b32.xlu1 %v5613_v45, %s3639_s21  ;;  %v5641_v45 = vld [vmem:[#allocation12_spill] sm:$0xff] }
 0x2f5   : > { %v1677_v2 = vpop.permute.xlu0 %1676  ;;  %v5642_v36 = vmax.f32 %v5641_v45, 0.0 }
 0x2f6   : > { %v2062_v8 = vpop.permute.xlu1 %2061  ;;  %v2166_v42 = vld [vmem:[#allocation2 + $0xb0] sm:$0xff]  ;;  %1749 = vst.msk [vmem:[#allocation2 + $0xc0] sm:$0xff] %vm1724_vm9, %v1677_v2 }
 0x2f7   : > { %2135 = vst.msk [vmem:[#allocation2 + $0xb8] sm:$0xff] %vm2111_vm12, %v2062_v8  ;;  %3423 = vmatprep.mubr.msk.f32.mxu1 %vm2188_vm13, %v2166_v42  ;;  %2555 = vrot.lane.b32.xlu0 %v5616_v12, %s3639_s21  ;;  %v5643_v8 = vld [vmem:[#allocation13_spill] sm:$0xff]  ;;  %v5645_v12 = vld [vmem:[#allocation14_spill] sm:$0xff] }
 0x2f8   : > { %2557 = vrot.lane.b32.xlu1 %v5615_v29, %s3639_s21  ;;  %v5644_v42 = vmax.f32 %v5643_v8, 0.0 }
 0x2f9   : > { %v1074_v9 = vpop.permute.xlu0 %1073 }
 0x2fa   : > { %v1282_v6 = vpop.permute.xlu1 %1281  ;;  %1143 = vst.msk [vmem:[#allocation2 + $0xd8] sm:$0xff] %vm1115_vm5, %v1074_v9  ;;  %v5647_v9 = vld [vmem:[#allocation15_spill] sm:$0xff] }
 0x2fb   : > { %1352 = vst.msk [vmem:[#allocation2 + $0xd0] sm:$0xff] %vm1325_vm6, %v1282_v6  ;;  %2559 = vrot.lane.b32.xlu0 %v5618_v50, %s3639_s21  ;;  %v5646_v6 = vmax.f32 %v5645_v12, 0.0 }
 0x2fc   : > { %2561 = vrot.lane.b32.xlu1 %v5617_v56, %s3639_s21  ;;  %v5648_v56 = vmax.f32 %v5647_v9, 0.0 }
 0x2fd   : > { %v1679_v15 = vpop.permute.xlu0 %1678 }
 0x2fe   : > { %v1806_v16 = vpop.permute.xlu1 %1805  ;;  %v2167_v59 = vld [vmem:[#allocation2 + $0xb8] sm:$0xff]  ;;  %1750 = vst.msk [vmem:[#allocation2 + $0xc8] sm:$0xff] %vm1724_vm9, %v1679_v15 }
 0x2ff   : > { %1878 = vst.msk [vmem:[#allocation2 + $0xc0] sm:$0xff] %vm1853_vm10, %v1806_v16  ;;  %3424 = vmatmul.mubr.msk.f32.gmra.mrb[38].mxu1 %vm2188_vm13, %v2167_v59  ;;  %2563 = vrot.lane.b32.xlu0 %v5620_v20, %s3639_s21 }
 0x300   : > { %2565 = vrot.lane.b32.xlu1 %v5619_v13, %s3639_s21  ;;  %v5649_v13 = vld [vmem:[#allocation16_spill] sm:$0xff] }
 0x301   : > { %v1284_v19 = vpop.permute.xlu0 %1283  ;;  %v5650_v20 = vmax.f32 %v5649_v13, 0.0 }
 0x302   : > { %v1412_v10 = vpop.permute.xlu1 %1411  ;;  %1353 = vst.msk [vmem:[#allocation2 + $0xd8] sm:$0xff] %vm1325_vm6, %v1284_v19 }
 0x303   : > { %1482 = vst.msk [vmem:[#allocation2 + $0xd0] sm:$0xff] %vm1455_vm7, %v1412_v10  ;;  %2567 = vrot.lane.b32.xlu0 %v5622_v47, %s3639_s21  ;;  %v5651_v10 = vld [vmem:[#allocation17_spill] sm:$0xff] }
 0x304   : > { %2569 = vrot.lane.b32.xlu1 %v5621_v32, %s3639_s21  ;;  %v5652_v19 = vmax.f32 %v5651_v10, 0.0 }
 0x305   : > { %v1808_v23 = vpop.permute.xlu0 %1807 }
 0x306   : > { %v1935_v24 = vpop.permute.xlu1 %1934  ;;  %v5135_v43 = vpop.f32.mrb[24].mxu1  ;;  %1879 = vst.msk [vmem:[#allocation2 + $0xc8] sm:$0xff] %vm1853_vm10, %v1808_v23 }
 0x307   : > { %2007 = vst.msk [vmem:[#allocation2 + $0xc0] sm:$0xff] %vm1982_vm11, %v1935_v24  ;;  %v5138_v41 = vpop.f32.mrb[25].mxu1  ;;  %2571 = vrot.lane.b32.xlu0 %v5624_v28, %s3639_s21  ;;  %v5653_v24 = vld [vmem:[#allocation18_spill] sm:$0xff] }
 0x308   : > { %2573 = vrot.lane.b32.xlu1 %v5623_v5, %s3639_s21  ;;  %v5654_v23 = vmax.f32 %v5653_v24, 0.0 }
 0x309   : > { %v1414_v44 = vpop.permute.xlu0 %1413 }
 0x30a   : > { %v1547_v27 = vpop.permute.xlu1 %1546  ;;  %1483 = vst.msk [vmem:[#allocation2 + $0xd8] sm:$0xff] %vm1455_vm7, %v1414_v44 }
 0x30b   : > { %1617 = vst.msk [vmem:[#allocation2 + $0xd0] sm:$0xff] %vm1590_vm8, %v1547_v27  ;;  %2575 = vrot.lane.b32.xlu0 %v5626_v25, %s3639_s21 }
 0x30c   : > { %2577 = vrot.lane.b32.xlu1 %v5625_v62, %s3639_s21 }
 0x30d   : > { %v1937_v21 = vpop.permute.xlu0 %1936 }
 0x30e   : > { %v2064_v49 = vpop.permute.xlu1 %2063  ;;  %2008 = vst.msk [vmem:[#allocation2 + $0xc8] sm:$0xff] %vm1982_vm11, %v1937_v21 }
 0x30f   : > { %2136 = vst.msk [vmem:[#allocation2 + $0xc0] sm:$0xff] %vm2111_vm12, %v2064_v49  ;;  %2579 = vrot.lane.b32.xlu0 %v5627_v31, %s3639_s21 }
 0x310   : > { %2581 = vrot.lane.b32.xlu1 %v5628_v54, %s3639_s21 }
 0x311   : > { %v1076_v52 = vpop.permute.xlu0 %1075 }
 0x312   : > { %v1549_v3 = vpop.permute.xlu1 %1548  ;;  %1144 = vst.msk [vmem:[#allocation2 + $0xe0] sm:$0xff] %vm1115_vm5, %v1076_v52 }
 0x313   : > { %1618 = vst.msk [vmem:[#allocation2 + $0xd8] sm:$0xff] %vm1590_vm8, %v1549_v3  ;;  %2583 = vrot.lane.b32.xlu0 %v5630_v63, %s3639_s21 }
 0x314   : > { %2585 = vrot.lane.b32.xlu1 %v5632_v4, %s3639_s21 }
 0x315   : > { %v1681_v53 = vpop.permute.xlu0 %1680 }
 0x316   : > { %v2066_v7 = vpop.permute.xlu1 %2065  ;;  %v2168_v18 = vld [vmem:[#allocation2 + $0xc0] sm:$0xff]  ;;  %1751 = vst.msk [vmem:[#allocation2 + $0xd0] sm:$0xff] %vm1724_vm9, %v1681_v53 }
 0x317   : > { %2137 = vst.msk [vmem:[#allocation2 + $0xc8] sm:$0xff] %vm2111_vm12, %v2066_v7  ;;  %3426 = vmatprep.mubr.msk.f32.mxu1 %vm2188_vm13, %v2168_v18  ;;  %2587 = vrot.lane.b32.xlu0 %v5634_v30, %s3639_s21 }
 0x318   : > { %2589 = vrot.lane.b32.xlu1 %v5636_v60, %s3639_s21 }
 0x319   : > { %v1078_v34 = vpop.permute.xlu0 %1077 }
 0x31a   : > { %v1286_v38 = vpop.permute.xlu1 %1285  ;;  %1145 = vst.msk [vmem:[#allocation2 + $0xe8] sm:$0xff] %vm1115_vm5, %v1078_v34 }
 0x31b   : > { %1354 = vst.msk [vmem:[#allocation2 + $0xe0] sm:$0xff] %vm1325_vm6, %v1286_v38  ;;  %2591 = vrot.lane.b32.xlu0 %v5638_v40, %s3639_s21  ;;  %v5255_v40 = vld [vmem:[%s5544_s4] ss:$0 sm:$0xff] }
 0x31c   : > { %2593 = vrot.lane.b32.xlu1 %v5640_v48, %s3639_s21  ;;  %v2365_v12 = vadd.f32 %v5255_v40, %v4965_v22  ;;  %v2375_v22 = vadd.f32 %v5255_v40, %v5017_v39  ;;  %v2370_v10 = vadd.f32 %v4962_v11, %v5255_v40  ;;  %v2380_v11 = vadd.f32 %v5014_v46, %v5255_v40 }
 0x31d   : > { %v1683_v1 = vpop.permute.xlu0 %1682  ;;  %v2390_v46 = vadd.f32 %v5069_v58, %v5255_v40  ;;  %v2400_v58 = vadd.f32 %v5135_v43, %v5255_v40 }
 0x31e   : > { %v1810_v55 = vpop.permute.xlu1 %1809  ;;  %v2169_v33 = vld [vmem:[#allocation2 + $0xc8] sm:$0xff]  ;;  %1752 = vst.msk [vmem:[#allocation2 + $0xd8] sm:$0xff] %vm1724_vm9, %v1683_v1  ;;  %v2516_v39 = vmax.f32 %v2370_v10, 0.0 }
 0x31f   : > { %1880 = vst.msk [vmem:[#allocation2 + $0xd0] sm:$0xff] %vm1853_vm10, %v1810_v55  ;;  %3427 = vmatmul.mubr.msk.f32.gmra.mrb[40].mxu1 %vm2188_vm13, %v2169_v33  ;;  %2595 = vrot.lane.b32.xlu0 %v5642_v36, %s3639_s21  ;;  %v2355_v33 = vadd.f32 %v5255_v40, %v4913_v14 }
 0x320   : > { %2597 = vrot.lane.b32.xlu1 %v5644_v42, %s3639_s21 }
 0x321   : > { %v1288_v29 = vpop.permute.xlu0 %1287 }
 0x322   : > { %v1416_v2 = vpop.permute.xlu1 %1415  ;;  %1355 = vst.msk [vmem:[#allocation2 + $0xe8] sm:$0xff] %vm1325_vm6, %v1288_v29  ;;  %v2513_v29 = vmax.f32 %v2355_v33, 0.0 }
 0x323   : > { %1484 = vst.msk [vmem:[#allocation2 + $0xe0] sm:$0xff] %vm1455_vm7, %v1416_v2  ;;  %2599 = vrot.lane.b32.xlu0 %v5646_v6, %s3639_s21  ;;  %v2360_v6 = vadd.f32 %v4910_v57, %v5255_v40  ;;  %v2515_v57 = vmax.f32 %v2365_v12, 0.0 }
 0x324   : > { %2601 = vrot.lane.b32.xlu1 %v5648_v56, %s3639_s21 }
 0x325   : > { %v1812_v59 = vpop.permute.xlu0 %1811 }
 0x326   : > { %v1939_v50 = vpop.permute.xlu1 %1938  ;;  %v5205_v16 = vpop.f32.mrb[26].mxu1  ;;  %1881 = vst.msk [vmem:[#allocation2 + $0xd8] sm:$0xff] %vm1853_vm10, %v1812_v59 }
 0x327   : > { %2009 = vst.msk [vmem:[#allocation2 + $0xd0] sm:$0xff] %vm1982_vm11, %v1939_v50  ;;  %v5208_v15 = vpop.f32.mrb[27].mxu1  ;;  %2603 = vrot.lane.b32.xlu0 %v5650_v20, %s3639_s21  ;;  %v2514_v20 = vmax.f32 %v2360_v6, 0.0 }
 0x328   : > { %2605 = vrot.lane.b32.xlu1 %v5652_v19, %s3639_s21 }
 0x329   : > { %v1418_v47 = vpop.permute.xlu0 %1417 }
 0x32a   : > { %v1551_v32 = vpop.permute.xlu1 %1550  ;;  %1485 = vst.msk [vmem:[#allocation2 + $0xe8] sm:$0xff] %vm1455_vm7, %v1418_v47 }
 0x32b   : > { %1619 = vst.msk [vmem:[#allocation2 + $0xe0] sm:$0xff] %vm1590_vm8, %v1551_v32  ;;  %2607 = vrot.lane.b32.xlu0 %v5654_v23, %s3639_s21  ;;  %v2517_v23 = vmax.f32 %v2375_v22, 0.0  ;;  %s3646_s21 = smov [#allocation3]  }
 0x32c   : > { %s3577_s8 = sshll.u32 %s3646_s21, 4  ;;  %s3578_s8 = int_to_ptr.vmem [resolvable:$false] %s3577_s8 }
 0x32d   : > { %v1941_v28 = vpop.permute.xlu0 %1940  ;;  %s3579_s13 = scalar_lea.vmem %s3578_s8, 8192  ;;  %p3580_p0 = scmp.lt.s32.totalorder %s5490_s22, %s3578_s8 }
 0x32e   : > { %v2068_v5 = vpop.permute.xlu1 %2067  ;;  %2010 = vst.msk [vmem:[#allocation2 + $0xd8] sm:$0xff] %vm1982_vm11, %v1941_v28  ;;  %p3581_p1 = scmp.lt.s32.totalorder %s3579_s13, %s3573_s17 }
 0x32f   : > { %2138 = vst.msk [vmem:[#allocation2 + $0xd0] sm:$0xff] %vm2111_vm12, %v2068_v5  ;;  %v2385_v5 = vadd.f32 %v5255_v40, %v5072_v26 }
 0x330   : > { %p3582_p2 = por %p3581_p1, %p3580_p0 }
 0x331   : > { %v1080_v44 = vpop.permute.xlu0 %1079 }
 0x332   : > { %v1553_v27 = vpop.permute.xlu1 %1552  ;;  %1146 = vst.msk [vmem:[#allocation2 + $0xf0] sm:$0xff] %vm1115_vm5, %v1080_v44  ;;  %p3583_p3 = pnand %p3582_p2, %p3576_p13 }
 0x333   : > { %1620 = vst.msk [vmem:[#allocation2 + $0xe8] sm:$0xff] %vm1590_vm8, %v1553_v27 }
 0x335   : > { %v1685_v49 = vpop.permute.xlu0 %1684 }
 0x336   : > { %v2070_v62 = vpop.permute.xlu1 %2069  ;;  %v2170_v25 = vld [vmem:[#allocation2 + $0xd0] sm:$0xff]  ;;  %1753 = vst.msk [vmem:[#allocation2 + $0xe0] sm:$0xff] %vm1724_vm9, %v1685_v49  ;;  %v2395_v49 = vadd.f32 %v5255_v40, %v5138_v41 }
 0x337   : > { %2139 = vst.msk [vmem:[#allocation2 + $0xd8] sm:$0xff] %vm2111_vm12, %v2070_v62  ;;  %3429 = vmatprep.mubr.msk.f32.mxu1 %vm2188_vm13, %v2170_v25  ;;  %v2519_v25 = vmax.f32 %v2385_v5, 0.0 }
 0x339   : > { %v1082_v31 = vpop.permute.xlu0 %1081 }
 0x33a   : > { %v1290_v21 = vpop.permute.xlu1 %1289  ;;  %1147 = vst.msk [vmem:[#allocation2 + $0xf8] sm:$0xff] %vm1115_vm5, %v1082_v31  ;;  %v2518_v31 = vmax.f32 %v2380_v11, 0.0 }
 0x33b   : > { %1356 = vst.msk [vmem:[#allocation2 + $0xf0] sm:$0xff] %vm1325_vm6, %v1290_v21 }
 0x33d   : > { %v1687_v52 = vpop.permute.xlu0 %1686 }
 0x33e   : > { %v1814_v54 = vpop.permute.xlu1 %1813  ;;  %v2171_v3 = vld [vmem:[#allocation2 + $0xd8] sm:$0xff]  ;;  %1754 = vst.msk [vmem:[#allocation2 + $0xe8] sm:$0xff] %vm1724_vm9, %v1687_v52 }
 0x33f   : > { %1882 = vst.msk [vmem:[#allocation2 + $0xe0] sm:$0xff] %vm1853_vm10, %v1814_v54  ;;  %3430 = vmatmul.mubr.msk.f32.gmra.mrb[42].mxu1 %vm2188_vm13, %v2171_v3 }
 0x341   : > { %v1292_v63 = vpop.permute.xlu0 %1291 }
 0x342   : > { %v1420_v51 = vpop.permute.xlu1 %1419  ;;  %1357 = vst.msk [vmem:[#allocation2 + $0xf8] sm:$0xff] %vm1325_vm6, %v1292_v63  ;;  %v2405_v63 = vadd.f32 %v5255_v40, %v5208_v15  ;;  %v2522_v15 = vmax.f32 %v2400_v58, 0.0 }
 0x343   : > { %1486 = vst.msk [vmem:[#allocation2 + $0xf0] sm:$0xff] %vm1455_vm7, %v1420_v51  ;;  %v2521_v51 = vmax.f32 %v2395_v49, 0.0 }
 0x345   : > { %v1816_v7 = vpop.permute.xlu0 %1815 }
 0x346   : > { %v1943_v37 = vpop.permute.xlu1 %1942  ;;  %v5236_v4 = vpop.f32.mrb[28].mxu1  ;;  %1883 = vst.msk [vmem:[#allocation2 + $0xe8] sm:$0xff] %vm1853_vm10, %v1816_v7 }
 0x347   : > { %2011 = vst.msk [vmem:[#allocation2 + $0xe0] sm:$0xff] %vm1982_vm11, %v1943_v37  ;;  %v5239_v18 = vpop.f32.mrb[29].mxu1  ;;  %v2520_v37 = vmax.f32 %v2390_v46, 0.0 }
 0x349   : > { %v1422_v61 = vpop.permute.xlu0 %1421 }
 0x34a   : > { %v1555_v53 = vpop.permute.xlu1 %1554  ;;  %1487 = vst.msk [vmem:[#allocation2 + $0xf8] sm:$0xff] %vm1455_vm7, %v1422_v61 }
 0x34b   : > { %1621 = vst.msk [vmem:[#allocation2 + $0xf0] sm:$0xff] %vm1590_vm8, %v1555_v53 }
 0x34d   : > { %v1945_v0 = vpop.permute.xlu0 %1944 }
 0x34e   : > { %v2072_v30 = vpop.permute.xlu1 %2071  ;;  %2012 = vst.msk [vmem:[#allocation2 + $0xe8] sm:$0xff] %vm1982_vm11, %v1945_v0  ;;  %v2523_v0 = vmax.f32 %v2405_v63, 0.0 }
 0x34f   : > { %2140 = vst.msk [vmem:[#allocation2 + $0xe0] sm:$0xff] %vm2111_vm12, %v2072_v30 }
 0x351   : > { %v1557_v34 = vpop.permute.xlu0 %1556 }
 0x352   : > { %v1689_v60 = vpop.permute.xlu1 %1688  ;;  %v5246_v38 = vpop.f32.mrb[30].mxu1  ;;  %1622 = vst.msk [vmem:[#allocation2 + $0xf8] sm:$0xff] %vm1590_vm8, %v1557_v34  ;;  %v2410_v34 = vadd.f32 %v5205_v16, %v5255_v40  ;;  %v2420_v16 = vadd.f32 %v5236_v4, %v5255_v40 }
 0x353   : > { %1755 = vst.msk [vmem:[#allocation2 + $0xf0] sm:$0xff] %vm1724_vm9, %v1689_v60  ;;  %v5249_v35 = vpop.f32.mrb[31].mxu1  ;;  %v2415_v60 = vadd.f32 %v5255_v40, %v5239_v18 }
 0x354   : > { %v2425_v18 = vadd.f32 %v5255_v40, %v5249_v35  ;;  %v2526_v35 = vmax.f32 %v2420_v16, 0.0 }
 0x355   : > { %v2074_v55 = vpop.permute.xlu0 %2073 }
 0x356   : > { %v1691_v17 = vpop.permute.xlu1 %1690  ;;  %v2172_v48 = vld [vmem:[#allocation2 + $0xe0] sm:$0xff]  ;;  %2141 = vst.msk [vmem:[#allocation2 + $0xe8] sm:$0xff] %vm2111_vm12, %v2074_v55  ;;  %v2527_v12 = vmax.f32 %v2425_v18, 0.0 }
 0x357   : > { %1756 = vst.msk [vmem:[#allocation2 + $0xf8] sm:$0xff] %vm1724_vm9, %v1691_v17  ;;  %3432 = vmatprep.mubr.msk.f32.mxu1 %vm2188_vm13, %v2172_v48 }
 0x359   : > { %v3559_v8 = vpop.permute.xlu0 %3558 }
 0x35a   : > { %v3564_v1 = vpop.permute.xlu1 %3563  ;;  %v3561_v42 = vunpack.i.h.bf16 %v3559_v8  ;;  %v3560_v2 = vunpack.i.l.bf16 %v3559_v8 }
 0x35b   : > { %v3566_v45 = vunpack.i.h.bf16 %v3564_v1  ;;  %v3565_v36 = vunpack.i.l.bf16 %v3564_v1 }
 0x35c   : > { %1885 = vst.msk [vmem:[#allocation2 + $0xf8] sm:$0xff] %vm1853_vm10, %v3561_v42  ;;  %1884 = vst.msk [vmem:[#allocation2 + $0xf0] sm:$0xff] %vm1853_vm10, %v3560_v2 }
 0x35d   : > { %2013 = vst.msk [vmem:[#allocation2 + $0xf0] sm:$0xff] %vm1982_vm11, %v3565_v36  ;;  %2014 = vst.msk [vmem:[#allocation2 + $0xf8] sm:$0xff] %vm1982_vm11, %v3566_v45  ;;  %v3569_v56 = vpop.permute.xlu0 %3568  ;;  %v2173_v50 = vld [vmem:[#allocation2 + $0xe8] sm:$0xff]  ;;  %v2525_v45 = vmax.f32 %v2415_v60, 0.0  ;;  %v2524_v36 = vmax.f32 %v2410_v34, 0.0 }
 0x35e   : > { %v2546_v9 = vpop.permute.xlu1 %2545  ;;  %v3571_v59 = vunpack.i.h.bf16 %v3569_v56  ;;  %v3570_v13 = vunpack.i.l.bf16 %v3569_v56  ;;  %3433 = vmatmul.mubr.msk.f32.gmra.mrb[44].mxu1 %vm2188_vm13, %v2173_v50 }
 0x35f   : > { %v2641_v14 = vsel %vm349_vm1, %v2513_v29, %v2546_v9  ;;  %v2430_v9 = vadd.f32 %v5246_v38, %v5255_v40 }
 0x360   : > { %3440 = vmatprep.mubr.msk.f32.mxu0 %vm2681_vm14, %v2641_v14  ;;  %2142 = vst.msk [vmem:[#allocation2 + $0xf0] sm:$0xff] %vm2111_vm12, %v3570_v13  ;;  %2143 = vst.msk [vmem:[#allocation2 + $0xf8] sm:$0xff] %vm2111_vm12, %v3571_v59 }
 0x361   : > { %v2548_v47 = vpop.permute.xlu0 %2547  ;;  %v2528_v13 = vmax.f32 %v2430_v9, 0.0 }
 0x362   : > { %v2550_v19 = vpop.permute.xlu1 %2549  ;;  %v2642_v24 = vsel %vm349_vm1, %v2514_v20, %v2548_v47 }
 0x363   : > { %v2643_v32 = vsel %vm349_vm1, %v2515_v57, %v2550_v19  ;;  %3441 = vmatmul.mubr.msk.f32.vlgmr.msra.gmra.mrb[16].mxu0 %vm2681_vm14, %v2642_v24 }
 0x364   : > { %3443 = vmatprep.mubr.msk.f32.mxu0 %vm2681_vm14, %v2643_v32 }
 0x365   : > { %v2552_v44 = vpop.permute.xlu0 %2551 }
 0x366   : > { %v2554_v28 = vpop.permute.xlu1 %2553  ;;  %v2644_v62 = vsel %vm349_vm1, %v2516_v39, %v2552_v44 }
 0x367   : > { %v2645_v27 = vsel %vm349_vm1, %v2517_v23, %v2554_v28  ;;  %3444 = vmatmul.mubr.msk.f32.gmra.mrb[18].mxu0 %vm2681_vm14, %v2644_v62  ;;  %v2174_v26 = vld [vmem:[#allocation2 + $0xf0] sm:$0xff]  ;;  %v2175_v21 = vld [vmem:[#allocation2 + $0xf8] sm:$0xff] }
 0x368   : > { %3435 = vmatprep.mubr.msk.f32.mxu1 %vm2188_vm13, %v2174_v26  ;;  %3446 = vmatprep.mubr.msk.f32.mxu0 %vm2681_vm14, %v2645_v27 }
 0x369   : > { %v2556_v52 = vpop.permute.xlu0 %2555  ;;  %3436 = vmatmul.mubr.msk.f32.gmra.mrb[46].mxu1 %vm2188_vm13, %v2175_v21 }
 0x36a   : > { %v2558_v54 = vpop.permute.xlu1 %2557  ;;  %v2646_v41 = vsel %vm349_vm1, %v2518_v31, %v2556_v52 }
 0x36b   : > { %v2647_v3 = vsel %vm349_vm1, %v2519_v25, %v2558_v54  ;;  %3447 = vmatmul.mubr.msk.f32.gmra.mrb[20].mxu0 %vm2681_vm14, %v2646_v41 }
 0x36c   : > { %3449 = vmatprep.mubr.msk.f32.mxu0 %vm2681_vm14, %v2647_v3 }
 0x36d   : > { %v2560_v61 = vpop.permute.xlu0 %2559 }
 0x36e   : > { %v2562_v7 = vpop.permute.xlu1 %2561  ;;  %v2648_v30 = vsel %vm349_vm1, %v2520_v37, %v2560_v61 }
 0x36f   : > { %v2649_v53 = vsel %vm349_vm1, %v2521_v51, %v2562_v7  ;;  %3450 = vmatmul.mubr.msk.f32.gmra.mrb[22].mxu0 %vm2681_vm14, %v2648_v30 }
 0x370   : > { %3452 = vmatprep.mubr.msk.f32.mxu0 %vm2681_vm14, %v2649_v53 }
 0x371   : > { %v2564_v55 = vpop.permute.xlu0 %2563 }
 0x372   : > { %v2566_v43 = vpop.permute.xlu1 %2565  ;;  %v3416_v17 = vpop.f32.mrb[32].mxu1  ;;  %v2650_v1 = vsel %vm349_vm1, %v2522_v15, %v2564_v55 }
 0x373   : > { %v2651_v48 = vsel %vm349_vm1, %v2523_v0, %v2566_v43  ;;  %v2434_v33 = vpop.f32.mrb[33].mxu1  ;;  %3453 = vmatmul.mubr.msk.f32.gmra.mrb[24].mxu0 %vm2681_vm14, %v2650_v1  ;;  %v2440_v57 = vadd.f32 %v3416_v17, %v5255_v40 }
 0x374   : > { %3455 = vmatprep.mubr.msk.f32.mxu0 %vm2681_vm14, %v2651_v48  ;;  %v2435_v6 = vadd.f32 %v5255_v40, %v2434_v33 }
 0x375   : > { %v2568_v2 = vpop.permute.xlu0 %2567  ;;  %v2530_v19 = vmax.f32 %v2440_v57, 0.0 }
 0x376   : > { %v2570_v8 = vpop.permute.xlu1 %2569  ;;  %v2652_v29 = vsel %vm349_vm1, %v2524_v36, %v2568_v2  ;;  %v2529_v59 = vmax.f32 %v2435_v6, 0.0 }
 0x377   : > { %v2653_v42 = vsel %vm349_vm1, %v2525_v45, %v2570_v8  ;;  %3456 = vmatmul.mubr.msk.f32.gmra.mrb[26].mxu0 %vm2681_vm14, %v2652_v29 }
 0x378   : > { %3458 = vmatprep.mubr.msk.f32.mxu0 %vm2681_vm14, %v2653_v42 }
 0x379   : > { %v2572_v56 = vpop.permute.xlu0 %2571 }
 0x37a   : > { %v2574_v4 = vpop.permute.xlu1 %2573  ;;  %v2654_v50 = vsel %vm349_vm1, %v2526_v35, %v2572_v56 }
 0x37b   : > { %v2655_v14 = vsel %vm349_vm1, %v2527_v12, %v2574_v4  ;;  %3459 = vmatmul.mubr.msk.f32.gmra.mrb[28].mxu0 %vm2681_vm14, %v2654_v50 }
 0x37c   : > { %3461 = vmatprep.mubr.msk.f32.mxu0 %vm2681_vm14, %v2655_v14 }
 0x37d   : > { %v2576_v38 = vpop.permute.xlu0 %2575 }
 0x37e   : > { %v2578_v22 = vpop.permute.xlu1 %2577  ;;  %v2656_v10 = vsel %vm349_vm1, %v2528_v13, %v2576_v38 }
 0x37f   : > { %v2657_v20 = vsel %vm349_vm1, %v2529_v59, %v2578_v22  ;;  %3462 = vmatmul.mubr.msk.f32.gmra.mrb[30].mxu0 %vm2681_vm14, %v2656_v10  ;;  %v5377_v22 = vld [vmem:[%s5546_s6] ss:$0 sm:$0xff] }
 0x380   : > { %3464 = vmatprep.mubr.msk.f32.mxu0 %vm2681_vm14, %v2657_v20 }
 0x381   : > { %v2580_v32 = vpop.permute.xlu0 %2579 }
 0x382   : > { %v2658_v47 = vsel %vm349_vm1, %v2530_v19, %v2580_v32  ;;  %v2582_v28 = vpop.permute.xlu1 %2581 }
 0x383   : > { %3465 = vmatmul.mubr.msk.f32.gmra.mrb[32].mxu0 %vm2681_vm14, %v2658_v47 }
 0x385   : > { %v2584_v44 = vpop.permute.xlu0 %2583 }
 0x386   : > { %v2586_v54 = vpop.permute.xlu1 %2585 }
 0x389   : > { %v2588_v52 = vpop.permute.xlu0 %2587 }
 0x38a   : > { %v2590_v61 = vpop.permute.xlu1 %2589 }
 0x38d   : > { %v2592_v0 = vpop.permute.xlu0 %2591 }
 0x38e   : > { %v2594_v33 = vpop.permute.xlu1 %2593 }
 0x391   : > { %v2596_v45 = vpop.permute.xlu0 %2595 }
 0x392   : > { %v3419_v24 = vpop.f32.mrb[34].mxu1  ;;  %v2598_v12 = vpop.permute.xlu1 %2597 }
 0x393   : > { %v2450_v23 = vadd.f32 %v3419_v24, %v5255_v40  ;;  %v2444_v5 = vpop.f32.mrb[35].mxu1 }
 0x394   : > { %v2445_v39 = vadd.f32 %v5255_v40, %v2444_v5 }
 0x395   : > { %v2532_v11 = vmax.f32 %v2450_v23, 0.0  ;;  %v2600_v35 = vpop.permute.xlu0 %2599 }
 0x396   : > { %v2531_v27 = vmax.f32 %v2445_v39, 0.0  ;;  %v2602_v57 = vpop.permute.xlu1 %2601 }
 0x397   : > { %v2660_v25 = vsel %vm349_vm1, %v2532_v11, %v2584_v44 }
 0x398   : > { %v2659_v62 = vsel %vm349_vm1, %v2531_v27, %v2582_v28 }
 0x399   : > { %3467 = vmatprep.mubr.msk.f32.mxu0 %vm2681_vm14, %v2659_v62  ;;  %v2604_v38 = vpop.permute.xlu0 %2603 }
 0x39a   : > { %3468 = vmatmul.mubr.msk.f32.gmra.mrb[34].mxu0 %vm2681_vm14, %v2660_v25 }
 0x3b2   : > { %v3422_v49 = vpop.f32.mrb[36].mxu1 }
 0x3b3   : > { %v2460_v26 = vadd.f32 %v3422_v49, %v5255_v40  ;;  %v2454_v21 = vpop.f32.mrb[37].mxu1 }
 0x3b4   : > { %v2455_v31 = vadd.f32 %v5255_v40, %v2454_v21 }
 0x3b5   : > { %v2534_v46 = vmax.f32 %v2460_v26, 0.0 }
 0x3b6   : > { %v2533_v3 = vmax.f32 %v2455_v31, 0.0 }
 0x3b7   : > { %v2662_v51 = vsel %vm349_vm1, %v2534_v46, %v2588_v52  ;;  %v2606_v46 = vpop.permute.xlu1 %2605  ;;  %v2608_v52 = vpop.permute.xlu0 %2607 }
 0x3b8   : > { %v2661_v41 = vsel %vm349_vm1, %v2533_v3, %v2586_v54 }
 0x3b9   : > { %3470 = vmatprep.mubr.msk.f32.mxu0 %vm2681_vm14, %v2661_v41 }
 0x3ba   : > { %3471 = vmatmul.mubr.msk.f32.gmra.mrb[36].mxu0 %vm2681_vm14, %v2662_v51 }
 0x3d2   : > { %v3425_v63 = vpop.f32.mrb[38].mxu1 }
 0x3d3   : > { %v2470_v37 = vadd.f32 %v3425_v63, %v5255_v40  ;;  %v2464_v58 = vpop.f32.mrb[39].mxu1 }
 0x3d4   : > { %v2465_v7 = vadd.f32 %v5255_v40, %v2464_v58 }
 0x3d5   : > { %v2536_v53 = vmax.f32 %v2470_v37, 0.0 }
 0x3d6   : > { %v2535_v30 = vmax.f32 %v2465_v7, 0.0 }
 0x3d7   : > { %v2664_v15 = vsel %vm349_vm1, %v2536_v53, %v2592_v0 }
 0x3d8   : > { %v2663_v60 = vsel %vm349_vm1, %v2535_v30, %v2590_v61 }
 0x3d9   : > { %3473 = vmatprep.mubr.msk.f32.mxu0 %vm2681_vm14, %v2663_v60 }
 0x3da   : > { %3474 = vmatmul.mubr.msk.f32.gmra.mrb[38].mxu0 %vm2681_vm14, %v2664_v15 }
 0x3f2   : > { %v3428_v34 = vpop.f32.mrb[40].mxu1 }
 0x3f3   : > { %v2480_v43 = vadd.f32 %v3428_v34, %v5255_v40  ;;  %v2474_v17 = vpop.f32.mrb[41].mxu1 }
 0x3f4   : > { %v2475_v48 = vadd.f32 %v5255_v40, %v2474_v17 }
 0x3f5   : > { %v2538_v55 = vmax.f32 %v2480_v43, 0.0 }
 0x3f6   : > { %v2537_v1 = vmax.f32 %v2475_v48, 0.0 }
 0x3f7   : > { %v2666_v36 = vsel %vm349_vm1, %v2538_v55, %v2596_v45 }
 0x3f8   : > { %v2665_v18 = vsel %vm349_vm1, %v2537_v1, %v2594_v33 }
 0x3f9   : > { %3476 = vmatprep.mubr.msk.f32.mxu0 %vm2681_vm14, %v2665_v18 }
 0x3fa   : > { %3477 = vmatmul.mubr.msk.f32.gmra.mrb[40].mxu0 %vm2681_vm14, %v2666_v36 }
 0x412   : > { %v3431_v16 = vpop.f32.mrb[42].mxu1 }
 0x413   : > { %v2490_v8 = vadd.f32 %v3431_v16, %v5255_v40  ;;  %v2484_v42 = vpop.f32.mrb[43].mxu1 }
 0x414   : > { %v2485_v2 = vadd.f32 %v5255_v40, %v2484_v42 }
 0x415   : > { %v2540_v29 = vmax.f32 %v2490_v8, 0.0 }
 0x416   : > { %v2539_v6 = vmax.f32 %v2485_v2, 0.0 }
 0x417   : > { %v2668_v4 = vsel %vm349_vm1, %v2540_v29, %v2600_v35 }
 0x418   : > { %v2667_v9 = vsel %vm349_vm1, %v2539_v6, %v2598_v12 }
 0x419   : > { %3479 = vmatprep.mubr.msk.f32.mxu0 %vm2681_vm14, %v2667_v9 }
 0x41a   : > { %3480 = vmatmul.mubr.msk.f32.gmra.mrb[42].mxu0 %vm2681_vm14, %v2668_v4 }
 0x431   : > { %v3434_v14 = vpop.f32.mrb[44].mxu1 }
 0x432   : > { %v2500_v56 = vadd.f32 %v3434_v14, %v5255_v40  ;;  %v2494_v50 = vpop.f32.mrb[45].mxu1 }
 0x433   : > { %v2495_v59 = vadd.f32 %v5255_v40, %v2494_v50 }
 0x434   : > { %v2542_v13 = vmax.f32 %v2500_v56, 0.0 }
 0x435   : > { %v2541_v20 = vmax.f32 %v2495_v59, 0.0 }
 0x436   : > { %v3442_v10 = vpop.f32.mrb[16].mxu0  ;;  %v2670_v24 = vsel %vm349_vm1, %v2542_v13, %v2604_v38 }
 0x437   : > { %v2669_v19 = vsel %vm349_vm1, %v2541_v20, %v2602_v57  ;;  %v2850_v32 = vadd.f32 %v3442_v10, %v5377_v22  ;;  %v2844_v47 = vpop.f32.mrb[17].mxu0 }
 0x438   : > { %v2845_v23 = vadd.f32 %v5377_v22, %v2844_v47  ;;  %3482 = vmatprep.mubr.msk.f32.mxu0 %vm2681_vm14, %v2669_v19 }
 0x439   : > { %3005 = vst.msk [vmem:[%s5384_s18 + $0x8] sm:$0xff] %vm3003_vm15, %v2850_v32  ;;  %3483 = vmatmul.mubr.msk.f32.gmra.mrb[44].mxu0 %vm2681_vm14, %v2670_v24 }
 0x43a   : > { %3004 = vst.msk [vmem:[%s5384_s18] sm:$0xff] %vm3003_vm15, %v2845_v23  ;;  %v3445_v5 = vpop.f32.mrb[18].mxu0 }
 0x43b   : > { %v2860_v39 = vadd.f32 %v3445_v5, %v5377_v22  ;;  %v2854_v11 = vpop.f32.mrb[19].mxu0 }
 0x43c   : > { %v2855_v28 = vadd.f32 %v5377_v22, %v2854_v11  ;;  %v3437_v27 = vpop.f32.mrb[46].mxu1 }
 0x43d   : > { %3007 = vst.msk [vmem:[%s5384_s18 + $0x18] sm:$0xff] %vm3003_vm15, %v2860_v39  ;;  %v2510_v44 = vadd.f32 %v3437_v27, %v5255_v40  ;;  %v2504_v62 = vpop.f32.mrb[47].mxu1 }
 0x43e   : > { %3006 = vst.msk [vmem:[%s5384_s18 + $0x10] sm:$0xff] %vm3003_vm15, %v2855_v28  ;;  %v2505_v25 = vadd.f32 %v5255_v40, %v2504_v62  ;;  %v3448_v49 = vpop.f32.mrb[20].mxu0 }
 0x43f   : > { %v2544_v26 = vmax.f32 %v2510_v44, 0.0  ;;  %v2870_v21 = vadd.f32 %v3448_v49, %v5377_v22  ;;  %v2864_v31 = vpop.f32.mrb[21].mxu0 }
 0x440   : > { %v2543_v54 = vmax.f32 %v2505_v25, 0.0  ;;  %v2865_v3 = vadd.f32 %v5377_v22, %v2864_v31 }
 0x441   : > { %3009 = vst.msk [vmem:[%s5384_s18 + $0x28] sm:$0xff] %vm3003_vm15, %v2870_v21  ;;  %v2672_v51 = vsel %vm349_vm1, %v2544_v26, %v2608_v52 }
 0x442   : > { %3008 = vst.msk [vmem:[%s5384_s18 + $0x20] sm:$0xff] %vm3003_vm15, %v2865_v3  ;;  %v2671_v40 = vsel %vm349_vm1, %v2543_v54, %v2606_v46  ;;  %v3451_v41 = vpop.f32.mrb[22].mxu0 }
 0x443   : > { %v2880_v63 = vadd.f32 %v3451_v41, %v5377_v22  ;;  %v2874_v37 = vpop.f32.mrb[23].mxu0  ;;  %3485 = vmatprep.mubr.msk.f32.mxu0 %vm2681_vm14, %v2671_v40 }
 0x444   : > { %v2875_v58 = vadd.f32 %v5377_v22, %v2874_v37  ;;  %3486 = vmatmul.mubr.msk.f32.gmra.mrb[46].mxu0 %vm2681_vm14, %v2672_v51 }
 0x445   : > { %3011 = vst.msk [vmem:[%s5384_s18 + $0x38] sm:$0xff] %vm3003_vm15, %v2880_v63 }
 0x446   : > { %3010 = vst.msk [vmem:[%s5384_s18 + $0x30] sm:$0xff] %vm3003_vm15, %v2875_v58  ;;  %v3454_v7 = vpop.f32.mrb[24].mxu0 }
 0x447   : > { %v2890_v53 = vadd.f32 %v3454_v7, %v5377_v22  ;;  %v2884_v61 = vpop.f32.mrb[25].mxu0 }
 0x448   : > { %v2885_v30 = vadd.f32 %v5377_v22, %v2884_v61 }
 0x449   : > { %3013 = vst.msk [vmem:[%s5384_s18 + $0x48] sm:$0xff] %vm3003_vm15, %v2890_v53 }
 0x44a   : > { %3012 = vst.msk [vmem:[%s5384_s18 + $0x40] sm:$0xff] %vm3003_vm15, %v2885_v30  ;;  %v3457_v0 = vpop.f32.mrb[26].mxu0 }
 0x44b   : > { %v2900_v60 = vadd.f32 %v3457_v0, %v5377_v22  ;;  %v2894_v15 = vpop.f32.mrb[27].mxu0 }
 0x44c   : > { %v2895_v34 = vadd.f32 %v5377_v22, %v2894_v15 }
 0x44d   : > { %3015 = vst.msk [vmem:[%s5384_s18 + $0x58] sm:$0xff] %vm3003_vm15, %v2900_v60 }
 0x44e   : > { %3014 = vst.msk [vmem:[%s5384_s18 + $0x50] sm:$0xff] %vm3003_vm15, %v2895_v34  ;;  %v3460_v43 = vpop.f32.mrb[28].mxu0 }
 0x44f   : > { %v2910_v17 = vadd.f32 %v3460_v43, %v5377_v22  ;;  %v2904_v48 = vpop.f32.mrb[29].mxu0 }
 0x450   : > { %v2905_v55 = vadd.f32 %v5377_v22, %v2904_v48 }
 0x451   : > { %3017 = vst.msk [vmem:[%s5384_s18 + $0x68] sm:$0xff] %vm3003_vm15, %v2910_v17 }
 0x452   : > { %3016 = vst.msk [vmem:[%s5384_s18 + $0x60] sm:$0xff] %vm3003_vm15, %v2905_v55  ;;  %v3463_v33 = vpop.f32.mrb[30].mxu0 }
 0x453   : > { %v2920_v1 = vadd.f32 %v3463_v33, %v5377_v22  ;;  %v2914_v45 = vpop.f32.mrb[31].mxu0 }
 0x454   : > { %v2915_v18 = vadd.f32 %v5377_v22, %v2914_v45 }
 0x455   : > { %3019 = vst.msk [vmem:[%s5384_s18 + $0x78] sm:$0xff] %vm3003_vm15, %v2920_v1 }
 0x456   : > { %3018 = vst.msk [vmem:[%s5384_s18 + $0x70] sm:$0xff] %vm3003_vm15, %v2915_v18  ;;  %v3466_v36 = vpop.f32.mrb[32].mxu0 }
 0x457   : > { %v2930_v16 = vadd.f32 %v3466_v36, %v5377_v22  ;;  %v2924_v8 = vpop.f32.mrb[33].mxu0 }
 0x458   : > { %v2925_v42 = vadd.f32 %v5377_v22, %v2924_v8 }
 0x459   : > { %3021 = vst.msk [vmem:[%s5384_s18 + $0x88] sm:$0xff] %vm3003_vm15, %v2930_v16 }
 0x45a   : > { %3020 = vst.msk [vmem:[%s5384_s18 + $0x80] sm:$0xff] %vm3003_vm15, %v2925_v42 }
 0x46d   : > { %v3469_v2 = vpop.f32.mrb[34].mxu0 }
 0x46e   : > { %v2940_v29 = vadd.f32 %v3469_v2, %v5377_v22  ;;  %v2934_v12 = vpop.f32.mrb[35].mxu0 }
 0x46f   : > { %v2935_v6 = vadd.f32 %v5377_v22, %v2934_v12 }
 0x470   : > { %3023 = vst.msk [vmem:[%s5384_s18 + $0x98] sm:$0xff] %vm3003_vm15, %v2940_v29 }
 0x471   : > { %3022 = vst.msk [vmem:[%s5384_s18 + $0x90] sm:$0xff] %vm3003_vm15, %v2935_v6 }
 0x48d   : > { %v3472_v35 = vpop.f32.mrb[36].mxu0 }
 0x48e   : > { %v2950_v9 = vadd.f32 %v3472_v35, %v5377_v22  ;;  %v2944_v4 = vpop.f32.mrb[37].mxu0 }
 0x48f   : > { %v2945_v14 = vadd.f32 %v5377_v22, %v2944_v4 }
 0x490   : > { %3025 = vst.msk [vmem:[%s5384_s18 + $0xa8] sm:$0xff] %vm3003_vm15, %v2950_v9 }
 0x491   : > { %3024 = vst.msk [vmem:[%s5384_s18 + $0xa0] sm:$0xff] %vm3003_vm15, %v2945_v14 }
 0x4ad   : > { %v3475_v56 = vpop.f32.mrb[38].mxu0 }
 0x4ae   : > { %v2960_v50 = vadd.f32 %v3475_v56, %v5377_v22  ;;  %v2954_v59 = vpop.f32.mrb[39].mxu0 }
 0x4af   : > { %v2955_v13 = vadd.f32 %v5377_v22, %v2954_v59 }
 0x4b0   : > { %3027 = vst.msk [vmem:[%s5384_s18 + $0xb8] sm:$0xff] %vm3003_vm15, %v2960_v50 }
 0x4b1   : > { %3026 = vst.msk [vmem:[%s5384_s18 + $0xb0] sm:$0xff] %vm3003_vm15, %v2955_v13 }
 0x4cd   : > { %v3478_v57 = vpop.f32.mrb[40].mxu0 }
 0x4ce   : > { %v2970_v20 = vadd.f32 %v3478_v57, %v5377_v22  ;;  %v2964_v38 = vpop.f32.mrb[41].mxu0 }
 0x4cf   : > { %v2965_v10 = vadd.f32 %v5377_v22, %v2964_v38 }
 0x4d0   : > { %3029 = vst.msk [vmem:[%s5384_s18 + $0xc8] sm:$0xff] %vm3003_vm15, %v2970_v20 }
 0x4d1   : > { %3028 = vst.msk [vmem:[%s5384_s18 + $0xc0] sm:$0xff] %vm3003_vm15, %v2965_v10 }
 0x4ed   : > { %v3481_v19 = vpop.f32.mrb[42].mxu0 }
 0x4ee   : > { %v2980_v32 = vadd.f32 %v3481_v19, %v5377_v22  ;;  %v2974_v47 = vpop.f32.mrb[43].mxu0 }
 0x4ef   : > { %v2975_v24 = vadd.f32 %v5377_v22, %v2974_v47 }
 0x4f0   : > { %3031 = vst.msk [vmem:[%s5384_s18 + $0xd8] sm:$0xff] %vm3003_vm15, %v2980_v32 }
 0x4f1   : > { %3030 = vst.msk [vmem:[%s5384_s18 + $0xd0] sm:$0xff] %vm3003_vm15, %v2975_v24 }
 0x50c   : > { %v3484_v23 = vpop.f32.mrb[44].mxu0 }
 0x50d   : > { %v2990_v5 = vadd.f32 %v3484_v23, %v5377_v22  ;;  %v2984_v39 = vpop.f32.mrb[45].mxu0 }
 0x50e   : > { %v2985_v11 = vadd.f32 %v5377_v22, %v2984_v39 }
 0x50f   : > { %3033 = vst.msk [vmem:[%s5384_s18 + $0xe8] sm:$0xff] %vm3003_vm15, %v2990_v5 }
 0x510   : > { %3032 = vst.msk [vmem:[%s5384_s18 + $0xe0] sm:$0xff] %vm3003_vm15, %v2985_v11 }
 0x517   : > { %v3487_v28 = vpop.f32.mrb[46].mxu0 }
 0x518   : > { %v3000_v27 = vadd.f32 %v3487_v28, %v5377_v22  ;;  %v2994_v44 = vpop.f32.mrb[47].mxu0 }
 0x519   : > { %v2995_v62 = vadd.f32 %v5377_v22, %v2994_v44 }
 0x51a   : > { %3035 = vst.msk [vmem:[%s5384_s18 + $0xf8] sm:$0xff] %vm3003_vm15, %v3000_v27 }
 0x51b   : > { %3034 = vst.msk [vmem:[%s5384_s18 + $0xf0] sm:$0xff] %vm3003_vm15, %v2995_v62 }
 0x51c   : > { %3586 = shalt.err (!%p3583_p3)
}
 0x51d   : > { %s3587_s9 = scalar_lea.hbm %s5487_s29, 4096  ;;  %s3591_s18 = scalar_lea.hbm %s5547_s7, 8192 }
 0x51e   : > { %p3588_p4 = scmp.ne.s32.totalorder %s5487_s29, %s3587_s9  ;;  %p3592_p9 = scmp.lt.u32.totalorder %s5487_s29, %s5547_s7 }
 0x51f   : > { %p3593_p10 = scmp.lt.u32.totalorder %s3591_s18, %s3587_s9  ;;  %p3595_p12 = scmp.lt.u32.totalorder %s3587_s9, %s5487_s29 }
 0x520   : > { %p3589_p7 = pnand %p3588_p4, %p3726_p5 }
 0x521   : > { %p3594_p11 = por %p3593_p10, %p3592_p9 }
 0x522   : > { %p3590_p8 = pneg %p3589_p7 }
 0x523   : > { %p3596_p13 = por %p3595_p12, %p3594_p11 }
 0x525   : > { %p3597_p0 = pnand %p3596_p13, %p3590_p8 }
 0x527   : > { %3600 = shalt.err (!%p3597_p0)
}
 0x528   : > { %s3647_s16 = smov 128  }
 0x529   : > { %3498 = dma.vmem_to_hbm [thread:$0]  (%p3726_p5), %s5490_s22, 4096, %s5487_s29, %s5498_s28, %s3647_s16, %s3647_s16, %s3638_s20  }
 0x52a PF: > { %p3504_p1 = scmp.ge.s32.totalorder %s3635_s27, 2  ;;  %s3065_s17 = sand.u32 1, %s3623_s24  }
 0x52b   : > { %s3066_s21 = scalar_lea.sflag [#allocation4], %s3065_s17 }
 0x52c   : > { %p3501_p2 = pnand %p3504_p1, %p3730_p6 }
 0x52e   : > { %3618 = dma.done.wait (!%p3501_p2), %s3066_s21, 4096  }
 0x52f   : > { %3620 = vsyncadd (!%p3501_p2), %s3066_s21, 4294963200  ;;  %p17_p3 = scmp.ge.s32.totalorder %s3713_s30, 4   ;;  %s5655_s24 = smov %s3627_s25 }
 0x530   : > { %s5656_s25 = smov %s3631_s26  ;;  %s5657_s26 = smov %s3724_s10 }
 0x531   : > { %s5658_s27 = smov %s3713_s30  ;;  %19 = sbr.rel (!%p17_p3) target bundleno = 3 (0x3), region = 83 }
 0x538   :  { %3071 = vsyncpa [#allocation4], 1 }
 0x539   :  { %3073 = vsyncpa [#allocation4 + $0x1], 1 }

</bundles_post_ra>
